<compile_context>
chip_gen: v7x
topology: tpu7x:2x2x1
jax: 0.10.0
libtpu: 0.0.40
codegen_flags: <defaults>
</compile_context>

<pallas_src>
import math
from functools import partial

import jax
import jax.numpy as jnp
from jax.experimental import pallas as pl
from jax.experimental.pallas import tpu as pltpu

LN_EPS = 1e-5


# ---------------------------------------------------------------------------
# helpers (usable both inside the kernel and in the pure-JAX reference)
# ---------------------------------------------------------------------------
def _layer_norm(x, w, b, eps=LN_EPS):
    mean = jnp.mean(x, axis=-1, keepdims=True)
    var = jnp.mean(jnp.square(x - mean), axis=-1, keepdims=True)
    return (x - mean) * jax.lax.rsqrt(var + eps) * w + b


def _gelu_tanh(x):
    # TODO(synk): exact erf GELU (PyTorch default) replaced by tanh approximation.
    c = math.sqrt(2.0 / math.pi)
    return 0.5 * x * (1.0 + jnp.tanh(c * (x + 0.044715 * x * x * x)))


def _const_spec(shape):
    n = len(shape)
    return pl.BlockSpec(shape, lambda b: (0,) * n)


# ---------------------------------------------------------------------------
# the single fused kernel: prep + n_layer blocks + head, one grid step per batch
# ---------------------------------------------------------------------------
def _fused_kernel(v_ref, a_ref, off_ref, mod_ref, pos_ref, bands_ref,
                  lnvw_ref, lnvb_ref, lnaw_ref, lnab_ref,
                  ln1w_ref, ln1b_ref,
                  wq_ref, bq_ref, wk_ref, bk_ref, wv_ref, bv_ref,
                  wp_ref, bp_ref,
                  ln2w_ref, ln2b_ref,
                  w1_ref, b1_ref, w2_ref, b2_ref,
                  lnfw_ref, lnfb_ref, wh_ref, bh_ref,
                  o_ref, x_buf,
                  *, sv, sa, n_layer, n_head, eps):
    # ---- 1) assemble x = [OFF | LN_v(v) | MOD | LN_a(a)] + pos  (all in VMEM) ----
    x_buf[0:1, :] = off_ref[...]
    x_buf[1:1 + sv, :] = _layer_norm(v_ref[...], lnvw_ref[...], lnvb_ref[...], eps)
    x_buf[1 + sv:2 + sv, :] = mod_ref[...]
    x_buf[2 + sv:2 + sv + sa, :] = _layer_norm(a_ref[...], lnaw_ref[...], lnab_ref[...], eps)
    x = x_buf[...] + pos_ref[...]                          # (S, D) f32

    s, d = x.shape
    hd = d // n_head
    scale = 1.0 / math.sqrt(hd)
    bands = bands_ref[...]                                 # (H, 1, D), hoisted once

    # ---- 2) transformer blocks (static unroll; weights stay VMEM-resident) ----
    for l in range(n_layer):
        # ---- self-attention: x = x + proj(MHA(ln1(x))) ----
        h = _layer_norm(x, ln1w_ref[l], ln1b_ref[l], eps)
        hb = h.astype(jnp.bfloat16)
        q = jnp.dot(hb, wq_ref[l], preferred_element_type=jnp.float32) + bq_ref[l]
        k = jnp.dot(hb, wk_ref[l], preferred_element_type=jnp.float32) + bk_ref[l]
        vl = jnp.dot(hb, wv_ref[l], preferred_element_type=jnp.float32) + bv_ref[l]

        # stacked multi-head attention: one mask, one softmax, two matmul callsites
        q3 = (q[None, :, :] * bands).astype(jnp.bfloat16)               # (H,S,D) banded
        k3 = jnp.broadcast_to(k.astype(jnp.bfloat16)[None, :, :], (n_head, s, d))
        v3 = jnp.broadcast_to(vl.astype(jnp.bfloat16)[None, :, :], (n_head, s, d))
        sc = jnp.einsum("hqd,hkd->hqk", q3, k3,
                        preferred_element_type=jnp.float32) * scale     # (H,S,S)
        sc = sc - jnp.max(sc, axis=-1, keepdims=True)
        p = jnp.exp(sc)
        p = p / jnp.sum(p, axis=-1, keepdims=True)
        y3 = jnp.einsum("hqk,hkd->hqd", p.astype(jnp.bfloat16), v3,
                        preferred_element_type=jnp.float32)             # (H,S,D)
        y = jnp.sum(y3 * bands, axis=0)                    # heads occupy disjoint lane bands
        x = x + jnp.dot(y.astype(jnp.bfloat16), wp_ref[l],
                        preferred_element_type=jnp.float32) + bp_ref[l]

        # ---- MLP: x = x + W2(gelu(W1(ln2(x)))) ----
        h2 = _layer_norm(x, ln2w_ref[l], ln2b_ref[l], eps)
        m1 = jnp.dot(h2.astype(jnp.bfloat16), w1_ref[l],
                     preferred_element_type=jnp.float32) + b1_ref[l]
        m1 = _gelu_tanh(m1)
        x = x + jnp.dot(m1.astype(jnp.bfloat16), w2_ref[l],
                        preferred_element_type=jnp.float32) + b2_ref[l]

    # ---- 3) head: ln_f on the CLS row only + off_head linear ----
    x0 = _layer_norm(x[0:1, :], lnfw_ref[...], lnfb_ref[...], eps)
    o_ref[...] = (jnp.dot(x0.astype(jnp.bfloat16), wh_ref[...],
                          preferred_element_type=jnp.float32)
                  + bh_ref[...]).astype(o_ref.dtype)


def global_transformer_forward(v, a, params, *, n_head):
    B, Sv, D = v.shape
    Sa = a.shape[1]
    S = Sv + Sa + 2
    L = params["wq"].shape[0]
    C = params["wh"].shape[1]
    assert D % n_head == 0
    hd = D // n_head

    # (H, 1, D) lane-band selector, 1.0 inside head h's channel band (constant)
    head_bands = (jnp.arange(D)[None, :] // hd
                  == jnp.arange(n_head)[:, None]).astype(jnp.float32)[:, None, :]

    args = [v, a,
            params["OFF_tok"], params["MOD_tok"], params["pos_emb"], head_bands,
            params["lnv_w"], params["lnv_b"], params["lna_w"], params["lna_b"],
            params["ln1_w"], params["ln1_b"],
            params["wq"], params["bq"], params["wk"], params["bk"],
            params["wv"], params["bv"], params["wp"], params["bp"],
            params["ln2_w"], params["ln2_b"],
            params["w1"], params["b1"], params["w2"], params["b2"],
            params["lnf_w"], params["lnf_b"], params["wh"], params["bh"]]

    in_specs = [pl.BlockSpec((None, Sv, D), lambda b: (b, 0, 0)),
                pl.BlockSpec((None, Sa, D), lambda b: (b, 0, 0))]
    in_specs += [_const_spec(t.shape) for t in args[2:]]

    flops = int(B * (L * (8 * S * D * D               # q,k,v,proj projections
                          + 4 * n_head * S * S * D    # QK^T + P@V (band-masked full-D)
                          + 16 * S * D * D)           # MLP D->4D->D
                     + 2 * D * C))
    transc = int(B * L * (n_head * S * S + 4 * S * D))
    bytes_acc = int(sum(t.size * jnp.dtype(t.dtype).itemsize for t in args) + B * C * 4)

    out = pl.pallas_call(
        partial(_fused_kernel, sv=Sv, sa=Sa, n_layer=L, n_head=n_head, eps=LN_EPS),
        out_shape=jax.ShapeDtypeStruct((B, 1, C), jnp.float32),
        grid_spec=pltpu.PrefetchScalarGridSpec(
            num_scalar_prefetch=0,
            grid=(B,),
            in_specs=in_specs,
            out_specs=pl.BlockSpec((None, 1, C), lambda b: (b, 0, 0)),
            scratch_shapes=[pltpu.VMEM((S, D), jnp.float32)],
        ),
        compiler_params=pltpu.CompilerParams(dimension_semantics=("parallel",)),
        cost_estimate=pl.CostEstimate(flops=flops, transcendentals=transc,
                                      bytes_accessed=bytes_acc),
    )(*args)
    return out[:, 0, :]


# ---------------------------------------------------------------------------
# deterministic parameter construction + pure-JAX reference
# ---------------------------------------------------------------------------
def init_params(key, *, n_embd, n_layer, seq_len, n_cls, w_scale=0.2):
    D = n_embd
    f32 = jnp.float32
    ks = jax.random.split(key, 20)

    def nrm(k, shape):
        return jax.random.normal(k, shape, f32) * w_scale

    return dict(
        OFF_tok=jax.random.normal(ks[0], (1, D), f32),
        MOD_tok=jax.random.normal(ks[1], (1, D), f32),
        pos_emb=jax.random.normal(ks[2], (seq_len, D), f32),
        lnv_w=jnp.ones((1, D), f32), lnv_b=jnp.zeros((1, D), f32),
        lna_w=jnp.ones((1, D), f32), lna_b=jnp.zeros((1, D), f32),
        lnf_w=jnp.ones((1, D), f32), lnf_b=jnp.zeros((1, D), f32),
        ln1_w=jnp.ones((n_layer, 1, D), f32), ln1_b=jnp.zeros((n_layer, 1, D), f32),
        ln2_w=jnp.ones((n_layer, 1, D), f32), ln2_b=jnp.zeros((n_layer, 1, D), f32),
        wq=nrm(ks[3], (n_layer, D, D)).astype(jnp.bfloat16), bq=nrm(ks[4], (n_layer, 1, D)),
        wk=nrm(ks[5], (n_layer, D, D)).astype(jnp.bfloat16), bk=nrm(ks[6], (n_layer, 1, D)),
        wv=nrm(ks[7], (n_layer, D, D)).astype(jnp.bfloat16), bv=nrm(ks[8], (n_layer, 1, D)),
        wp=nrm(ks[9], (n_layer, D, D)).astype(jnp.bfloat16), bp=nrm(ks[10], (n_layer, 1, D)),
        w1=nrm(ks[11], (n_layer, D, 4 * D)).astype(jnp.bfloat16),
        b1=nrm(ks[12], (n_layer, 1, 4 * D)),
        w2=nrm(ks[13], (n_layer, 4 * D, D)).astype(jnp.bfloat16),
        b2=nrm(ks[14], (n_layer, 1, D)),
        wh=nrm(ks[15], (D, n_cls)).astype(jnp.bfloat16), bh=nrm(ks[16], (1, n_cls)),
    )


def reference_forward(v, a, p, *, n_head):
    """Pure-JAX GlobalTransformer forward with the same bf16-operand MXU numerics."""
    B, Sv, D = v.shape
    hd = D // n_head

    def mm(x, w):
        return jnp.dot(x.astype(jnp.bfloat16), w.astype(jnp.bfloat16),
                       preferred_element_type=jnp.float32)

    off = jnp.broadcast_to(p["OFF_tok"][None, :, :], (B, 1, D))
    mod = jnp.broadcast_to(p["MOD_tok"][None, :, :], (B, 1, D))
    vn = _layer_norm(v, p["lnv_w"], p["lnv_b"])
    an = _layer_norm(a, p["lna_w"], p["lna_b"])
    x = jnp.concatenate([off, vn, mod, an], axis=1) + p["pos_emb"][None, :, :]
    S = x.shape[1]
    L = p["wq"].shape[0]
    for l in range(L):
        h = _layer_norm(x, p["ln1_w"][l], p["ln1_b"][l])
        q = mm(h, p["wq"][l]) + p["bq"][l]
        k = mm(h, p["wk"][l]) + p["bk"][l]
        w = mm(h, p["wv"][l]) + p["bv"][l]
        qh = q.reshape(B, S, n_head, hd).transpose(0, 2, 1, 3)
        kh = k.reshape(B, S, n_head, hd).transpose(0, 2, 1, 3)
        wh_ = w.reshape(B, S, n_head, hd).transpose(0, 2, 1, 3)
        att = jnp.einsum("bhqd,bhkd->bhqk", qh.astype(jnp.bfloat16),
                         kh.astype(jnp.bfloat16),
                         preferred_element_type=jnp.float32) / math.sqrt(hd)
        att = jax.nn.softmax(att, axis=-1)
        y = jnp.einsum("bhqk,bhkd->bhqd", att.astype(jnp.bfloat16),
                       wh_.astype(jnp.bfloat16),
                       preferred_element_type=jnp.float32)
        y = y.transpose(0, 2, 1, 3).reshape(B, S, D)
        x = x + mm(y, p["wp"][l]) + p["bp"][l]
        h2 = _layer_norm(x, p["ln2_w"][l], p["ln2_b"][l])
        m = _gelu_tanh(mm(h2, p["w1"][l]) + p["b1"][l])
        x = x + mm(m, p["w2"][l]) + p["b2"][l]
    x0 = _layer_norm(x[:, 0, :], p["lnf_w"], p["lnf_b"])
    return mm(x0, p["wh"]) + p["bh"]


# ---------------------------------------------------------------------------
if __name__ == "__main__":
    # Toy config consistent with the module: n_embd=32, n_head=4, n_layer=2,
    # Sv=Sa=8 visual/audio tokens, 21 offset classes.
    B, SV, SA = 2, 8, 8
    N_EMBD, N_HEAD, N_LAYER, N_CLS = 32, 4, 2, 21
    S = 1 + SV + 1 + SA                      # [OFF] + vis + [MOD] + aud

    key = jax.random.PRNGKey(0)
    kv, ka, kp = jax.random.split(key, 3)
    v = jax.random.normal(kv, (B, SV, N_EMBD), jnp.float32)
    a = jax.random.normal(ka, (B, SA, N_EMBD), jnp.float32)
    params = init_params(kp, n_embd=N_EMBD, n_layer=N_LAYER, seq_len=S, n_cls=N_CLS)

    fwd = jax.jit(lambda v_, a_, p_: global_transformer_forward(v_, a_, p_, n_head=N_HEAD))
    out = jax.block_until_ready(fwd(v, a, params))
    assert out.shape == (B, N_CLS), out.shape
    assert bool(jnp.all(jnp.isfinite(out)))

    ref = jax.block_until_ready(reference_forward(v, a, params, n_head=N_HEAD))
    max_err = float(jnp.max(jnp.abs(out - ref)))
    assert max_err < 2e-2, f"mismatch vs pure-JAX reference: max abs err {max_err}"

    print("KERNEL_OK")
</pallas_src>

<mosaic_0001>
module attributes {stable_mosaic.version = 11 : i64} {
  func.func @_fused_kernel(%arg0: i32, %arg1: memref<1x8x32xf32, #tpu.memory_space<vmem>>, %arg2: memref<1x8x32xf32, #tpu.memory_space<vmem>>, %arg3: memref<1x32xf32, #tpu.memory_space<vmem>>, %arg4: memref<1x32xf32, #tpu.memory_space<vmem>>, %arg5: memref<18x32xf32, #tpu.memory_space<vmem>>, %arg6: memref<4x1x32xf32, #tpu.memory_space<vmem>>, %arg7: memref<1x32xf32, #tpu.memory_space<vmem>>, %arg8: memref<1x32xf32, #tpu.memory_space<vmem>>, %arg9: memref<1x32xf32, #tpu.memory_space<vmem>>, %arg10: memref<1x32xf32, #tpu.memory_space<vmem>>, %arg11: memref<2x1x32xf32, #tpu.memory_space<vmem>>, %arg12: memref<2x1x32xf32, #tpu.memory_space<vmem>>, %arg13: memref<2x32x32xbf16, #tpu.memory_space<vmem>>, %arg14: memref<2x1x32xf32, #tpu.memory_space<vmem>>, %arg15: memref<2x32x32xbf16, #tpu.memory_space<vmem>>, %arg16: memref<2x1x32xf32, #tpu.memory_space<vmem>>, %arg17: memref<2x32x32xbf16, #tpu.memory_space<vmem>>, %arg18: memref<2x1x32xf32, #tpu.memory_space<vmem>>, %arg19: memref<2x32x32xbf16, #tpu.memory_space<vmem>>, %arg20: memref<2x1x32xf32, #tpu.memory_space<vmem>>, %arg21: memref<2x1x32xf32, #tpu.memory_space<vmem>>, %arg22: memref<2x1x32xf32, #tpu.memory_space<vmem>>, %arg23: memref<2x32x128xbf16, #tpu.memory_space<vmem>>, %arg24: memref<2x1x128xf32, #tpu.memory_space<vmem>>, %arg25: memref<2x128x32xbf16, #tpu.memory_space<vmem>>, %arg26: memref<2x1x32xf32, #tpu.memory_space<vmem>>, %arg27: memref<1x32xf32, #tpu.memory_space<vmem>>, %arg28: memref<1x32xf32, #tpu.memory_space<vmem>>, %arg29: memref<32x21xbf16, #tpu.memory_space<vmem>>, %arg30: memref<1x21xf32, #tpu.memory_space<vmem>>, %arg31: memref<1x1x21xf32, #tpu.memory_space<vmem>>, %arg32: memref<18x32xf32, #tpu.memory_space<vmem>>) attributes {dimension_semantics = [#tpu.dimension_semantics<parallel>], iteration_bounds = array<i64: 2>, scalar_prefetch = 0 : i64, scratch_operands = 1 : i64, tpu.core_type = #tpu.core_type<tc>, window_params = [{transform_indices = @transform_0, window_bounds = array<i64: 1, 8, 32>}, {transform_indices = @transform_1, window_bounds = array<i64: 1, 8, 32>}, {pipeline_mode = #tpu.pipeline_mode<synchronous>, transform_indices = @transform_2, window_bounds = array<i64: 1, 32>}, {pipeline_mode = #tpu.pipeline_mode<synchronous>, transform_indices = @transform_3, window_bounds = array<i64: 1, 32>}, {pipeline_mode = #tpu.pipeline_mode<synchronous>, transform_indices = @transform_4, window_bounds = array<i64: 18, 32>}, {pipeline_mode = #tpu.pipeline_mode<synchronous>, transform_indices = @transform_5, window_bounds = array<i64: 4, 1, 32>}, {pipeline_mode = #tpu.pipeline_mode<synchronous>, transform_indices = @transform_6, window_bounds = array<i64: 1, 32>}, {pipeline_mode = #tpu.pipeline_mode<synchronous>, transform_indices = @transform_7, window_bounds = array<i64: 1, 32>}, {pipeline_mode = #tpu.pipeline_mode<synchronous>, transform_indices = @transform_8, window_bounds = array<i64: 1, 32>}, {pipeline_mode = #tpu.pipeline_mode<synchronous>, transform_indices = @transform_9, window_bounds = array<i64: 1, 32>}, {pipeline_mode = #tpu.pipeline_mode<synchronous>, transform_indices = @transform_10, window_bounds = array<i64: 2, 1, 32>}, {pipeline_mode = #tpu.pipeline_mode<synchronous>, transform_indices = @transform_11, window_bounds = array<i64: 2, 1, 32>}, {pipeline_mode = #tpu.pipeline_mode<synchronous>, transform_indices = @transform_12, window_bounds = array<i64: 2, 32, 32>}, {pipeline_mode = #tpu.pipeline_mode<synchronous>, transform_indices = @transform_13, window_bounds = array<i64: 2, 1, 32>}, {pipeline_mode = #tpu.pipeline_mode<synchronous>, transform_indices = @transform_14, window_bounds = array<i64: 2, 32, 32>}, {pipeline_mode = #tpu.pipeline_mode<synchronous>, transform_indices = @transform_15, window_bounds = array<i64: 2, 1, 32>}, {pipeline_mode = #tpu.pipeline_mode<synchronous>, transform_indices = @transform_16, window_bounds = array<i64: 2, 32, 32>}, {pipeline_mode = #tpu.pipeline_mode<synchronous>, transform_indices = @transform_17, window_bounds = array<i64: 2, 1, 32>}, {pipeline_mode = #tpu.pipeline_mode<synchronous>, transform_indices = @transform_18, window_bounds = array<i64: 2, 32, 32>}, {pipeline_mode = #tpu.pipeline_mode<synchronous>, transform_indices = @transform_19, window_bounds = array<i64: 2, 1, 32>}, {pipeline_mode = #tpu.pipeline_mode<synchronous>, transform_indices = @transform_20, window_bounds = array<i64: 2, 1, 32>}, {pipeline_mode = #tpu.pipeline_mode<synchronous>, transform_indices = @transform_21, window_bounds = array<i64: 2, 1, 32>}, {pipeline_mode = #tpu.pipeline_mode<synchronous>, transform_indices = @transform_22, window_bounds = array<i64: 2, 32, 128>}, {pipeline_mode = #tpu.pipeline_mode<synchronous>, transform_indices = @transform_23, window_bounds = array<i64: 2, 1, 128>}, {pipeline_mode = #tpu.pipeline_mode<synchronous>, transform_indices = @transform_24, window_bounds = array<i64: 2, 128, 32>}, {pipeline_mode = #tpu.pipeline_mode<synchronous>, transform_indices = @transform_25, window_bounds = array<i64: 2, 1, 32>}, {pipeline_mode = #tpu.pipeline_mode<synchronous>, transform_indices = @transform_26, window_bounds = array<i64: 1, 32>}, {pipeline_mode = #tpu.pipeline_mode<synchronous>, transform_indices = @transform_27, window_bounds = array<i64: 1, 32>}, {pipeline_mode = #tpu.pipeline_mode<synchronous>, transform_indices = @transform_28, window_bounds = array<i64: 32, 21>}, {pipeline_mode = #tpu.pipeline_mode<synchronous>, transform_indices = @transform_29, window_bounds = array<i64: 1, 21>}, {transform_indices = @transform_30, window_bounds = array<i64: 1, 1, 21>}]} {
    %c0 = arith.constant 0 : index
    %c0_0 = arith.constant 0 : index
    %0 = vector.load %arg3[%c0, %c0_0] : memref<1x32xf32, #tpu.memory_space<vmem>>, vector<1x32xf32>
    %c0_1 = arith.constant 0 : index
    %c0_2 = arith.constant 0 : index
    %1 = vector.load %arg32[%c0_1, %c0_2] : memref<18x32xf32, #tpu.memory_space<vmem>>, vector<1x32xf32>
    tpu.vector_store %arg32[%c0_1, %c0_2], %0 {strides = array<i32>} : memref<18x32xf32, #tpu.memory_space<vmem>>, vector<1x32xf32>,
    %c0_3 = arith.constant 0 : index
    %c0_4 = arith.constant 0 : index
    %c0_5 = arith.constant 0 : index
    %2 = vector.load %arg1[%c0_3, %c0_4, %c0_5] : memref<1x8x32xf32, #tpu.memory_space<vmem>>, vector<1x8x32xf32>
    %3 = vector.shape_cast %2 : vector<1x8x32xf32> to vector<8x32xf32>
    %c0_6 = arith.constant 0 : index
    %c0_7 = arith.constant 0 : index
    %4 = vector.load %arg7[%c0_6, %c0_7] : memref<1x32xf32, #tpu.memory_space<vmem>>, vector<1x32xf32>
    %c0_8 = arith.constant 0 : index
    %c0_9 = arith.constant 0 : index
    %5 = vector.load %arg8[%c0_8, %c0_9] : memref<1x32xf32, #tpu.memory_space<vmem>>, vector<1x32xf32>
    %cst = arith.constant dense<0.000000e+00> : vector<8xf32>
    %6 = vector.multi_reduction <add>, %3, %cst [1] : vector<8x32xf32> to vector<8xf32>
    %7 = vector.shape_cast %6 : vector<8xf32> to vector<8x1xf32>
    %cst_10 = arith.constant 3.200000e+01 : f32
    %8 = vector.broadcast %cst_10 : f32 to vector<8x1xf32>
    %9 = arith.divf %7, %8 : vector<8x1xf32>
    %10 = vector.broadcast %9 : vector<8x1xf32> to vector<8x32xf32>
    %11 = arith.subf %3, %10 : vector<8x32xf32>
    %12 = arith.mulf %11, %11 : vector<8x32xf32>
    %cst_11 = arith.constant dense<0.000000e+00> : vector<8xf32>
    %13 = vector.multi_reduction <add>, %12, %cst_11 [1] : vector<8x32xf32> to vector<8xf32>
    %14 = vector.shape_cast %13 : vector<8xf32> to vector<8x1xf32>
    %cst_12 = arith.constant 3.200000e+01 : f32
    %15 = vector.broadcast %cst_12 : f32 to vector<8x1xf32>
    %16 = arith.divf %14, %15 : vector<8x1xf32>
    %17 = vector.broadcast %9 : vector<8x1xf32> to vector<8x32xf32>
    %18 = arith.subf %3, %17 : vector<8x32xf32>
    %cst_13 = arith.constant 9.99999974E-6 : f32
    %19 = vector.broadcast %cst_13 : f32 to vector<8x1xf32>
    %20 = arith.addf %16, %19 : vector<8x1xf32>
    %21 = math.rsqrt %20 : vector<8x1xf32>
    %22 = vector.broadcast %21 : vector<8x1xf32> to vector<8x32xf32>
    %23 = arith.mulf %18, %22 : vector<8x32xf32>
    %24 = vector.broadcast %4 : vector<1x32xf32> to vector<8x32xf32>
    %25 = arith.mulf %23, %24 : vector<8x32xf32>
    %26 = vector.broadcast %5 : vector<1x32xf32> to vector<8x32xf32>
    %27 = arith.addf %25, %26 : vector<8x32xf32>
    %c1 = arith.constant 1 : index
    %c0_14 = arith.constant 0 : index
    %28 = vector.load %arg32[%c1, %c0_14] : memref<18x32xf32, #tpu.memory_space<vmem>>, vector<8x32xf32>
    tpu.vector_store %arg32[%c1, %c0_14], %27 {strides = array<i32>} : memref<18x32xf32, #tpu.memory_space<vmem>>, vector<8x32xf32>,
    %c0_15 = arith.constant 0 : index
    %c0_16 = arith.constant 0 : index
    %29 = vector.load %arg4[%c0_15, %c0_16] : memref<1x32xf32, #tpu.memory_space<vmem>>, vector<1x32xf32>
    %c9 = arith.constant 9 : index
    %c0_17 = arith.constant 0 : index
    %30 = vector.load %arg32[%c9, %c0_17] : memref<18x32xf32, #tpu.memory_space<vmem>>, vector<1x32xf32>
    tpu.vector_store %arg32[%c9, %c0_17], %29 {strides = array<i32>} : memref<18x32xf32, #tpu.memory_space<vmem>>, vector<1x32xf32>,
    %c0_18 = arith.constant 0 : index
    %c0_19 = arith.constant 0 : index
    %c0_20 = arith.constant 0 : index
    %31 = vector.load %arg2[%c0_18, %c0_19, %c0_20] : memref<1x8x32xf32, #tpu.memory_space<vmem>>, vector<1x8x32xf32>
    %32 = vector.shape_cast %31 : vector<1x8x32xf32> to vector<8x32xf32>
    %c0_21 = arith.constant 0 : index
    %c0_22 = arith.constant 0 : index
    %33 = vector.load %arg9[%c0_21, %c0_22] : memref<1x32xf32, #tpu.memory_space<vmem>>, vector<1x32xf32>
    %c0_23 = arith.constant 0 : index
    %c0_24 = arith.constant 0 : index
    %34 = vector.load %arg10[%c0_23, %c0_24] : memref<1x32xf32, #tpu.memory_space<vmem>>, vector<1x32xf32>
    %cst_25 = arith.constant dense<0.000000e+00> : vector<8xf32>
    %35 = vector.multi_reduction <add>, %32, %cst_25 [1] : vector<8x32xf32> to vector<8xf32>
    %36 = vector.shape_cast %35 : vector<8xf32> to vector<8x1xf32>
    %cst_26 = arith.constant 3.200000e+01 : f32
    %37 = vector.broadcast %cst_26 : f32 to vector<8x1xf32>
    %38 = arith.divf %36, %37 : vector<8x1xf32>
    %39 = vector.broadcast %38 : vector<8x1xf32> to vector<8x32xf32>
    %40 = arith.subf %32, %39 : vector<8x32xf32>
    %41 = arith.mulf %40, %40 : vector<8x32xf32>
    %cst_27 = arith.constant dense<0.000000e+00> : vector<8xf32>
    %42 = vector.multi_reduction <add>, %41, %cst_27 [1] : vector<8x32xf32> to vector<8xf32>
    %43 = vector.shape_cast %42 : vector<8xf32> to vector<8x1xf32>
    %cst_28 = arith.constant 3.200000e+01 : f32
    %44 = vector.broadcast %cst_28 : f32 to vector<8x1xf32>
    %45 = arith.divf %43, %44 : vector<8x1xf32>
    %46 = vector.broadcast %38 : vector<8x1xf32> to vector<8x32xf32>
    %47 = arith.subf %32, %46 : vector<8x32xf32>
    %cst_29 = arith.constant 9.99999974E-6 : f32
    %48 = vector.broadcast %cst_29 : f32 to vector<8x1xf32>
    %49 = arith.addf %45, %48 : vector<8x1xf32>
    %50 = math.rsqrt %49 : vector<8x1xf32>
    %51 = vector.broadcast %50 : vector<8x1xf32> to vector<8x32xf32>
    %52 = arith.mulf %47, %51 : vector<8x32xf32>
    %53 = vector.broadcast %33 : vector<1x32xf32> to vector<8x32xf32>
    %54 = arith.mulf %52, %53 : vector<8x32xf32>
    %55 = vector.broadcast %34 : vector<1x32xf32> to vector<8x32xf32>
    %56 = arith.addf %54, %55 : vector<8x32xf32>
    %c10 = arith.constant 10 : index
    %c0_30 = arith.constant 0 : index
    %57 = vector.load %arg32[%c10, %c0_30] : memref<18x32xf32, #tpu.memory_space<vmem>>, vector<8x32xf32>
    tpu.vector_store %arg32[%c10, %c0_30], %56 {strides = array<i32>} : memref<18x32xf32, #tpu.memory_space<vmem>>, vector<8x32xf32>,
    %c0_31 = arith.constant 0 : index
    %c0_32 = arith.constant 0 : index
    %58 = vector.load %arg32[%c0_31, %c0_32] : memref<18x32xf32, #tpu.memory_space<vmem>>, vector<18x32xf32>
    %c0_33 = arith.constant 0 : index
    %c0_34 = arith.constant 0 : index
    %59 = vector.load %arg5[%c0_33, %c0_34] : memref<18x32xf32, #tpu.memory_space<vmem>>, vector<18x32xf32>
    %60 = arith.addf %58, %59 : vector<18x32xf32>
    %c0_35 = arith.constant 0 : index
    %c0_36 = arith.constant 0 : index
    %c0_37 = arith.constant 0 : index
    %61 = vector.load %arg6[%c0_35, %c0_36, %c0_37] : memref<4x1x32xf32, #tpu.memory_space<vmem>>, vector<4x1x32xf32>
    %c0_38 = arith.constant 0 : index
    %c0_39 = arith.constant 0 : index
    %c0_40 = arith.constant 0 : index
    %62 = vector.load %arg11[%c0_38, %c0_39, %c0_40] : memref<2x1x32xf32, #tpu.memory_space<vmem>>, vector<1x1x32xf32>
    %63 = vector.shape_cast %62 : vector<1x1x32xf32> to vector<1x32xf32>
    %c0_41 = arith.constant 0 : index
    %c0_42 = arith.constant 0 : index
    %c0_43 = arith.constant 0 : index
    %64 = vector.load %arg12[%c0_41, %c0_42, %c0_43] : memref<2x1x32xf32, #tpu.memory_space<vmem>>, vector<1x1x32xf32>
    %65 = vector.shape_cast %64 : vector<1x1x32xf32> to vector<1x32xf32>
    %cst_44 = arith.constant dense<0.000000e+00> : vector<18xf32>
    %66 = vector.multi_reduction <add>, %60, %cst_44 [1] : vector<18x32xf32> to vector<18xf32>
    %67 = vector.shape_cast %66 : vector<18xf32> to vector<18x1xf32>
    %cst_45 = arith.constant 3.200000e+01 : f32
    %68 = vector.broadcast %cst_45 : f32 to vector<18x1xf32>
    %69 = arith.divf %67, %68 : vector<18x1xf32>
    %70 = vector.broadcast %69 : vector<18x1xf32> to vector<18x32xf32>
    %71 = arith.subf %60, %70 : vector<18x32xf32>
    %72 = arith.mulf %71, %71 : vector<18x32xf32>
    %cst_46 = arith.constant dense<0.000000e+00> : vector<18xf32>
    %73 = vector.multi_reduction <add>, %72, %cst_46 [1] : vector<18x32xf32> to vector<18xf32>
    %74 = vector.shape_cast %73 : vector<18xf32> to vector<18x1xf32>
    %cst_47 = arith.constant 3.200000e+01 : f32
    %75 = vector.broadcast %cst_47 : f32 to vector<18x1xf32>
    %76 = arith.divf %74, %75 : vector<18x1xf32>
    %77 = vector.broadcast %69 : vector<18x1xf32> to vector<18x32xf32>
    %78 = arith.subf %60, %77 : vector<18x32xf32>
    %cst_48 = arith.constant 9.99999974E-6 : f32
    %79 = vector.broadcast %cst_48 : f32 to vector<18x1xf32>
    %80 = arith.addf %76, %79 : vector<18x1xf32>
    %81 = math.rsqrt %80 : vector<18x1xf32>
    %82 = vector.broadcast %81 : vector<18x1xf32> to vector<18x32xf32>
    %83 = arith.mulf %78, %82 : vector<18x32xf32>
    %84 = vector.broadcast %63 : vector<1x32xf32> to vector<18x32xf32>
    %85 = arith.mulf %83, %84 : vector<18x32xf32>
    %86 = vector.broadcast %65 : vector<1x32xf32> to vector<18x32xf32>
    %87 = arith.addf %85, %86 : vector<18x32xf32>
    %88 = arith.truncf %87 : vector<18x32xf32> to vector<18x32xbf16>
    %c0_49 = arith.constant 0 : index
    %c0_50 = arith.constant 0 : index
    %c0_51 = arith.constant 0 : index
    %89 = vector.load %arg13[%c0_49, %c0_50, %c0_51] : memref<2x32x32xbf16, #tpu.memory_space<vmem>>, vector<1x32x32xbf16>
    %90 = vector.shape_cast %89 : vector<1x32x32xbf16> to vector<32x32xbf16>
    %cst_52 = arith.constant dense<0.000000e+00> : vector<18x32xf32>
    %91 = tpu.matmul %88, %90, %cst_52 {dimension_numbers = #tpu.dot_dimension_numbers<[1], [0], [0], [1], [0, 0, 1, 1], [], []>} : vector<18x32xbf16>, vector<32x32xbf16>, vector<18x32xf32> -> vector<18x32xf32>
    %c0_53 = arith.constant 0 : index
    %c0_54 = arith.constant 0 : index
    %c0_55 = arith.constant 0 : index
    %92 = vector.load %arg14[%c0_53, %c0_54, %c0_55] : memref<2x1x32xf32, #tpu.memory_space<vmem>>, vector<1x1x32xf32>
    %93 = vector.shape_cast %92 : vector<1x1x32xf32> to vector<1x32xf32>
    %94 = vector.broadcast %93 : vector<1x32xf32> to vector<18x32xf32>
    %95 = arith.addf %91, %94 : vector<18x32xf32>
    %c0_56 = arith.constant 0 : index
    %c0_57 = arith.constant 0 : index
    %c0_58 = arith.constant 0 : index
    %96 = vector.load %arg15[%c0_56, %c0_57, %c0_58] : memref<2x32x32xbf16, #tpu.memory_space<vmem>>, vector<1x32x32xbf16>
    %97 = vector.shape_cast %96 : vector<1x32x32xbf16> to vector<32x32xbf16>
    %cst_59 = arith.constant dense<0.000000e+00> : vector<18x32xf32>
    %98 = tpu.matmul %88, %97, %cst_59 {dimension_numbers = #tpu.dot_dimension_numbers<[1], [0], [0], [1], [0, 0, 1, 1], [], []>} : vector<18x32xbf16>, vector<32x32xbf16>, vector<18x32xf32> -> vector<18x32xf32>
    %c0_60 = arith.constant 0 : index
    %c0_61 = arith.constant 0 : index
    %c0_62 = arith.constant 0 : index
    %99 = vector.load %arg16[%c0_60, %c0_61, %c0_62] : memref<2x1x32xf32, #tpu.memory_space<vmem>>, vector<1x1x32xf32>
    %100 = vector.shape_cast %99 : vector<1x1x32xf32> to vector<1x32xf32>
    %101 = vector.broadcast %100 : vector<1x32xf32> to vector<18x32xf32>
    %102 = arith.addf %98, %101 : vector<18x32xf32>
    %c0_63 = arith.constant 0 : index
    %c0_64 = arith.constant 0 : index
    %c0_65 = arith.constant 0 : index
    %103 = vector.load %arg17[%c0_63, %c0_64, %c0_65] : memref<2x32x32xbf16, #tpu.memory_space<vmem>>, vector<1x32x32xbf16>
    %104 = vector.shape_cast %103 : vector<1x32x32xbf16> to vector<32x32xbf16>
    %cst_66 = arith.constant dense<0.000000e+00> : vector<18x32xf32>
    %105 = tpu.matmul %88, %104, %cst_66 {dimension_numbers = #tpu.dot_dimension_numbers<[1], [0], [0], [1], [0, 0, 1, 1], [], []>} : vector<18x32xbf16>, vector<32x32xbf16>, vector<18x32xf32> -> vector<18x32xf32>
    %c0_67 = arith.constant 0 : index
    %c0_68 = arith.constant 0 : index
    %c0_69 = arith.constant 0 : index
    %106 = vector.load %arg18[%c0_67, %c0_68, %c0_69] : memref<2x1x32xf32, #tpu.memory_space<vmem>>, vector<1x1x32xf32>
    %107 = vector.shape_cast %106 : vector<1x1x32xf32> to vector<1x32xf32>
    %108 = vector.broadcast %107 : vector<1x32xf32> to vector<18x32xf32>
    %109 = arith.addf %105, %108 : vector<18x32xf32>
    %110 = vector.shape_cast %95 : vector<18x32xf32> to vector<1x18x32xf32>
    %111 = vector.broadcast %110 : vector<1x18x32xf32> to vector<4x18x32xf32>
    %112 = vector.broadcast %61 : vector<4x1x32xf32> to vector<4x18x32xf32>
    %113 = arith.mulf %111, %112 : vector<4x18x32xf32>
    %114 = arith.truncf %113 : vector<4x18x32xf32> to vector<4x18x32xbf16>
    %115 = arith.truncf %102 : vector<18x32xf32> to vector<18x32xbf16>
    %116 = vector.shape_cast %115 : vector<18x32xbf16> to vector<1x18x32xbf16>
    %117 = vector.shape_cast %116 : vector<1x18x32xbf16> to vector<1x18x32xbf16>
    %118 = vector.broadcast %117 : vector<1x18x32xbf16> to vector<4x18x32xbf16>
    %119 = arith.truncf %109 : vector<18x32xf32> to vector<18x32xbf16>
    %120 = vector.shape_cast %119 : vector<18x32xbf16> to vector<1x18x32xbf16>
    %121 = vector.shape_cast %120 : vector<1x18x32xbf16> to vector<1x18x32xbf16>
    %122 = vector.broadcast %121 : vector<1x18x32xbf16> to vector<4x18x32xbf16>
    "tpu.trace_start"() <{level = 10 : i32, message = "hqd,hkd->hqk"}> : () -> ()
    %cst_70 = arith.constant dense<0.000000e+00> : vector<4x18x18xf32>
    %123 = tpu.matmul %114, %118, %cst_70 {dimension_numbers = #tpu.dot_dimension_numbers<[2], [2], [1], [1], [0, 0, 0, 1, 1, 1], [0], [0]>} : vector<4x18x32xbf16>, vector<4x18x32xbf16>, vector<4x18x18xf32> -> vector<4x18x18xf32>
    "tpu.trace_stop"() : () -> ()
    %cst_71 = arith.constant 0.353553385 : f32
    %124 = vector.broadcast %cst_71 : f32 to vector<4x18x18xf32>
    %125 = arith.mulf %123, %124 : vector<4x18x18xf32>
    %cst_72 = arith.constant dense<0xFF800000> : vector<4x18xf32>
    %126 = vector.multi_reduction <maximumf>, %125, %cst_72 [2] : vector<4x18x18xf32> to vector<4x18xf32>
    %127 = vector.shape_cast %126 : vector<4x18xf32> to vector<4x18x1xf32>
    %128 = vector.broadcast %127 : vector<4x18x1xf32> to vector<4x18x18xf32>
    %129 = arith.subf %125, %128 : vector<4x18x18xf32>
    %130 = math.exp %129 : vector<4x18x18xf32>
    %cst_73 = arith.constant dense<0.000000e+00> : vector<4x18xf32>
    %131 = vector.multi_reduction <add>, %130, %cst_73 [2] : vector<4x18x18xf32> to vector<4x18xf32>
    %132 = vector.shape_cast %131 : vector<4x18xf32> to vector<4x18x1xf32>
    %133 = vector.broadcast %132 : vector<4x18x1xf32> to vector<4x18x18xf32>
    %134 = arith.divf %130, %133 : vector<4x18x18xf32>
    %135 = arith.truncf %134 : vector<4x18x18xf32> to vector<4x18x18xbf16>
    "tpu.trace_start"() <{level = 10 : i32, message = "hqk,hkd->hqd"}> : () -> ()
    %cst_74 = arith.constant dense<0.000000e+00> : vector<4x18x32xf32>
    %136 = tpu.matmul %135, %122, %cst_74 {dimension_numbers = #tpu.dot_dimension_numbers<[2], [1], [1], [2], [0, 0, 0, 1, 1, 2], [0], [0]>} : vector<4x18x18xbf16>, vector<4x18x32xbf16>, vector<4x18x32xf32> -> vector<4x18x32xf32>
    "tpu.trace_stop"() : () -> ()
    %137 = vector.broadcast %61 : vector<4x1x32xf32> to vector<4x18x32xf32>
    %138 = arith.mulf %136, %137 : vector<4x18x32xf32>
    %cst_75 = arith.constant dense<0.000000e+00> : vector<18x32xf32>
    %139 = vector.multi_reduction <add>, %138, %cst_75 [0] : vector<4x18x32xf32> to vector<18x32xf32>
    %140 = arith.truncf %139 : vector<18x32xf32> to vector<18x32xbf16>
    %c0_76 = arith.constant 0 : index
    %c0_77 = arith.constant 0 : index
    %c0_78 = arith.constant 0 : index
    %141 = vector.load %arg19[%c0_76, %c0_77, %c0_78] : memref<2x32x32xbf16, #tpu.memory_space<vmem>>, vector<1x32x32xbf16>
    %142 = vector.shape_cast %141 : vector<1x32x32xbf16> to vector<32x32xbf16>
    %cst_79 = arith.constant dense<0.000000e+00> : vector<18x32xf32>
    %143 = tpu.matmul %140, %142, %cst_79 {dimension_numbers = #tpu.dot_dimension_numbers<[1], [0], [0], [1], [0, 0, 1, 1], [], []>} : vector<18x32xbf16>, vector<32x32xbf16>, vector<18x32xf32> -> vector<18x32xf32>
    %144 = arith.addf %60, %143 : vector<18x32xf32>
    %c0_80 = arith.constant 0 : index
    %c0_81 = arith.constant 0 : index
    %c0_82 = arith.constant 0 : index
    %145 = vector.load %arg20[%c0_80, %c0_81, %c0_82] : memref<2x1x32xf32, #tpu.memory_space<vmem>>, vector<1x1x32xf32>
    %146 = vector.shape_cast %145 : vector<1x1x32xf32> to vector<1x32xf32>
    %147 = vector.broadcast %146 : vector<1x32xf32> to vector<18x32xf32>
    %148 = arith.addf %144, %147 : vector<18x32xf32>
    %c0_83 = arith.constant 0 : index
    %c0_84 = arith.constant 0 : index
    %c0_85 = arith.constant 0 : index
    %149 = vector.load %arg21[%c0_83, %c0_84, %c0_85] : memref<2x1x32xf32, #tpu.memory_space<vmem>>, vector<1x1x32xf32>
    %150 = vector.shape_cast %149 : vector<1x1x32xf32> to vector<1x32xf32>
    %c0_86 = arith.constant 0 : index
    %c0_87 = arith.constant 0 : index
    %c0_88 = arith.constant 0 : index
    %151 = vector.load %arg22[%c0_86, %c0_87, %c0_88] : memref<2x1x32xf32, #tpu.memory_space<vmem>>, vector<1x1x32xf32>
    %152 = vector.shape_cast %151 : vector<1x1x32xf32> to vector<1x32xf32>
    %cst_89 = arith.constant dense<0.000000e+00> : vector<18xf32>
    %153 = vector.multi_reduction <add>, %148, %cst_89 [1] : vector<18x32xf32> to vector<18xf32>
    %154 = vector.shape_cast %153 : vector<18xf32> to vector<18x1xf32>
    %cst_90 = arith.constant 3.200000e+01 : f32
    %155 = vector.broadcast %cst_90 : f32 to vector<18x1xf32>
    %156 = arith.divf %154, %155 : vector<18x1xf32>
    %157 = vector.broadcast %156 : vector<18x1xf32> to vector<18x32xf32>
    %158 = arith.subf %148, %157 : vector<18x32xf32>
    %159 = arith.mulf %158, %158 : vector<18x32xf32>
    %cst_91 = arith.constant dense<0.000000e+00> : vector<18xf32>
    %160 = vector.multi_reduction <add>, %159, %cst_91 [1] : vector<18x32xf32> to vector<18xf32>
    %161 = vector.shape_cast %160 : vector<18xf32> to vector<18x1xf32>
    %cst_92 = arith.constant 3.200000e+01 : f32
    %162 = vector.broadcast %cst_92 : f32 to vector<18x1xf32>
    %163 = arith.divf %161, %162 : vector<18x1xf32>
    %164 = vector.broadcast %156 : vector<18x1xf32> to vector<18x32xf32>
    %165 = arith.subf %148, %164 : vector<18x32xf32>
    %cst_93 = arith.constant 9.99999974E-6 : f32
    %166 = vector.broadcast %cst_93 : f32 to vector<18x1xf32>
    %167 = arith.addf %163, %166 : vector<18x1xf32>
    %168 = math.rsqrt %167 : vector<18x1xf32>
    %169 = vector.broadcast %168 : vector<18x1xf32> to vector<18x32xf32>
    %170 = arith.mulf %165, %169 : vector<18x32xf32>
    %171 = vector.broadcast %150 : vector<1x32xf32> to vector<18x32xf32>
    %172 = arith.mulf %170, %171 : vector<18x32xf32>
    %173 = vector.broadcast %152 : vector<1x32xf32> to vector<18x32xf32>
    %174 = arith.addf %172, %173 : vector<18x32xf32>
    %175 = arith.truncf %174 : vector<18x32xf32> to vector<18x32xbf16>
    %c0_94 = arith.constant 0 : index
    %c0_95 = arith.constant 0 : index
    %c0_96 = arith.constant 0 : index
    %176 = vector.load %arg23[%c0_94, %c0_95, %c0_96] : memref<2x32x128xbf16, #tpu.memory_space<vmem>>, vector<1x32x128xbf16>
    %177 = vector.shape_cast %176 : vector<1x32x128xbf16> to vector<32x128xbf16>
    %cst_97 = arith.constant dense<0.000000e+00> : vector<18x128xf32>
    %178 = tpu.matmul %175, %177, %cst_97 {dimension_numbers = #tpu.dot_dimension_numbers<[1], [0], [0], [1], [0, 0, 1, 1], [], []>} : vector<18x32xbf16>, vector<32x128xbf16>, vector<18x128xf32> -> vector<18x128xf32>
    %c0_98 = arith.constant 0 : index
    %c0_99 = arith.constant 0 : index
    %c0_100 = arith.constant 0 : index
    %179 = vector.load %arg24[%c0_98, %c0_99, %c0_100] : memref<2x1x128xf32, #tpu.memory_space<vmem>>, vector<1x1x128xf32>
    %180 = vector.shape_cast %179 : vector<1x1x128xf32> to vector<1x128xf32>
    %181 = vector.broadcast %180 : vector<1x128xf32> to vector<18x128xf32>
    %182 = arith.addf %178, %181 : vector<18x128xf32>
    %cst_101 = arith.constant 5.000000e-01 : f32
    %183 = vector.broadcast %cst_101 : f32 to vector<18x128xf32>
    %184 = arith.mulf %183, %182 : vector<18x128xf32>
    %cst_102 = arith.constant 4.471500e-02 : f32
    %185 = vector.broadcast %cst_102 : f32 to vector<18x128xf32>
    %186 = arith.mulf %185, %182 : vector<18x128xf32>
    %187 = arith.mulf %186, %182 : vector<18x128xf32>
    %188 = arith.mulf %187, %182 : vector<18x128xf32>
    %189 = arith.addf %182, %188 : vector<18x128xf32>
    %cst_103 = arith.constant 0.797884583 : f32
    %190 = vector.broadcast %cst_103 : f32 to vector<18x128xf32>
    %191 = arith.mulf %190, %189 : vector<18x128xf32>
    %192 = math.tanh %191 : vector<18x128xf32>
    %cst_104 = arith.constant 1.000000e+00 : f32
    %193 = vector.broadcast %cst_104 : f32 to vector<18x128xf32>
    %194 = arith.addf %193, %192 : vector<18x128xf32>
    %195 = arith.mulf %184, %194 : vector<18x128xf32>
    %196 = arith.truncf %195 : vector<18x128xf32> to vector<18x128xbf16>
    %c0_105 = arith.constant 0 : index
    %c0_106 = arith.constant 0 : index
    %c0_107 = arith.constant 0 : index
    %197 = vector.load %arg25[%c0_105, %c0_106, %c0_107] : memref<2x128x32xbf16, #tpu.memory_space<vmem>>, vector<1x128x32xbf16>
    %198 = vector.shape_cast %197 : vector<1x128x32xbf16> to vector<128x32xbf16>
    %cst_108 = arith.constant dense<0.000000e+00> : vector<18x32xf32>
    %199 = tpu.matmul %196, %198, %cst_108 {dimension_numbers = #tpu.dot_dimension_numbers<[1], [0], [0], [1], [0, 0, 1, 1], [], []>} : vector<18x128xbf16>, vector<128x32xbf16>, vector<18x32xf32> -> vector<18x32xf32>
    %200 = arith.addf %148, %199 : vector<18x32xf32>
    %c0_109 = arith.constant 0 : index
    %c0_110 = arith.constant 0 : index
    %c0_111 = arith.constant 0 : index
    %201 = vector.load %arg26[%c0_109, %c0_110, %c0_111] : memref<2x1x32xf32, #tpu.memory_space<vmem>>, vector<1x1x32xf32>
    %202 = vector.shape_cast %201 : vector<1x1x32xf32> to vector<1x32xf32>
    %203 = vector.broadcast %202 : vector<1x32xf32> to vector<18x32xf32>
    %204 = arith.addf %200, %203 : vector<18x32xf32>
    %c1_112 = arith.constant 1 : index
    %c0_113 = arith.constant 0 : index
    %c0_114 = arith.constant 0 : index
    %205 = vector.load %arg11[%c1_112, %c0_113, %c0_114] : memref<2x1x32xf32, #tpu.memory_space<vmem>>, vector<1x1x32xf32>
    %206 = vector.shape_cast %205 : vector<1x1x32xf32> to vector<1x32xf32>
    %c1_115 = arith.constant 1 : index
    %c0_116 = arith.constant 0 : index
    %c0_117 = arith.constant 0 : index
    %207 = vector.load %arg12[%c1_115, %c0_116, %c0_117] : memref<2x1x32xf32, #tpu.memory_space<vmem>>, vector<1x1x32xf32>
    %208 = vector.shape_cast %207 : vector<1x1x32xf32> to vector<1x32xf32>
    %cst_118 = arith.constant dense<0.000000e+00> : vector<18xf32>
    %209 = vector.multi_reduction <add>, %204, %cst_118 [1] : vector<18x32xf32> to vector<18xf32>
    %210 = vector.shape_cast %209 : vector<18xf32> to vector<18x1xf32>
    %cst_119 = arith.constant 3.200000e+01 : f32
    %211 = vector.broadcast %cst_119 : f32 to vector<18x1xf32>
    %212 = arith.divf %210, %211 : vector<18x1xf32>
    %213 = vector.broadcast %212 : vector<18x1xf32> to vector<18x32xf32>
    %214 = arith.subf %204, %213 : vector<18x32xf32>
    %215 = arith.mulf %214, %214 : vector<18x32xf32>
    %cst_120 = arith.constant dense<0.000000e+00> : vector<18xf32>
    %216 = vector.multi_reduction <add>, %215, %cst_120 [1] : vector<18x32xf32> to vector<18xf32>
    %217 = vector.shape_cast %216 : vector<18xf32> to vector<18x1xf32>
    %cst_121 = arith.constant 3.200000e+01 : f32
    %218 = vector.broadcast %cst_121 : f32 to vector<18x1xf32>
    %219 = arith.divf %217, %218 : vector<18x1xf32>
    %220 = vector.broadcast %212 : vector<18x1xf32> to vector<18x32xf32>
    %221 = arith.subf %204, %220 : vector<18x32xf32>
    %cst_122 = arith.constant 9.99999974E-6 : f32
    %222 = vector.broadcast %cst_122 : f32 to vector<18x1xf32>
    %223 = arith.addf %219, %222 : vector<18x1xf32>
    %224 = math.rsqrt %223 : vector<18x1xf32>
    %225 = vector.broadcast %224 : vector<18x1xf32> to vector<18x32xf32>
    %226 = arith.mulf %221, %225 : vector<18x32xf32>
    %227 = vector.broadcast %206 : vector<1x32xf32> to vector<18x32xf32>
    %228 = arith.mulf %226, %227 : vector<18x32xf32>
    %229 = vector.broadcast %208 : vector<1x32xf32> to vector<18x32xf32>
    %230 = arith.addf %228, %229 : vector<18x32xf32>
    %231 = arith.truncf %230 : vector<18x32xf32> to vector<18x32xbf16>
    %c1_123 = arith.constant 1 : index
    %c0_124 = arith.constant 0 : index
    %c0_125 = arith.constant 0 : index
    %232 = vector.load %arg13[%c1_123, %c0_124, %c0_125] : memref<2x32x32xbf16, #tpu.memory_space<vmem>>, vector<1x32x32xbf16>
    %233 = vector.shape_cast %232 : vector<1x32x32xbf16> to vector<32x32xbf16>
    %cst_126 = arith.constant dense<0.000000e+00> : vector<18x32xf32>
    %234 = tpu.matmul %231, %233, %cst_126 {dimension_numbers = #tpu.dot_dimension_numbers<[1], [0], [0], [1], [0, 0, 1, 1], [], []>} : vector<18x32xbf16>, vector<32x32xbf16>, vector<18x32xf32> -> vector<18x32xf32>
    %c1_127 = arith.constant 1 : index
    %c0_128 = arith.constant 0 : index
    %c0_129 = arith.constant 0 : index
    %235 = vector.load %arg14[%c1_127, %c0_128, %c0_129] : memref<2x1x32xf32, #tpu.memory_space<vmem>>, vector<1x1x32xf32>
    %236 = vector.shape_cast %235 : vector<1x1x32xf32> to vector<1x32xf32>
    %237 = vector.broadcast %236 : vector<1x32xf32> to vector<18x32xf32>
    %238 = arith.addf %234, %237 : vector<18x32xf32>
    %c1_130 = arith.constant 1 : index
    %c0_131 = arith.constant 0 : index
    %c0_132 = arith.constant 0 : index
    %239 = vector.load %arg15[%c1_130, %c0_131, %c0_132] : memref<2x32x32xbf16, #tpu.memory_space<vmem>>, vector<1x32x32xbf16>
    %240 = vector.shape_cast %239 : vector<1x32x32xbf16> to vector<32x32xbf16>
    %cst_133 = arith.constant dense<0.000000e+00> : vector<18x32xf32>
    %241 = tpu.matmul %231, %240, %cst_133 {dimension_numbers = #tpu.dot_dimension_numbers<[1], [0], [0], [1], [0, 0, 1, 1], [], []>} : vector<18x32xbf16>, vector<32x32xbf16>, vector<18x32xf32> -> vector<18x32xf32>
    %c1_134 = arith.constant 1 : index
    %c0_135 = arith.constant 0 : index
    %c0_136 = arith.constant 0 : index
    %242 = vector.load %arg16[%c1_134, %c0_135, %c0_136] : memref<2x1x32xf32, #tpu.memory_space<vmem>>, vector<1x1x32xf32>
    %243 = vector.shape_cast %242 : vector<1x1x32xf32> to vector<1x32xf32>
    %244 = vector.broadcast %243 : vector<1x32xf32> to vector<18x32xf32>
    %245 = arith.addf %241, %244 : vector<18x32xf32>
    %c1_137 = arith.constant 1 : index
    %c0_138 = arith.constant 0 : index
    %c0_139 = arith.constant 0 : index
    %246 = vector.load %arg17[%c1_137, %c0_138, %c0_139] : memref<2x32x32xbf16, #tpu.memory_space<vmem>>, vector<1x32x32xbf16>
    %247 = vector.shape_cast %246 : vector<1x32x32xbf16> to vector<32x32xbf16>
    %cst_140 = arith.constant dense<0.000000e+00> : vector<18x32xf32>
    %248 = tpu.matmul %231, %247, %cst_140 {dimension_numbers = #tpu.dot_dimension_numbers<[1], [0], [0], [1], [0, 0, 1, 1], [], []>} : vector<18x32xbf16>, vector<32x32xbf16>, vector<18x32xf32> -> vector<18x32xf32>
    %c1_141 = arith.constant 1 : index
    %c0_142 = arith.constant 0 : index
    %c0_143 = arith.constant 0 : index
    %249 = vector.load %arg18[%c1_141, %c0_142, %c0_143] : memref<2x1x32xf32, #tpu.memory_space<vmem>>, vector<1x1x32xf32>
    %250 = vector.shape_cast %249 : vector<1x1x32xf32> to vector<1x32xf32>
    %251 = vector.broadcast %250 : vector<1x32xf32> to vector<18x32xf32>
    %252 = arith.addf %248, %251 : vector<18x32xf32>
    %253 = vector.shape_cast %238 : vector<18x32xf32> to vector<1x18x32xf32>
    %254 = vector.broadcast %253 : vector<1x18x32xf32> to vector<4x18x32xf32>
    %255 = vector.broadcast %61 : vector<4x1x32xf32> to vector<4x18x32xf32>
    %256 = arith.mulf %254, %255 : vector<4x18x32xf32>
    %257 = arith.truncf %256 : vector<4x18x32xf32> to vector<4x18x32xbf16>
    %258 = arith.truncf %245 : vector<18x32xf32> to vector<18x32xbf16>
    %259 = vector.shape_cast %258 : vector<18x32xbf16> to vector<1x18x32xbf16>
    %260 = vector.shape_cast %259 : vector<1x18x32xbf16> to vector<1x18x32xbf16>
    %261 = vector.broadcast %260 : vector<1x18x32xbf16> to vector<4x18x32xbf16>
    %262 = arith.truncf %252 : vector<18x32xf32> to vector<18x32xbf16>
    %263 = vector.shape_cast %262 : vector<18x32xbf16> to vector<1x18x32xbf16>
    %264 = vector.shape_cast %263 : vector<1x18x32xbf16> to vector<1x18x32xbf16>
    %265 = vector.broadcast %264 : vector<1x18x32xbf16> to vector<4x18x32xbf16>
    "tpu.trace_start"() <{level = 10 : i32, message = "hqd,hkd->hqk"}> : () -> ()
    %cst_144 = arith.constant dense<0.000000e+00> : vector<4x18x18xf32>
    %266 = tpu.matmul %257, %261, %cst_144 {dimension_numbers = #tpu.dot_dimension_numbers<[2], [2], [1], [1], [0, 0, 0, 1, 1, 1], [0], [0]>} : vector<4x18x32xbf16>, vector<4x18x32xbf16>, vector<4x18x18xf32> -> vector<4x18x18xf32>
    "tpu.trace_stop"() : () -> ()
    %cst_145 = arith.constant 0.353553385 : f32
    %267 = vector.broadcast %cst_145 : f32 to vector<4x18x18xf32>
    %268 = arith.mulf %266, %267 : vector<4x18x18xf32>
    %cst_146 = arith.constant dense<0xFF800000> : vector<4x18xf32>
    %269 = vector.multi_reduction <maximumf>, %268, %cst_146 [2] : vector<4x18x18xf32> to vector<4x18xf32>
    %270 = vector.shape_cast %269 : vector<4x18xf32> to vector<4x18x1xf32>
    %271 = vector.broadcast %270 : vector<4x18x1xf32> to vector<4x18x18xf32>
    %272 = arith.subf %268, %271 : vector<4x18x18xf32>
    %273 = math.exp %272 : vector<4x18x18xf32>
    %cst_147 = arith.constant dense<0.000000e+00> : vector<4x18xf32>
    %274 = vector.multi_reduction <add>, %273, %cst_147 [2] : vector<4x18x18xf32> to vector<4x18xf32>
    %275 = vector.shape_cast %274 : vector<4x18xf32> to vector<4x18x1xf32>
    %276 = vector.broadcast %275 : vector<4x18x1xf32> to vector<4x18x18xf32>
    %277 = arith.divf %273, %276 : vector<4x18x18xf32>
    %278 = arith.truncf %277 : vector<4x18x18xf32> to vector<4x18x18xbf16>
    "tpu.trace_start"() <{level = 10 : i32, message = "hqk,hkd->hqd"}> : () -> ()
    %cst_148 = arith.constant dense<0.000000e+00> : vector<4x18x32xf32>
    %279 = tpu.matmul %278, %265, %cst_148 {dimension_numbers = #tpu.dot_dimension_numbers<[2], [1], [1], [2], [0, 0, 0, 1, 1, 2], [0], [0]>} : vector<4x18x18xbf16>, vector<4x18x32xbf16>, vector<4x18x32xf32> -> vector<4x18x32xf32>
    "tpu.trace_stop"() : () -> ()
    %280 = vector.broadcast %61 : vector<4x1x32xf32> to vector<4x18x32xf32>
    %281 = arith.mulf %279, %280 : vector<4x18x32xf32>
    %cst_149 = arith.constant dense<0.000000e+00> : vector<18x32xf32>
    %282 = vector.multi_reduction <add>, %281, %cst_149 [0] : vector<4x18x32xf32> to vector<18x32xf32>
    %283 = arith.truncf %282 : vector<18x32xf32> to vector<18x32xbf16>
    %c1_150 = arith.constant 1 : index
    %c0_151 = arith.constant 0 : index
    %c0_152 = arith.constant 0 : index
    %284 = vector.load %arg19[%c1_150, %c0_151, %c0_152] : memref<2x32x32xbf16, #tpu.memory_space<vmem>>, vector<1x32x32xbf16>
    %285 = vector.shape_cast %284 : vector<1x32x32xbf16> to vector<32x32xbf16>
    %cst_153 = arith.constant dense<0.000000e+00> : vector<18x32xf32>
    %286 = tpu.matmul %283, %285, %cst_153 {dimension_numbers = #tpu.dot_dimension_numbers<[1], [0], [0], [1], [0, 0, 1, 1], [], []>} : vector<18x32xbf16>, vector<32x32xbf16>, vector<18x32xf32> -> vector<18x32xf32>
    %287 = arith.addf %204, %286 : vector<18x32xf32>
    %c1_154 = arith.constant 1 : index
    %c0_155 = arith.constant 0 : index
    %c0_156 = arith.constant 0 : index
    %288 = vector.load %arg20[%c1_154, %c0_155, %c0_156] : memref<2x1x32xf32, #tpu.memory_space<vmem>>, vector<1x1x32xf32>
    %289 = vector.shape_cast %288 : vector<1x1x32xf32> to vector<1x32xf32>
    %290 = vector.broadcast %289 : vector<1x32xf32> to vector<18x32xf32>
    %291 = arith.addf %287, %290 : vector<18x32xf32>
    %c1_157 = arith.constant 1 : index
    %c0_158 = arith.constant 0 : index
    %c0_159 = arith.constant 0 : index
    %292 = vector.load %arg21[%c1_157, %c0_158, %c0_159] : memref<2x1x32xf32, #tpu.memory_space<vmem>>, vector<1x1x32xf32>
    %293 = vector.shape_cast %292 : vector<1x1x32xf32> to vector<1x32xf32>
    %c1_160 = arith.constant 1 : index
    %c0_161 = arith.constant 0 : index
    %c0_162 = arith.constant 0 : index
    %294 = vector.load %arg22[%c1_160, %c0_161, %c0_162] : memref<2x1x32xf32, #tpu.memory_space<vmem>>, vector<1x1x32xf32>
    %295 = vector.shape_cast %294 : vector<1x1x32xf32> to vector<1x32xf32>
    %cst_163 = arith.constant dense<0.000000e+00> : vector<18xf32>
    %296 = vector.multi_reduction <add>, %291, %cst_163 [1] : vector<18x32xf32> to vector<18xf32>
    %297 = vector.shape_cast %296 : vector<18xf32> to vector<18x1xf32>
    %cst_164 = arith.constant 3.200000e+01 : f32
    %298 = vector.broadcast %cst_164 : f32 to vector<18x1xf32>
    %299 = arith.divf %297, %298 : vector<18x1xf32>
    %300 = vector.broadcast %299 : vector<18x1xf32> to vector<18x32xf32>
    %301 = arith.subf %291, %300 : vector<18x32xf32>
    %302 = arith.mulf %301, %301 : vector<18x32xf32>
    %cst_165 = arith.constant dense<0.000000e+00> : vector<18xf32>
    %303 = vector.multi_reduction <add>, %302, %cst_165 [1] : vector<18x32xf32> to vector<18xf32>
    %304 = vector.shape_cast %303 : vector<18xf32> to vector<18x1xf32>
    %cst_166 = arith.constant 3.200000e+01 : f32
    %305 = vector.broadcast %cst_166 : f32 to vector<18x1xf32>
    %306 = arith.divf %304, %305 : vector<18x1xf32>
    %307 = vector.broadcast %299 : vector<18x1xf32> to vector<18x32xf32>
    %308 = arith.subf %291, %307 : vector<18x32xf32>
    %cst_167 = arith.constant 9.99999974E-6 : f32
    %309 = vector.broadcast %cst_167 : f32 to vector<18x1xf32>
    %310 = arith.addf %306, %309 : vector<18x1xf32>
    %311 = math.rsqrt %310 : vector<18x1xf32>
    %312 = vector.broadcast %311 : vector<18x1xf32> to vector<18x32xf32>
    %313 = arith.mulf %308, %312 : vector<18x32xf32>
    %314 = vector.broadcast %293 : vector<1x32xf32> to vector<18x32xf32>
    %315 = arith.mulf %313, %314 : vector<18x32xf32>
    %316 = vector.broadcast %295 : vector<1x32xf32> to vector<18x32xf32>
    %317 = arith.addf %315, %316 : vector<18x32xf32>
    %318 = arith.truncf %317 : vector<18x32xf32> to vector<18x32xbf16>
    %c1_168 = arith.constant 1 : index
    %c0_169 = arith.constant 0 : index
    %c0_170 = arith.constant 0 : index
    %319 = vector.load %arg23[%c1_168, %c0_169, %c0_170] : memref<2x32x128xbf16, #tpu.memory_space<vmem>>, vector<1x32x128xbf16>
    %320 = vector.shape_cast %319 : vector<1x32x128xbf16> to vector<32x128xbf16>
    %cst_171 = arith.constant dense<0.000000e+00> : vector<18x128xf32>
    %321 = tpu.matmul %318, %320, %cst_171 {dimension_numbers = #tpu.dot_dimension_numbers<[1], [0], [0], [1], [0, 0, 1, 1], [], []>} : vector<18x32xbf16>, vector<32x128xbf16>, vector<18x128xf32> -> vector<18x128xf32>
    %c1_172 = arith.constant 1 : index
    %c0_173 = arith.constant 0 : index
    %c0_174 = arith.constant 0 : index
    %322 = vector.load %arg24[%c1_172, %c0_173, %c0_174] : memref<2x1x128xf32, #tpu.memory_space<vmem>>, vector<1x1x128xf32>
    %323 = vector.shape_cast %322 : vector<1x1x128xf32> to vector<1x128xf32>
    %324 = vector.broadcast %323 : vector<1x128xf32> to vector<18x128xf32>
    %325 = arith.addf %321, %324 : vector<18x128xf32>
    %cst_175 = arith.constant 5.000000e-01 : f32
    %326 = vector.broadcast %cst_175 : f32 to vector<18x128xf32>
    %327 = arith.mulf %326, %325 : vector<18x128xf32>
    %cst_176 = arith.constant 4.471500e-02 : f32
    %328 = vector.broadcast %cst_176 : f32 to vector<18x128xf32>
    %329 = arith.mulf %328, %325 : vector<18x128xf32>
    %330 = arith.mulf %329, %325 : vector<18x128xf32>
    %331 = arith.mulf %330, %325 : vector<18x128xf32>
    %332 = arith.addf %325, %331 : vector<18x128xf32>
    %cst_177 = arith.constant 0.797884583 : f32
    %333 = vector.broadcast %cst_177 : f32 to vector<18x128xf32>
    %334 = arith.mulf %333, %332 : vector<18x128xf32>
    %335 = math.tanh %334 : vector<18x128xf32>
    %cst_178 = arith.constant 1.000000e+00 : f32
    %336 = vector.broadcast %cst_178 : f32 to vector<18x128xf32>
    %337 = arith.addf %336, %335 : vector<18x128xf32>
    %338 = arith.mulf %327, %337 : vector<18x128xf32>
    %339 = arith.truncf %338 : vector<18x128xf32> to vector<18x128xbf16>
    %c1_179 = arith.constant 1 : index
    %c0_180 = arith.constant 0 : index
    %c0_181 = arith.constant 0 : index
    %340 = vector.load %arg25[%c1_179, %c0_180, %c0_181] : memref<2x128x32xbf16, #tpu.memory_space<vmem>>, vector<1x128x32xbf16>
    %341 = vector.shape_cast %340 : vector<1x128x32xbf16> to vector<128x32xbf16>
    %cst_182 = arith.constant dense<0.000000e+00> : vector<18x32xf32>
    %342 = tpu.matmul %339, %341, %cst_182 {dimension_numbers = #tpu.dot_dimension_numbers<[1], [0], [0], [1], [0, 0, 1, 1], [], []>} : vector<18x128xbf16>, vector<128x32xbf16>, vector<18x32xf32> -> vector<18x32xf32>
    %343 = arith.addf %291, %342 : vector<18x32xf32>
    %c1_183 = arith.constant 1 : index
    %c0_184 = arith.constant 0 : index
    %c0_185 = arith.constant 0 : index
    %344 = vector.load %arg26[%c1_183, %c0_184, %c0_185] : memref<2x1x32xf32, #tpu.memory_space<vmem>>, vector<1x1x32xf32>
    %345 = vector.shape_cast %344 : vector<1x1x32xf32> to vector<1x32xf32>
    %346 = vector.broadcast %345 : vector<1x32xf32> to vector<18x32xf32>
    %347 = arith.addf %343, %346 : vector<18x32xf32>
    %348 = vector.extract_strided_slice %347 {offsets = [0, 0], sizes = [1, 32], strides = [1, 1]} : vector<18x32xf32> to vector<1x32xf32>
    %c0_186 = arith.constant 0 : index
    %c0_187 = arith.constant 0 : index
    %349 = vector.load %arg27[%c0_186, %c0_187] : memref<1x32xf32, #tpu.memory_space<vmem>>, vector<1x32xf32>
    %c0_188 = arith.constant 0 : index
    %c0_189 = arith.constant 0 : index
    %350 = vector.load %arg28[%c0_188, %c0_189] : memref<1x32xf32, #tpu.memory_space<vmem>>, vector<1x32xf32>
    %cst_190 = arith.constant dense<0.000000e+00> : vector<1xf32>
    %351 = vector.multi_reduction <add>, %348, %cst_190 [1] : vector<1x32xf32> to vector<1xf32>
    %352 = vector.shape_cast %351 : vector<1xf32> to vector<1x1xf32>
    %cst_191 = arith.constant 3.200000e+01 : f32
    %353 = vector.broadcast %cst_191 : f32 to vector<1x1xf32>
    %354 = arith.divf %352, %353 : vector<1x1xf32>
    %355 = vector.broadcast %354 : vector<1x1xf32> to vector<1x32xf32>
    %356 = arith.subf %348, %355 : vector<1x32xf32>
    %357 = arith.mulf %356, %356 : vector<1x32xf32>
    %cst_192 = arith.constant dense<0.000000e+00> : vector<1xf32>
    %358 = vector.multi_reduction <add>, %357, %cst_192 [1] : vector<1x32xf32> to vector<1xf32>
    %359 = vector.shape_cast %358 : vector<1xf32> to vector<1x1xf32>
    %cst_193 = arith.constant 3.200000e+01 : f32
    %360 = vector.broadcast %cst_193 : f32 to vector<1x1xf32>
    %361 = arith.divf %359, %360 : vector<1x1xf32>
    %362 = vector.broadcast %354 : vector<1x1xf32> to vector<1x32xf32>
    %363 = arith.subf %348, %362 : vector<1x32xf32>
    %cst_194 = arith.constant 9.99999974E-6 : f32
    %364 = vector.broadcast %cst_194 : f32 to vector<1x1xf32>
    %365 = arith.addf %361, %364 : vector<1x1xf32>
    %366 = math.rsqrt %365 : vector<1x1xf32>
    %367 = vector.broadcast %366 : vector<1x1xf32> to vector<1x32xf32>
    %368 = arith.mulf %363, %367 : vector<1x32xf32>
    %369 = arith.mulf %368, %349 : vector<1x32xf32>
    %370 = arith.addf %369, %350 : vector<1x32xf32>
    %371 = arith.truncf %370 : vector<1x32xf32> to vector<1x32xbf16>
    %c0_195 = arith.constant 0 : index
    %c0_196 = arith.constant 0 : index
    %372 = vector.load %arg29[%c0_195, %c0_196] : memref<32x21xbf16, #tpu.memory_space<vmem>>, vector<32x21xbf16>
    %cst_197 = arith.constant dense<0.000000e+00> : vector<1x21xf32>
    %373 = tpu.matmul %371, %372, %cst_197 {dimension_numbers = #tpu.dot_dimension_numbers<[1], [0], [0], [1], [0, 0, 1, 1], [], []>} : vector<1x32xbf16>, vector<32x21xbf16>, vector<1x21xf32> -> vector<1x21xf32>
    %c0_198 = arith.constant 0 : index
    %c0_199 = arith.constant 0 : index
    %374 = vector.load %arg30[%c0_198, %c0_199] : memref<1x21xf32, #tpu.memory_space<vmem>>, vector<1x21xf32>
    %375 = arith.addf %373, %374 : vector<1x21xf32>
    %c0_200 = arith.constant 0 : index
    %c0_201 = arith.constant 0 : index
    %c0_202 = arith.constant 0 : index
    %376 = vector.load %arg31[%c0_200, %c0_201, %c0_202] : memref<1x1x21xf32, #tpu.memory_space<vmem>>, vector<1x1x21xf32>
    %377 = vector.shape_cast %376 : vector<1x1x21xf32> to vector<1x21xf32>
    %378 = vector.shape_cast %375 : vector<1x21xf32> to vector<1x1x21xf32>
    tpu.vector_store %arg31[%c0_200, %c0_201, %c0_202], %378 {strides = array<i32>} : memref<1x1x21xf32, #tpu.memory_space<vmem>>, vector<1x1x21xf32>,
    return
  }
  func.func @transform_0(%arg0: i32) -> (i32, i32, i32) {
    %c0_i32 = arith.constant 0 : i32
    %c0_i32_0 = arith.constant 0 : i32
    %c0_i32_1 = arith.constant 0 : i32
    return %arg0, %c0_i32, %c0_i32_0 : i32, i32, i32
  }
  func.func @transform_1(%arg0: i32) -> (i32, i32, i32) {
    %c0_i32 = arith.constant 0 : i32
    %c0_i32_0 = arith.constant 0 : i32
    %c0_i32_1 = arith.constant 0 : i32
    return %arg0, %c0_i32, %c0_i32_0 : i32, i32, i32
  }
  func.func @transform_2(%arg0: i32) -> (i32, i32) {
    %c0_i32 = arith.constant 0 : i32
    %c0_i32_0 = arith.constant 0 : i32
    %c0_i32_1 = arith.constant 0 : i32
    return %c0_i32, %c0_i32_0 : i32, i32
  }
  func.func @transform_3(%arg0: i32) -> (i32, i32) {
    %c0_i32 = arith.constant 0 : i32
    %c0_i32_0 = arith.constant 0 : i32
    %c0_i32_1 = arith.constant 0 : i32
    return %c0_i32, %c0_i32_0 : i32, i32
  }
  func.func @transform_4(%arg0: i32) -> (i32, i32) {
    %c0_i32 = arith.constant 0 : i32
    %c0_i32_0 = arith.constant 0 : i32
    %c0_i32_1 = arith.constant 0 : i32
    return %c0_i32, %c0_i32_0 : i32, i32
  }
  func.func @transform_5(%arg0: i32) -> (i32, i32, i32) {
    %c0_i32 = arith.constant 0 : i32
    %c0_i32_0 = arith.constant 0 : i32
    %c0_i32_1 = arith.constant 0 : i32
    %c0_i32_2 = arith.constant 0 : i32
    return %c0_i32, %c0_i32_0, %c0_i32_1 : i32, i32, i32
  }
  func.func @transform_6(%arg0: i32) -> (i32, i32) {
    %c0_i32 = arith.constant 0 : i32
    %c0_i32_0 = arith.constant 0 : i32
    %c0_i32_1 = arith.constant 0 : i32
    return %c0_i32, %c0_i32_0 : i32, i32
  }
  func.func @transform_7(%arg0: i32) -> (i32, i32) {
    %c0_i32 = arith.constant 0 : i32
    %c0_i32_0 = arith.constant 0 : i32
    %c0_i32_1 = arith.constant 0 : i32
    return %c0_i32, %c0_i32_0 : i32, i32
  }
  func.func @transform_8(%arg0: i32) -> (i32, i32) {
    %c0_i32 = arith.constant 0 : i32
    %c0_i32_0 = arith.constant 0 : i32
    %c0_i32_1 = arith.constant 0 : i32
    return %c0_i32, %c0_i32_0 : i32, i32
  }
  func.func @transform_9(%arg0: i32) -> (i32, i32) {
    %c0_i32 = arith.constant 0 : i32
    %c0_i32_0 = arith.constant 0 : i32
    %c0_i32_1 = arith.constant 0 : i32
    return %c0_i32, %c0_i32_0 : i32, i32
  }
  func.func @transform_10(%arg0: i32) -> (i32, i32, i32) {
    %c0_i32 = arith.constant 0 : i32
    %c0_i32_0 = arith.constant 0 : i32
    %c0_i32_1 = arith.constant 0 : i32
    %c0_i32_2 = arith.constant 0 : i32
    return %c0_i32, %c0_i32_0, %c0_i32_1 : i32, i32, i32
  }
  func.func @transform_11(%arg0: i32) -> (i32, i32, i32) {
    %c0_i32 = arith.constant 0 : i32
    %c0_i32_0 = arith.constant 0 : i32
    %c0_i32_1 = arith.constant 0 : i32
    %c0_i32_2 = arith.constant 0 : i32
    return %c0_i32, %c0_i32_0, %c0_i32_1 : i32, i32, i32
  }
  func.func @transform_12(%arg0: i32) -> (i32, i32, i32) {
    %c0_i32 = arith.constant 0 : i32
    %c0_i32_0 = arith.constant 0 : i32
    %c0_i32_1 = arith.constant 0 : i32
    %c0_i32_2 = arith.constant 0 : i32
    return %c0_i32, %c0_i32_0, %c0_i32_1 : i32, i32, i32
  }
  func.func @transform_13(%arg0: i32) -> (i32, i32, i32) {
    %c0_i32 = arith.constant 0 : i32
    %c0_i32_0 = arith.constant 0 : i32
    %c0_i32_1 = arith.constant 0 : i32
    %c0_i32_2 = arith.constant 0 : i32
    return %c0_i32, %c0_i32_0, %c0_i32_1 : i32, i32, i32
  }
  func.func @transform_14(%arg0: i32) -> (i32, i32, i32) {
    %c0_i32 = arith.constant 0 : i32
    %c0_i32_0 = arith.constant 0 : i32
    %c0_i32_1 = arith.constant 0 : i32
    %c0_i32_2 = arith.constant 0 : i32
    return %c0_i32, %c0_i32_0, %c0_i32_1 : i32, i32, i32
  }
  func.func @transform_15(%arg0: i32) -> (i32, i32, i32) {
    %c0_i32 = arith.constant 0 : i32
    %c0_i32_0 = arith.constant 0 : i32
    %c0_i32_1 = arith.constant 0 : i32
    %c0_i32_2 = arith.constant 0 : i32
    return %c0_i32, %c0_i32_0, %c0_i32_1 : i32, i32, i32
  }
  func.func @transform_16(%arg0: i32) -> (i32, i32, i32) {
    %c0_i32 = arith.constant 0 : i32
    %c0_i32_0 = arith.constant 0 : i32
    %c0_i32_1 = arith.constant 0 : i32
    %c0_i32_2 = arith.constant 0 : i32
    return %c0_i32, %c0_i32_0, %c0_i32_1 : i32, i32, i32
  }
  func.func @transform_17(%arg0: i32) -> (i32, i32, i32) {
    %c0_i32 = arith.constant 0 : i32
    %c0_i32_0 = arith.constant 0 : i32
    %c0_i32_1 = arith.constant 0 : i32
    %c0_i32_2 = arith.constant 0 : i32
    return %c0_i32, %c0_i32_0, %c0_i32_1 : i32, i32, i32
  }
  func.func @transform_18(%arg0: i32) -> (i32, i32, i32) {
    %c0_i32 = arith.constant 0 : i32
    %c0_i32_0 = arith.constant 0 : i32
    %c0_i32_1 = arith.constant 0 : i32
    %c0_i32_2 = arith.constant 0 : i32
    return %c0_i32, %c0_i32_0, %c0_i32_1 : i32, i32, i32
  }
  func.func @transform_19(%arg0: i32) -> (i32, i32, i32) {
    %c0_i32 = arith.constant 0 : i32
    %c0_i32_0 = arith.constant 0 : i32
    %c0_i32_1 = arith.constant 0 : i32
    %c0_i32_2 = arith.constant 0 : i32
    return %c0_i32, %c0_i32_0, %c0_i32_1 : i32, i32, i32
  }
  func.func @transform_20(%arg0: i32) -> (i32, i32, i32) {
    %c0_i32 = arith.constant 0 : i32
    %c0_i32_0 = arith.constant 0 : i32
    %c0_i32_1 = arith.constant 0 : i32
    %c0_i32_2 = arith.constant 0 : i32
    return %c0_i32, %c0_i32_0, %c0_i32_1 : i32, i32, i32
  }
  func.func @transform_21(%arg0: i32) -> (i32, i32, i32) {
    %c0_i32 = arith.constant 0 : i32
    %c0_i32_0 = arith.constant 0 : i32
    %c0_i32_1 = arith.constant 0 : i32
    %c0_i32_2 = arith.constant 0 : i32
    return %c0_i32, %c0_i32_0, %c0_i32_1 : i32, i32, i32
  }
  func.func @transform_22(%arg0: i32) -> (i32, i32, i32) {
    %c0_i32 = arith.constant 0 : i32
    %c0_i32_0 = arith.constant 0 : i32
    %c0_i32_1 = arith.constant 0 : i32
    %c0_i32_2 = arith.constant 0 : i32
    return %c0_i32, %c0_i32_0, %c0_i32_1 : i32, i32, i32
  }
  func.func @transform_23(%arg0: i32) -> (i32, i32, i32) {
    %c0_i32 = arith.constant 0 : i32
    %c0_i32_0 = arith.constant 0 : i32
    %c0_i32_1 = arith.constant 0 : i32
    %c0_i32_2 = arith.constant 0 : i32
    return %c0_i32, %c0_i32_0, %c0_i32_1 : i32, i32, i32
  }
  func.func @transform_24(%arg0: i32) -> (i32, i32, i32) {
    %c0_i32 = arith.constant 0 : i32
    %c0_i32_0 = arith.constant 0 : i32
    %c0_i32_1 = arith.constant 0 : i32
    %c0_i32_2 = arith.constant 0 : i32
    return %c0_i32, %c0_i32_0, %c0_i32_1 : i32, i32, i32
  }
  func.func @transform_25(%arg0: i32) -> (i32, i32, i32) {
    %c0_i32 = arith.constant 0 : i32
    %c0_i32_0 = arith.constant 0 : i32
    %c0_i32_1 = arith.constant 0 : i32
    %c0_i32_2 = arith.constant 0 : i32
    return %c0_i32, %c0_i32_0, %c0_i32_1 : i32, i32, i32
  }
  func.func @transform_26(%arg0: i32) -> (i32, i32) {
    %c0_i32 = arith.constant 0 : i32
    %c0_i32_0 = arith.constant 0 : i32
    %c0_i32_1 = arith.constant 0 : i32
    return %c0_i32, %c0_i32_0 : i32, i32
  }
  func.func @transform_27(%arg0: i32) -> (i32, i32) {
    %c0_i32 = arith.constant 0 : i32
    %c0_i32_0 = arith.constant 0 : i32
    %c0_i32_1 = arith.constant 0 : i32
    return %c0_i32, %c0_i32_0 : i32, i32
  }
  func.func @transform_28(%arg0: i32) -> (i32, i32) {
    %c0_i32 = arith.constant 0 : i32
    %c0_i32_0 = arith.constant 0 : i32
    %c0_i32_1 = arith.constant 0 : i32
    return %c0_i32, %c0_i32_0 : i32, i32
  }
  func.func @transform_29(%arg0: i32) -> (i32, i32) {
    %c0_i32 = arith.constant 0 : i32
    %c0_i32_0 = arith.constant 0 : i32
    %c0_i32_1 = arith.constant 0 : i32
    return %c0_i32, %c0_i32_0 : i32, i32
  }
  func.func @transform_30(%arg0: i32) -> (i32, i32, i32) {
    %c0_i32 = arith.constant 0 : i32
    %c0_i32_0 = arith.constant 0 : i32
    %c0_i32_1 = arith.constant 0 : i32
    return %arg0, %c0_i32, %c0_i32_0 : i32, i32, i32
  }
}

</mosaic_0001>

<bundles_post_ra>
// kernel: _lambda_.1
= control target key start
LH: loop header
LB: loop body
LE: loop exit
PB: predicated region body
PF: predicated region fallthrough
CT: control target
= control target key end

     0   :  { %s5433_s6 = smov 1   ;;  %s5434_s10 = smov 2   ;;  %s6519_s0 = inlined_call_operand.smem [shape: u32[31], index: -1, kind: input, shape index: {}] }
   0x1   :  { %s5486_s5 = sld [smem:[%s6519_s0]]   ;;  %s5435_s14 = smov 3  }
   0x2   :  { %s5491_s9 = sld [smem:[%s6519_s0 + %s5433_s6]]   ;;  %s5436_s18 = smov 4  }
   0x3   :  { %s5496_s13 = sld [smem:[%s6519_s0 + %s5434_s10]]   ;;  %s5437_s22 = smov 5  }
   0x4   :  { %s5501_s17 = sld [smem:[%s6519_s0 + %s5435_s14]]   ;;  %s5438_s26 = smov 6  }
   0x5   :  { %s5506_s21 = sld [smem:[%s6519_s0 + %s5436_s18]]   ;;  %s5439_s30 = smov 7  }
   0x6   :  { %s5511_s25 = sld [smem:[%s6519_s0 + %s5437_s22]]   ;;  %s5440_s4 = smov 8  }
   0x7   :  { %6551 = sst [smem:[#allocation29_spill]] %s5486_s5  ;;  %s5441_s10 = smov 9  }
   0x8   :  { %6552 = sst [smem:[#allocation30_spill]] %s5491_s9  ;;  %s5442_s15 = smov 10  }
   0x9   :  { %6553 = sst [smem:[#allocation31_spill]] %s5496_s13  ;;  %s5443_s20 = smov 11  }
   0xa   :  { %6554 = sst [smem:[#allocation32_spill]] %s5501_s17  ;;  %s5445_s1 = smov 13  }
   0xb   :  { %s5516_s29 = sld [smem:[%s6519_s0 + %s5438_s26]]   ;;  %s5444_s26 = smov 12  }
   0xc   :  { %6555 = sst [smem:[#allocation33_spill]] %s5511_s25  ;;  %s5446_s7 = smov 14  }
   0xd   :  { %s5521_s3 = sld [smem:[%s6519_s0 + %s5439_s30]]   ;;  %s5448_s22 = smov 16  }
   0xe   :  { %s5526_s8 = sld [smem:[%s6519_s0 + %s5440_s4]]   ;;  %s5449_s28 = smov 17  }
   0xf   :  { %s5531_s14 = sld [smem:[%s6519_s0 + %s5441_s10]]  }
  0x10   :  { %s5536_s19 = sld [smem:[%s6519_s0 + %s5442_s15]]   ;;  %s5447_s15 = smov 15  }
  0x11   :  { %s5541_s24 = sld [smem:[%s6519_s0 + %s5443_s20]]  }
  0x12   :  { %s5546_s30 = sld [smem:[%s6519_s0 + %s5444_s26]]  }
  0x13   :  { %6556 = sst [smem:[#allocation34_spill]] %s5521_s3 }
  0x14   :  { %6557 = sst [smem:[#allocation35_spill]] %s5526_s8 }
  0x15   :  { %s5551_s6 = sld [smem:[%s6519_s0 + %s5445_s1]]  }
  0x16   :  { %6558 = sst [smem:[#allocation36_spill]] %s5536_s19 }
  0x17   :  { %6559 = sst [smem:[#allocation37_spill]] %s5541_s24 }
  0x18   :  { %6560 = sst [smem:[#allocation38_spill]] %s5546_s30 }
  0x19   :  { %s5556_s12 = sld [smem:[%s6519_s0 + %s5446_s7]]   ;;  %s5450_s7 = smov 18  }
  0x1a   :  { %s5561_s20 = sld [smem:[%s6519_s0 + %s5447_s15]]   ;;  %s5451_s15 = smov 19  }
  0x1b   :  { %6561 = sst [smem:[#allocation39_spill]] %s5551_s6 }
  0x1c   :  { %s5566_s27 = sld [smem:[%s6519_s0 + %s5448_s22]]   ;;  %s5452_s22 = smov 20  }
  0x1d   :  { %s5571_s4 = sld [smem:[%s6519_s0 + %s5449_s28]]   ;;  %s5453_s28 = smov 21  }
  0x1e   :  { %s5576_s25 = sld [smem:[%s6519_s0 + %s5450_s7]]   ;;  %s5454_s7 = smov 22  }
  0x1f   :  { %6562 = sst [smem:[#allocation40_spill]] %s5556_s12 }
  0x20   :  { %6563 = sst [smem:[#allocation41_spill]] %s5561_s20 }
  0x21   :  { %s5581_s24 = sld [smem:[%s6519_s0 + %s5451_s15]]   ;;  %s5455_s15 = smov 23  }
  0x22   :  { %6564 = sst [smem:[#allocation42_spill]] %s5566_s27 }
  0x23   :  { %6565 = sst [smem:[#allocation43_spill]] %s5571_s4 }
  0x24   :  { %6566 = sst [smem:[#allocation44_spill]] %s5576_s25 }
  0x25   :  { %s5586_s19 = sld [smem:[%s6519_s0 + %s5452_s22]]   ;;  %s5456_s22 = smov 24  }
  0x26   :  { %s5591_s4 = sld [smem:[%s6519_s0 + %s5453_s28]]   ;;  %s5457_s28 = smov 25  }
  0x27   :  { %6567 = sst [smem:[#allocation45_spill]] %s5581_s24 }
  0x28   :  { %s5596_s25 = sld [smem:[%s6519_s0 + %s5454_s7]]   ;;  %s5458_s7 = smov 26  }
  0x29   :  { %s5601_s12 = sld [smem:[%s6519_s0 + %s5455_s15]]   ;;  %s5459_s15 = smov 27  }
  0x2a   :  { %s5621_s27 = sld [smem:[%s6519_s0 + %s5459_s15]]  }
  0x2b   :  { %6568 = sst [smem:[#allocation46_spill]] %s5586_s19 }
  0x2c   :  { %6569 = sst [smem:[#allocation47_spill]] %s5591_s4 }
  0x2d   :  { %s5606_s19 = sld [smem:[%s6519_s0 + %s5456_s22]]   ;;  %s5460_s22 = smov 28  }
  0x2e   :  { %6570 = sst [smem:[#allocation48_spill]] %s5596_s25 }
  0x2f   :  { %6571 = sst [smem:[#allocation49_spill]] %s5601_s12 }
  0x30   :  { %s5611_s4 = sld [smem:[%s6519_s0 + %s5457_s28]]   ;;  %s5461_s28 = smov 29  }
  0x31   :  { %s5616_s25 = sld [smem:[%s6519_s0 + %s5458_s7]]   ;;  %s5462_s7 = smov 30  }
  0x32   :  { %6575 = sst [smem:[#allocation53_spill]] %s5621_s27 }
  0x33   :  { %6572 = sst [smem:[#allocation50_spill]] %s5606_s19 }
  0x34   :  { %s5626_s19 = sld [smem:[%s6519_s0 + %s5460_s22]]  }
  0x35   :  { %s5631_s30 = sld [smem:[%s6519_s0 + %s5461_s28]]  }
  0x36   :  { %6573 = sst [smem:[#allocation51_spill]] %s5611_s4 }
  0x37   :  { %6574 = sst [smem:[#allocation52_spill]] %s5616_s25 }
  0x38   :  { %s5636_s25 = sld [smem:[%s6519_s0 + %s5462_s7]]  }
  0x3b   :  { %6576 = sst [smem:[#allocation54_spill]] %s5631_s30 }
  0x3e   :  { %6577 = sst [smem:[#allocation55_spill]] %s5636_s25 }
  0x3f   :  { %66 = vsyncpa [#allocation4], 0 }
  0x40   :  { %68 = vsyncpa [#allocation4 + $0x1], 0 }
  0x41   :  { %69 = vsyncpa [#allocation7], 0 }
  0x42   :  { %71 = vsyncpa [#allocation7 + $0x1], 0 }
  0x43   :  { %72 = vsyncpa [#allocation10], 0 }
  0x44   :  { %73 = vsyncpa [#allocation13], 0 }
  0x45   :  { %74 = vsyncpa [#allocation16], 0 }
  0x46   :  { %75 = vsyncpa [#allocation19], 0 }
  0x47   :  { %76 = vsyncpa [#allocation5], 0 }
  0x48   :  { %78 = vsyncpa [#allocation5 + $0x1], 0  ;;  %s5638_s15 = smov 0   ;;  %s5640_s16 = smov 0  }
  0x49   :  { %s5642_s18 = smov 0   ;;  %s5644_s22 = smov 0  }
  0x4a LB: > { %s6578_s9 = sld [smem:[#allocation30_spill]]  ;;  %s6579_s5 = sld [smem:[#allocation29_spill]]  ;;  %s5423_s16 = sphi %s5640_s16, %s6631_s16   ;;  %s5419_s15 = sphi %s5638_s15, %s6630_s15   ;;  %s5431_s22 = sphi %s5644_s22, %s6633_s22   ;;  %s5427_s18 = sphi %s5642_s18, %s6632_s18  }
  0x4b   : > { %s6580_s30 = sld [smem:[#allocation54_spill]]  ;;  %s6581_s24 = sld [smem:[#allocation45_spill]] }
  0x4c   : > { %s6582_s20 = sld [smem:[#allocation41_spill]]  ;;  %s6584_s6 = sld [smem:[#allocation39_spill]] }
  0x4d   : > { %s6583_s12 = sld [smem:[#allocation49_spill]]  ;;  %s6585_s4 = sld [smem:[#allocation51_spill]] }
  0x4e   : > { %s6586_s17 = sld [smem:[#allocation32_spill]]  ;;  %s6587_s13 = sld [smem:[#allocation31_spill]] }
  0x4f   : > { %s5463_s0 = smov [#allocation8]   ;;  %s5659_s26 = sadd.s32 4294967295, %s5431_s22  }
  0x50   : > { %s768_s23 = sshll.u32 %s5463_s0, 4  ;;  %p4116_p0 = scmp.ge.s32.totalorder %s5431_s22, 1  ;;  %s5664_s23 = int_to_ptr.vmem [resolvable:$true] %s768_s23 }
  0x51   : > { %p6533_p1 = scmp.eq.s32.totalorder %s5659_s26, 0  ;;  %p755_p2 = scmp.lt.s32.totalorder %s5431_s22, 3 }
  0x52   : > { %s5464_s1 = smov [#allocation9]   ;;  %s5465_s10 = smov [#allocation12]  }
  0x53   : > { %p5666_p3 = pnand %p4116_p0, %p755_p2  ;;  %s779_s2 = sshll.u32 %s5464_s1, 4  ;;  %s5673_s2 = int_to_ptr.vmem [resolvable:$true] %s779_s2 }
  0x54   : > { %s832_s11 = sshll.u32 %s5465_s10, 4  ;;  %s5057_s0 = scalar_lea.hbm %s6587_s13, 16  ;;  %s5681_s11 = int_to_ptr.vmem [resolvable:$true] %s832_s11 }
  0x55   : > { %s6588_s28 = scalar_select %p5666_p3, 1, 0 }
  0x56   : > { %p4749_p5 = pneg %p5666_p3  ;;  %p5058_p7 = scmp.ne.s32.totalorder %s6587_s13, %s5057_s0 }
  0x57   : > { %p5064_p11 = scmp.lt.u32.totalorder %s5057_s0, %s6587_s13 }
  0x58   : > { %p5677_p6 = pnand %p4749_p5, %p6533_p1 }
  0x5a   : > { %p5687_p8 = pneg %p5677_p6 }
  0x5c   : > { %p5060_p9 = pnand %p5687_p8, %p5058_p7 }
  0x5e   : > { %p5061_p10 = pneg %p5060_p9 }
  0x60   : > { %p5066_p12 = pnand %p5064_p11, %p5061_p10 }
  0x62   : > { %5069 = shalt.err (!%p5066_p12)
}
  0x63   : > { %s5070_s1 = scalar_lea.vmem %s5664_s23, 16  ;;  %s5077_s10 = scalar_lea.vmem %s5664_s23, 32 }
  0x64   : > { %p5071_p13 = scmp.ne.s32.totalorder %s5664_s23, %s5070_s1  ;;  %p5078_p5 = scmp.lt.s32.totalorder %s5664_s23, %s5664_s23 }
  0x65   : > { %p5079_p4 = scmp.lt.s32.totalorder %s5077_s10, %s5070_s1 }
  0x66   : > { %p5073_p0 = pnand %p5071_p13, %p5687_p8 }
  0x67   : > { %p5080_p1 = por %p5079_p4, %p5078_p5 }
  0x68   : > { %p5074_p2 = pneg %p5073_p0 }
  0x6a   : > { %p5081_p7 = pnand %p5080_p1, %p5074_p2 }
  0x6c   : > { %5084 = shalt.err (!%p5081_p7)
}
  0x6d   : > { %4752 = dma.hbm_to_vmem [thread:$0]  (!%p5677_p6), %s6587_s13, 16, %s5664_s23, [#allocation7]  }
  0x6e   : > { %s5085_s0 = scalar_lea.hbm %s6586_s17, 16 }
  0x6f   : > { %p5086_p9 = scmp.ne.s32.totalorder %s6586_s17, %s5085_s0  ;;  %p5092_p12 = scmp.lt.u32.totalorder %s5085_s0, %s6586_s17 }
  0x71   : > { %p5088_p10 = pnand %p5086_p9, %p5687_p8 }
  0x73   : > { %p5089_p11 = pneg %p5088_p10 }
  0x75   : > { %p5094_p13 = pnand %p5092_p12, %p5089_p11 }
  0x77   : > { %5097 = shalt.err (!%p5094_p13)
}
  0x78   : > { %s5098_s1 = scalar_lea.vmem %s5673_s2, 16  ;;  %s5105_s10 = scalar_lea.vmem %s5673_s2, 32 }
  0x79   : > { %p5099_p1 = scmp.ne.s32.totalorder %s5673_s2, %s5098_s1  ;;  %p5106_p2 = scmp.lt.s32.totalorder %s5673_s2, %s5673_s2 }
  0x7a   : > { %p5107_p5 = scmp.lt.s32.totalorder %s5105_s10, %s5098_s1 }
  0x7b   : > { %p5101_p4 = pnand %p5099_p1, %p5687_p8 }
  0x7c   : > { %p5108_p7 = por %p5107_p5, %p5106_p2 }
  0x7d   : > { %p5102_p0 = pneg %p5101_p4 }
  0x7f   : > { %p5109_p9 = pnand %p5108_p7, %p5102_p0 }
  0x81   : > { %5112 = shalt.err (!%p5109_p9)
}
  0x82   : > { %4755 = dma.hbm_to_vmem [thread:$0]  (!%p5677_p6), %s6586_s17, 16, %s5673_s2, [#allocation10]  }
  0x83   : > { %s5113_s23 = scalar_lea.hbm %s6582_s20, 32 }
  0x84   : > { %p5114_p10 = scmp.ne.s32.totalorder %s6582_s20, %s5113_s23  ;;  %p5120_p13 = scmp.lt.u32.totalorder %s5113_s23, %s6582_s20 }
  0x86   : > { %p5116_p11 = pnand %p5114_p10, %p5687_p8 }
  0x88   : > { %p5117_p12 = pneg %p5116_p11 }
  0x8a   : > { %p5122_p1 = pnand %p5120_p13, %p5117_p12 }
  0x8c   : > { %5125 = shalt.err (!%p5122_p1)
}
  0x8d   : > { %s5126_s0 = scalar_lea.vmem %s5681_s11, 32  ;;  %p5134_p5 = scmp.lt.s32.totalorder %s5681_s11, %s5681_s11 }
  0x8e   : > { %p5127_p4 = scmp.ne.s32.totalorder %s5681_s11, %s5126_s0  ;;  %p5135_p7 = scmp.lt.s32.totalorder %s5126_s0, %s5126_s0 }
  0x90   : > { %p5129_p0 = pnand %p5127_p4, %p5687_p8  ;;  %p5136_p9 = por %p5135_p7, %p5134_p5 }
  0x92   : > { %p5130_p2 = pneg %p5129_p0 }
  0x94   : > { %p5137_p3 = pnand %p5136_p9, %p5130_p2 }
  0x96   : > { %5140 = shalt.err (!%p5137_p3)
}
  0x97   : > { %s5466_s2 = smov 16   ;;  %s5467_s1 = smov 1  }
  0x98   : > { %4761 = dma.hbm_to_vmem [thread:$0]  (!%p5677_p6), %s6582_s20, 32, %s5681_s11, [#allocation13], %s5466_s2, %s5466_s2, %s5467_s1  }
  0x99   : > { %s5468_s10 = smov [#allocation15]   ;;  %s5469_s0 = smov [#allocation11]  }
  0x9a   : > { %s876_s23 = sshll.u32 %s5468_s10, 4  ;;  %s816_s13 = sshll.u32 %s5469_s0, 4  ;;  %s877_s23 = int_to_ptr.vmem [resolvable:$true] %s876_s23  ;;  %s817_s13 = int_to_ptr.vmem [resolvable:$true] %s816_s13 }
  0x9b   : > { %s5141_s17 = scalar_lea.hbm %s6583_s12, 32 }
  0x9c   : > { %p5142_p3 = scmp.ne.s32.totalorder %s6583_s12, %s5141_s17  ;;  %p5148_p12 = scmp.lt.u32.totalorder %s5141_s17, %s6583_s12 }
  0x9e   : > { %p5144_p10 = pnand %p5142_p3, %p5687_p8 }
  0xa0   : > { %p5145_p11 = pneg %p5144_p10 }
  0xa2   : > { %p5150_p13 = pnand %p5148_p12, %p5145_p11 }
  0xa4   : > { %5153 = shalt.err (!%p5150_p13)
}
  0xa5   : > { %s5154_s27 = scalar_lea.vmem %s877_s23, 32  ;;  %p5162_p2 = scmp.lt.s32.totalorder %s877_s23, %s877_s23 }
  0xa6   : > { %p5155_p1 = scmp.ne.s32.totalorder %s877_s23, %s5154_s27  ;;  %p5163_p5 = scmp.lt.s32.totalorder %s5154_s27, %s5154_s27 }
  0xa8   : > { %p5157_p4 = pnand %p5155_p1, %p5687_p8  ;;  %p5164_p7 = por %p5163_p5, %p5162_p2 }
  0xaa   : > { %p5158_p0 = pneg %p5157_p4 }
  0xac   : > { %p5165_p9 = pnand %p5164_p7, %p5158_p0 }
  0xae   : > { %5168 = shalt.err (!%p5165_p9)
}
  0xaf   : > { %4767 = dma.hbm_to_vmem [thread:$0]  (!%p5677_p6), %s6583_s12, 32, %s877_s23, [#allocation16], %s5466_s2, %s5466_s2, %s5467_s1  }
  0xb0   : > { %s5169_s17 = scalar_lea.hbm %s6584_s6, 32 }
  0xb1   : > { %p5170_p3 = scmp.ne.s32.totalorder %s6584_s6, %s5169_s17  ;;  %p5176_p12 = scmp.lt.u32.totalorder %s5169_s17, %s6584_s6 }
  0xb3   : > { %p5172_p10 = pnand %p5170_p3, %p5687_p8 }
  0xb5   : > { %p5173_p11 = pneg %p5172_p10 }
  0xb7   : > { %p5178_p13 = pnand %p5176_p12, %p5173_p11 }
  0xb9   : > { %5181 = shalt.err (!%p5178_p13)
}
  0xba   : > { %s5182_s27 = scalar_lea.vmem %s817_s13, 32  ;;  %p5190_p2 = scmp.lt.s32.totalorder %s817_s13, %s817_s13 }
  0xbb   : > { %p5183_p1 = scmp.ne.s32.totalorder %s817_s13, %s5182_s27  ;;  %p5191_p5 = scmp.lt.s32.totalorder %s5182_s27, %s5182_s27 }
  0xbd   : > { %p5185_p4 = pnand %p5183_p1, %p5687_p8  ;;  %p5192_p7 = por %p5191_p5, %p5190_p2 }
  0xbf   : > { %p5186_p0 = pneg %p5185_p4 }
  0xc1   : > { %p5193_p9 = pnand %p5192_p7, %p5186_p0 }
  0xc3   : > { %5196 = shalt.err (!%p5193_p9)
}
  0xc4   : > { %4758 = dma.hbm_to_vmem [thread:$0]  (!%p5677_p6), %s6584_s6, 32, %s817_s13, [#allocation10], %s5466_s2, %s5466_s2, %s5467_s1  }
  0xc5   : > { %s5470_s11 = smov [#allocation14]   ;;  %s5471_s23 = smov [#allocation17]  }
  0xc6   : > { %s854_s10 = sshll.u32 %s5470_s11, 4  ;;  %s892_s0 = sshll.u32 %s5471_s23, 4  ;;  %s855_s10 = int_to_ptr.vmem [resolvable:$true] %s854_s10  ;;  %s893_s0 = int_to_ptr.vmem [resolvable:$true] %s892_s0 }
  0xc7   : > { %s5197_s17 = scalar_lea.hbm %s6581_s24, 32 }
  0xc8   : > { %p5198_p3 = scmp.ne.s32.totalorder %s6581_s24, %s5197_s17  ;;  %p5204_p12 = scmp.lt.u32.totalorder %s5197_s17, %s6581_s24 }
  0xca   : > { %p5200_p10 = pnand %p5198_p3, %p5687_p8 }
  0xcc   : > { %p5201_p11 = pneg %p5200_p10 }
  0xce   : > { %p5206_p13 = pnand %p5204_p12, %p5201_p11 }
  0xd0   : > { %5209 = shalt.err (!%p5206_p13)
}
  0xd1   : > { %s5210_s27 = scalar_lea.vmem %s855_s10, 32  ;;  %p5218_p2 = scmp.lt.s32.totalorder %s855_s10, %s855_s10 }
  0xd2   : > { %p5211_p1 = scmp.ne.s32.totalorder %s855_s10, %s5210_s27  ;;  %p5219_p5 = scmp.lt.s32.totalorder %s5210_s27, %s5210_s27 }
  0xd4   : > { %p5213_p4 = pnand %p5211_p1, %p5687_p8  ;;  %p5220_p7 = por %p5219_p5, %p5218_p2 }
  0xd6   : > { %p5214_p0 = pneg %p5213_p4 }
  0xd8   : > { %p5221_p9 = pnand %p5220_p7, %p5214_p0 }
  0xda   : > { %5224 = shalt.err (!%p5221_p9)
}
  0xdb   : > { %4764 = dma.hbm_to_vmem [thread:$0]  (!%p5677_p6), %s6581_s24, 32, %s855_s10, [#allocation13], %s5466_s2, %s5466_s2, %s5467_s1  }
  0xdc   : > { %s5225_s13 = scalar_lea.hbm %s6585_s4, 32 }
  0xdd   : > { %p5226_p3 = scmp.ne.s32.totalorder %s6585_s4, %s5225_s13  ;;  %p5232_p12 = scmp.lt.u32.totalorder %s5225_s13, %s6585_s4 }
  0xdf   : > { %p5228_p10 = pnand %p5226_p3, %p5687_p8 }
  0xe1   : > { %p5229_p11 = pneg %p5228_p10 }
  0xe3   : > { %p5234_p13 = pnand %p5232_p12, %p5229_p11 }
  0xe5   : > { %5237 = shalt.err (!%p5234_p13)
}
  0xe6   : > { %s5238_s11 = scalar_lea.vmem %s893_s0, 32  ;;  %p5246_p2 = scmp.lt.s32.totalorder %s893_s0, %s893_s0 }
  0xe7   : > { %p5239_p1 = scmp.ne.s32.totalorder %s893_s0, %s5238_s11  ;;  %p5247_p5 = scmp.lt.s32.totalorder %s5238_s11, %s5238_s11 }
  0xe9   : > { %p5241_p4 = pnand %p5239_p1, %p5687_p8  ;;  %p5248_p7 = por %p5247_p5, %p5246_p2 }
  0xeb   : > { %p5242_p0 = pneg %p5241_p4 }
  0xed   : > { %p5249_p9 = pnand %p5248_p7, %p5242_p0 }
  0xef   : > { %5252 = shalt.err (!%p5249_p9)
}
  0xf0   : > { %4770 = dma.hbm_to_vmem [thread:$0]  (!%p5677_p6), %s6585_s4, 32, %s893_s0, [#allocation16], %s5466_s2, %s5466_s2, %s5467_s1  }
  0xf1   : > { %s5472_s10 = smov [#allocation18]   ;;  %s5253_s17 = scalar_lea.hbm %s6580_s30, 16 }
  0xf2   : > { %s915_s23 = sshll.u32 %s5472_s10, 4  ;;  %p5254_p3 = scmp.ne.s32.totalorder %s6580_s30, %s5253_s17  ;;  %s916_s23 = int_to_ptr.vmem [resolvable:$true] %s915_s23 }
  0xf3   : > { %p5260_p12 = scmp.lt.u32.totalorder %s5253_s17, %s6580_s30 }
  0xf4   : > { %p5256_p10 = pnand %p5254_p3, %p5687_p8 }
  0xf6   : > { %p5257_p11 = pneg %p5256_p10 }
  0xf8   : > { %p5262_p13 = pnand %p5260_p12, %p5257_p11 }
  0xfa   : > { %5265 = shalt.err (!%p5262_p13)
}
  0xfb   : > { %s5266_s27 = scalar_lea.vmem %s916_s23, 16  ;;  %s5273_s13 = scalar_lea.vmem %s916_s23, 32 }
  0xfc   : > { %p5267_p1 = scmp.ne.s32.totalorder %s916_s23, %s5266_s27  ;;  %p5274_p2 = scmp.lt.s32.totalorder %s916_s23, %s916_s23 }
  0xfd   : > { %p5275_p5 = scmp.lt.s32.totalorder %s5273_s13, %s5266_s27 }
  0xfe   : > { %p5269_p4 = pnand %p5267_p1, %p5687_p8 }
  0xff   : > { %p5276_p7 = por %p5275_p5, %p5274_p2 }
 0x100   : > { %p5270_p0 = pneg %p5269_p4 }
 0x102   : > { %p5277_p9 = pnand %p5276_p7, %p5270_p0 }
 0x104   : > { %5280 = shalt.err (!%p5277_p9)
}
 0x105   : > { %4773 = dma.hbm_to_vmem [thread:$0]  (!%p5677_p6), %s6580_s30, 16, %s916_s23, [#allocation19]  }
 0x106   : > { %s4115_s25 = sadd.s32 4294967294, %s5431_s22   ;;  %s5803_s2 = sadd.s32 1, %s5431_s22  }
 0x107   : > { %s88_s7 = ssub.s32 %s5431_s22, %s5803_s2  ;;  %s91_s1 = sadd.s32 1, %s5427_s18 }
 0x108   : > { %p89_p8 = scmp.eq.s32.totalorder %s88_s7, 0  ;;  %p98_p3 = scmp.ne.s32.totalorder %s5427_s18, %s5423_s16 }
 0x109   : > { %p99_p10 = scmp.eq.s32.totalorder %s5431_s22, 0  ;;  %p104_p11 = scmp.ne.s32.totalorder %s5423_s16, %s5419_s15 }
 0x10a   : > { %s5814_s0 = scalar_select %p89_p8, %s5427_s18, %s91_s1  }
 0x10b   : > { %p5816_p12 = por %p99_p10, %p98_p3  ;;  %p6592_p6 = scmp.eq.s32.totalorder %s5659_s26, 0 }
 0x10c   : > { %p742_p1 = scmp.eq.s32.totalorder %s5659_s26, 1  ;;  %p748_p4 = scmp.eq.s32.totalorder %s4115_s25, 1 }
 0x10d   : > { %p5822_p13 = por %p6592_p6, %p104_p11  ;;  %p4793_p0 = scmp.lt.s32.totalorder %s5431_s22, 2 }
 0x10e   : > { %s926_s23 = sand.u32 1, %s5427_s18   ;;  %p5829_p2 = por %p742_p1, %p98_p3 }
 0x10f   : > { %s6593_s10 = scalar_select %p5822_p13, 1, 0 }
 0x110   : > { %s6594_s17 = scalar_select %p5829_p2, 1, 0 }
 0x111   : > { %p5833_p5 = por %p748_p4, %p104_p11  ;;  %s5837_s13 = sshll.u32 %s926_s23, 3 }
 0x112   : > { %s4127_s7 = sshll.u32 %s5431_s22, 7  ;;  %s930_s25 = scalar_lea.vmem [#allocation3], %s5837_s13 }
 0x113   : > { %s6595_s27 = scalar_select %p5833_p5, 1, 0 }
 0x114   : > { %s5841_s1 = scalar_lea.hbm %s6579_s5, %s4127_s7  ;;  %s937_s4 = sshll.u32 %s930_s25, 4  ;;  %s5844_s4 = int_to_ptr.vmem [resolvable:$true] %s937_s4 }
 0x115   : > { %p5848_p7 = pnand %p4793_p0, %p5816_p12  ;;  %s5853_s12 = scalar_lea.hbm %s6578_s9, %s4127_s7 }
 0x116   : > { %s927_s24 = scalar_lea.sflag [#allocation4], %s926_s23  ;;  %s5281_s30 = scalar_lea.hbm %s5841_s1, 128 }
 0x117   : > { %p5282_p9 = scmp.ne.s32.totalorder %s5841_s1, %s5281_s30  ;;  %p5283_p8 = pneg %p5848_p7 }
 0x118   : > { %s5286_s25 = scalar_lea.hbm %s6579_s5, 256  ;;  %p5287_p11 = scmp.lt.u32.totalorder %s5841_s1, %s6579_s5 }
 0x119   : > { %p5284_p3 = pnand %p5283_p8, %p5282_p9  ;;  %p5288_p12 = scmp.lt.u32.totalorder %s5286_s25, %s5281_s30 }
 0x11a   : > { %p5290_p1 = scmp.lt.u32.totalorder %s5281_s30, %s5841_s1 }
 0x11b   : > { %p5285_p10 = pneg %p5284_p3  ;;  %p5289_p6 = por %p5288_p12, %p5287_p11 }
 0x11d   : > { %p5291_p4 = por %p5290_p1, %p5289_p6 }
 0x11f   : > { %p5292_p0 = pnand %p5291_p4, %p5285_p10 }
 0x121   : > { %5295 = shalt.err (!%p5292_p0)
}
 0x122   : > { %s5296_s11 = scalar_lea.vmem %s5844_s4, 128  ;;  %s5473_s23 = smov [#allocation3]  }
 0x123   : > { %p5297_p5 = scmp.ne.s32.totalorder %s5844_s4, %s5296_s11  ;;  %s5301_s7 = sshll.u32 %s5473_s23, 4  ;;  %s5302_s7 = int_to_ptr.vmem [resolvable:$false] %s5301_s7 }
 0x124   : > { %s5303_s20 = scalar_lea.vmem %s5302_s7, 256  ;;  %p5304_p9 = scmp.lt.s32.totalorder %s5844_s4, %s5302_s7 }
 0x125   : > { %p5299_p2 = pnand %p5297_p5, %p5283_p8  ;;  %p5305_p3 = scmp.lt.s32.totalorder %s5303_s20, %s5296_s11 }
 0x127   : > { %p5300_p13 = pneg %p5299_p2  ;;  %p5306_p11 = por %p5305_p3, %p5304_p9 }
 0x129   : > { %p5307_p12 = pnand %p5306_p11, %p5300_p13 }
 0x12b   : > { %5310 = shalt.err (!%p5307_p12)
}
 0x12c   : > { %4777 = dma.hbm_to_vmem [thread:$0]  (!%p5848_p7), %s5841_s1, 128, %s5844_s4, %s927_s24  }
 0x12d   : > { %s948_s30 = scalar_lea.vmem [#allocation6], %s5837_s13  ;;  %s6597_s20 = sand.u32 1, %s5431_s22  }
 0x12e   : > { %s955_s25 = sshll.u32 %s948_s30, 4  ;;  %s945_s11 = scalar_lea.sflag [#allocation7], %s6597_s20  ;;  %s956_s25 = int_to_ptr.vmem [resolvable:$true] %s955_s25 }
 0x12f   : > { %s5311_s23 = scalar_lea.hbm %s5853_s12, 128  ;;  %s5316_s7 = scalar_lea.hbm %s6578_s9, 256 }
 0x130   : > { %p5312_p13 = scmp.ne.s32.totalorder %s5853_s12, %s5311_s23  ;;  %p5317_p10 = scmp.lt.u32.totalorder %s5853_s12, %s6578_s9 }
 0x131   : > { %p5318_p6 = scmp.lt.u32.totalorder %s5316_s7, %s5311_s23  ;;  %p5320_p4 = scmp.lt.u32.totalorder %s5311_s23, %s5853_s12 }
 0x132   : > { %p5314_p2 = pnand %p5312_p13, %p5283_p8 }
 0x133   : > { %p5319_p1 = por %p5318_p6, %p5317_p10 }
 0x134   : > { %p5315_p5 = pneg %p5314_p2 }
 0x135   : > { %p5321_p0 = por %p5320_p4, %p5319_p1 }
 0x137   : > { %p5322_p9 = pnand %p5321_p0, %p5315_p5 }
 0x139   : > { %5325 = shalt.err (!%p5322_p9)
}
 0x13a   : > { %s5326_s24 = scalar_lea.vmem %s956_s25, 128  ;;  %s5474_s4 = smov [#allocation6]  }
 0x13b   : > { %p5327_p3 = scmp.ne.s32.totalorder %s956_s25, %s5326_s24  ;;  %s5331_s13 = sshll.u32 %s5474_s4, 4  ;;  %s5332_s13 = int_to_ptr.vmem [resolvable:$false] %s5331_s13 }
 0x13c   : > { %s5333_s1 = scalar_lea.vmem %s5332_s13, 256  ;;  %p5334_p13 = scmp.lt.s32.totalorder %s956_s25, %s5332_s13 }
 0x13d   : > { %p5329_p11 = pnand %p5327_p3, %p5283_p8  ;;  %p5335_p2 = scmp.lt.s32.totalorder %s5333_s1, %s5326_s24 }
 0x13f   : > { %p5330_p12 = pneg %p5329_p11  ;;  %p5336_p6 = por %p5335_p2, %p5334_p13 }
 0x141   : > { %p5337_p10 = pnand %p5336_p6, %p5330_p12 }
 0x143   : > { %5340 = shalt.err (!%p5337_p10)
}
 0x144   : > { %4780 = dma.hbm_to_vmem [thread:$0]  (!%p5848_p7), %s5853_s12, 128, %s956_s25, %s945_s11  }
 0x145   : > { %p6598_p5 = scmp.ne.s32.totalorder %s6588_s28, 0 }
 0x146   : > { %s5898_s30 = sand.u32 (!%p6598_p5), 1, %s5423_s16   ;;  %p6599_p8 = scmp.ne.s32.totalorder (!%p6598_p5), %s6593_s10, 0 }
 0x147   : > { %964 = sbr.rel (%p6598_p5) target bundleno = 5901 (0x170d), region = 140  ;;  %s4131_s20 = sshll.u32 (!%p6598_p5), %s5898_s30, 3 }
 0x148   : > { %s967_s23 = scalar_lea.sflag (!%p6598_p5), [#allocation4], %s5898_s30  ;;  %s970_s7 = scalar_lea.vmem (!%p6598_p5), [#allocation3], %s4131_s20 }
 0x14e   : > { %5386 = dma.done.wait (%p6599_p8), %s967_s23, 128  }
 0x14f   : > { %5388 = vsyncadd (%p6599_p8), %s967_s23, 4294967168  ;;  %s975_s6 = sand.u32 1, %s5659_s26   ;;  %s979_s28 = scalar_lea.vmem [#allocation6], %s4131_s20 }
 0x150   : > { %s976_s12 = scalar_lea.sflag [#allocation7], %s975_s6 }
 0x151   : > { %5390 = dma.done.wait (%p6599_p8), %s976_s12, 128  }
 0x152   : > { %5392 = vsyncadd (%p6599_p8), %s976_s12, 4294967168  ;;  %p6600_p7 = scmp.eq.s32.totalorder %s5659_s26, 0 }
 0x154   : > { %5394 = dma.done.wait (%p6600_p7), [#allocation7], 16   ;;  %p6601_p1 = pmov %p6600_p7 }
 0x156   : > { %5396 = vsyncadd (%p6601_p1), [#allocation7], 4294967280  ;;  %p6602_p4 = pmov %p6601_p1 }
 0x157   : > { %p6603_p0 = pmov %p6601_p1 }
 0x158   : > { %5398 = dma.done.wait (%p6602_p4), [#allocation10], 48  }
 0x159   : > { %5400 = vsyncadd (%p6603_p0), [#allocation10], 4294967248  ;;  %p6604_p9 = pmov %p6603_p0 }
 0x15a   : > { %p6605_p3 = pmov %p6603_p0 }
 0x15b   : > { %5402 = dma.done.wait (%p6604_p9), [#allocation13], 64  }
 0x15c   : > { %5404 = vsyncadd (%p6605_p3), [#allocation13], 4294967232  ;;  %p6606_p11 = pmov %p6603_p0 }
 0x15d   : > { %p6607_p12 = pmov %p6603_p0 }
 0x15e   : > { %5406 = dma.done.wait (%p6606_p11), [#allocation16], 64  }
 0x15f   : > { %5408 = vsyncadd (%p6607_p12), [#allocation16], 4294967232  ;;  %p6608_p13 = pmov %p6603_p0 }
 0x160   : > { %p6609_p2 = pmov %p6603_p0 }
 0x161   : > { %5410 = dma.done.wait (%p6608_p13), [#allocation19], 16  }
 0x162   : > { %5412 = vsyncadd (%p6609_p2), [#allocation19], 4294967280  ;;  %vm1099_vm0 = vcmask 261120   ;;  %v1096_v0 = vld [vmem:[%s970_s7] sm:$0xff]  ;;  %v1131_v1 = vld [vmem:[%s979_s28] sm:$0xff]  ;;  %s6610_s3 = sld [smem:[#allocation34_spill]] }
 0x163   : > { %v1100_v2 = vsel %vm1099_vm0, %v1096_v0, 0.0  ;;  %v1134_v3 = vsel %vm1099_vm0, %v1131_v1, 0.0  ;;  %v1093_v14 = vld [vmem:[#allocation8] sm:$0x1]  ;;  %vm1094_vm1 = vcmask 253952   ;;  %s6611_s8 = sld [smem:[#allocation35_spill]] }
 0x164   : > { %1101 = vadd.xlane.f32.xlu0 %v1100_v2  ;;  %1095 = vst.msk [vmem:[#allocation2] sm:$0x1] %vm1094_vm1, %v1093_v14  ;;  %v1129_v15 = vld [vmem:[#allocation9] sm:$0x1]  ;;  %v4141_v23 = vld [vmem:[%s5516_s29] ss:$0 sm:$0xff] }
 0x165   : > { %1130 = vst.msk [vmem:[#allocation2 + $0x9] sm:$0x1] %vm1094_vm1, %v1129_v15  ;;  %v4144_v31 = vld [vmem:[%s5531_s14] ss:$0 sm:$0xff]  ;;  %v1166_v37 = vld [vmem:[%s5506_s21 + $0x8] sm:$0xff]  ;;  %vm1183_vm2 = vcmask 254976  }
 0x166   : > { %v1165_v34 = vld [vmem:[%s5506_s21] sm:$0xff]  ;;  %v1167_v38 = vld [vmem:[%s5506_s21 + $0x10] sm:$0x3]  ;;  %s6612_s10 = sld [smem:[#allocation38_spill]]  ;;  %s6613_s25 = sld [smem:[#allocation42_spill]]  ;;  %vm1886_vm3 = vcmask 1040384  }
 0x167   : > { %s6614_s11 = sld [smem:[#allocation40_spill]]  ;;  %s6615_s24 = sld [smem:[#allocation36_spill]]  ;;  %vm1745_vm4 = vcmask 140288   ;;  %vm1738_vm5 = vcmask 146432   ;;  %vm5476_vm6 = vmmov 0   ;;  %vm3905_vm7 = vcmask 163840  }
 0x168   : > { %1135 = vadd.xlane.f32.xlu0 %v1134_v3  ;;  %v4142_v25 = vld [vmem:[%s6610_s3] ss:$0 sm:$0xff]  ;;  %s6616_s4 = sld [smem:[#allocation37_spill]]  ;;  %s6617_s13 = sld [smem:[#allocation33_spill]] }
 0x169   : > { %v4143_v28 = vld [vmem:[%s6611_s8] ss:$0 sm:$0xff]  ;;  %s6618_s1 = sld [smem:[#allocation43_spill]]  ;;  %s6619_s20 = sld [smem:[#allocation44_spill]] }
 0x16a   : > { %s6620_s23 = sld [smem:[#allocation48_spill]]  ;;  %s6621_s7 = sld [smem:[#allocation46_spill]] }
 0x16b   : > { %s6622_s6 = sld [smem:[#allocation47_spill]]  ;;  %s6623_s12 = sld [smem:[#allocation50_spill]] }
 0x16c   : > { %v4877_v61 = vld [vmem:[%s6612_s10] sm:$0xff]   ;;  %v4879_v63 = vld [vmem:[%s6612_s10 + $0x8] sm:$0xff]   ;;  %s6624_s28 = sld [smem:[#allocation52_spill]]  ;;  %s6626_s3 = sld [smem:[#allocation55_spill]] }
 0x16d   : > { %v4878_v62 = vld [vmem:[%s6613_s25] sm:$0xff]   ;;  %4431 = vmatprep.subr.bf16.mxu1 %v4877_v61  ;;  %s1091_s5 = scalar_lea.vmem [#allocation20], %s5898_s30  ;;  %p6627_p10 = scmp.ne.s32.totalorder %s6594_s17, 0 }
 0x16e   : > { %4447 = vmatprep.subr.bf16.mxu0 %v4878_v62  ;;  %4432 = vmatpush3.bf16.msra.mxu1 %v4877_v61 }
 0x16f   : > { %4448 = vmatpush3.bf16.msra.mxu0 %v4878_v62  ;;  %4433 = vmatprep.subr.bf16.mxu1 %v4879_v63 }
 0x172   : > { %4434 = vmatpush3.bf16.msra.mxu1 %v4879_v63 }
 0x1f1   : > { %v1102_v4 = vpop.xlane.xlu0 %1101 }
 0x1f2   : > { %v1104_v5 = vmul.f32 0.03125, %v1102_v4 }
 0x1f4   : > { %v1105_v6 = vsub.f32 %v1096_v0, %v1104_v5  ;;  %v4880_v0 = vld [vmem:[%s6613_s25 + $0x8] sm:$0xff]  }
 0x1f5   : > { %v1136_v7 = vpop.xlane.xlu0 %1135  ;;  %4449 = vmatprep.subr.bf16.mxu0 %v4880_v0 }
 0x1f6   : > { %v1137_v8 = vmul.f32 0.03125, %v1136_v7  ;;  %v1106_v9 = vmul.f32 %v1105_v6, %v1105_v6  ;;  %4450 = vmatpush3.bf16.msra.mxu0 %v4880_v0 }
 0x1f8   : > { %v1138_v10 = vsub.f32 %v1131_v1, %v1137_v8  ;;  %v1107_v11 = vsel %vm1099_vm0, %v1106_v9, 0.0  ;;  %v4881_v1 = vld [vmem:[%s6614_s11] sm:$0xff]  }
 0x1f9   : > { %1108 = vadd.xlane.f32.xlu1 %v1107_v11  ;;  %4439 = vmatprep.subr.bf16.mxu1 %v4881_v1 }
 0x1fa   : > { %v1139_v12 = vmul.f32 %v1138_v10, %v1138_v10 }
 0x1fc   : > { %v1140_v13 = vsel %vm1099_vm0, %v1139_v12, 0.0 }
 0x1fd   : > { %1141 = vadd.xlane.f32.xlu1 %v1140_v13  ;;  %v4145_v13 = vld [vmem:[%s6615_s24] ss:$0 sm:$0xff] }
 0x286   : > { %v1109_v16 = vpop.xlane.xlu1 %1108 }
 0x287   : > { %v1110_v17 = vmul.f32 0.03125, %v1109_v16 }
 0x289   : > { %v1111_v18 = vadd.f32 1e-05, %v1110_v17 }
 0x28a   : > { %v1142_v19 = vpop.xlane.xlu1 %1141 }
 0x28b   : > { %4915 = vrsqrt.f32 %v1111_v18  ;;  %v1143_v20 = vmul.f32 0.03125, %v1142_v19  ;;  %v4146_v19 = vld [vmem:[%s6616_s4] ss:$0 sm:$0xff] }
 0x28d   : > { %v1144_v21 = vadd.f32 1e-05, %v1143_v20 }
 0x28f   : > { %4917 = vrsqrt.f32 %v1144_v21 }
 0x295   : > { %v4916_v22 = vpop.eup %4915 }
 0x296   : > { %v1113_v24 = vmul.f32 %v4916_v22, %v1105_v6 }
 0x298   : > { %v1120_v26 = vmul.f32 %v4141_v23, %v1113_v24 }
 0x299   : > { %v4918_v27 = vpop.eup %4917 }
 0x29a   : > { %v1127_v29 = vadd.f32 %v4142_v25, %v1120_v26  ;;  %v1146_v30 = vmul.f32 %v4918_v27, %v1138_v10  ;;  %v4882_v27 = vld [vmem:[%s6614_s11 + $0x8] sm:$0xff]  }
 0x29c   : > { %1128 = vst.msk [vmem:[#allocation2 + $0x1] sm:$0xff] %vm1099_vm0, %v1127_v29  ;;  %v1153_v32 = vmul.f32 %v4143_v28, %v1146_v30  ;;  %v4147_v29 = vld [vmem:[#allocation11] ss:$0 sm:$0xff] }
 0x29e   : > { %v1160_v33 = vadd.f32 %v4144_v31, %v1153_v32 }
 0x2a0   : > { %1161 = vst.msk [vmem:[#allocation2 + $0xa] sm:$0xff] %vm1099_vm0, %v1160_v33 }
 0x2a3   : > { %v1162_v35 = vld [vmem:[#allocation2] sm:$0xff] }
 0x2a4   : > { %v5944_v36 = vadd.f32 %v1165_v34, %v1162_v35  ;;  %v5981_v35 = vld [vmem:[%s6617_s13] ss:$0 sm:$0xff] }
 0x2a6   : > { %v1177_v39 = vsel %vm1099_vm0, %v5944_v36, 0.0 }
 0x2a7   : > { %1178 = vadd.xlane.f32.xlu0 %v1177_v39  ;;  %v1163_v40 = vld [vmem:[#allocation2 + $0x8] sm:$0xff]  ;;  %v1164_v41 = vld [vmem:[#allocation2 + $0x10] sm:$0x3] }
 0x2a8   : > { %v5950_v42 = vadd.f32 %v1166_v37, %v1163_v40  ;;  %v5952_v43 = vadd.f32 %v1167_v38, %v1164_v41  ;;  %v5984_v40 = vld [vmem:[%s6617_s13 + $0x1] ss:$0 sm:$0xff]  ;;  %v5987_v41 = vld [vmem:[%s6617_s13 + $0x2] ss:$0 sm:$0xff] }
 0x2aa   : > { %v1180_v44 = vsel %vm1099_vm0, %v5950_v42, 0.0  ;;  %v1184_v45 = vsel %vm1183_vm2, %v5952_v43, 0.0 }
 0x2ab   : > { %1181 = vadd.xlane.f32.xlu1 %v1180_v44  ;;  %1185 = vadd.xlane.f32.xlu0 %v1184_v45  ;;  %v4157_v44 = vld [vmem:[%s6618_s1] ss:$0 sm:$0xff]  ;;  %v5991_v45 = vld [vmem:[%s6617_s13 + $0x3] ss:$0 sm:$0xff] }
 0x334   : > { %v1179_v46 = vpop.xlane.xlu0 %1178 }
 0x335   : > { %v1187_v47 = vmul.f32 0.03125, %v1179_v46 }
 0x337   : > { %v1190_v48 = vsub.f32 %v5944_v36, %v1187_v47 }
 0x338   : > { %v1182_v49 = vpop.xlane.xlu1 %1181  ;;  %v1186_v50 = vpop.xlane.xlu0 %1185 }
 0x339   : > { %v1188_v51 = vmul.f32 0.03125, %v1182_v49  ;;  %v1189_v52 = vmul.f32 0.03125, %v1186_v50  ;;  %v1193_v53 = vmul.f32 %v1190_v48, %v1190_v48 }
 0x33b   : > { %v1191_v54 = vsub.f32 %v5950_v42, %v1188_v51  ;;  %v1192_v55 = vsub.f32 %v5952_v43, %v1189_v52  ;;  %v1196_v56 = vsel %vm1099_vm0, %v1193_v53, 0.0 }
 0x33c   : > { %1197 = vadd.xlane.f32.xlu1 %v1196_v56 }
 0x33d   : > { %v1194_v57 = vmul.f32 %v1191_v54, %v1191_v54  ;;  %v1195_v58 = vmul.f32 %v1192_v55, %v1192_v55 }
 0x33f   : > { %v1199_v59 = vsel %vm1099_vm0, %v1194_v57, 0.0  ;;  %v1202_v60 = vsel %vm1183_vm2, %v1195_v58, 0.0 }
 0x340   : > { %1200 = vadd.xlane.f32.xlu0 %v1199_v59  ;;  %1203 = vadd.xlane.f32.xlu1 %v1202_v60  ;;  %v4152_v59 = vld [vmem:[#allocation12] ss:$0 sm:$0xff] }
 0x3c9   : > { %v1198_v2 = vpop.xlane.xlu1 %1197 }
 0x3ca   : > { %v1205_v3 = vmul.f32 0.03125, %v1198_v2 }
 0x3cc   : > { %v1208_v4 = vadd.f32 1e-05, %v1205_v3 }
 0x3cd   : > { %v1204_v5 = vpop.xlane.xlu1 %1203  ;;  %v1201_v6 = vpop.xlane.xlu0 %1200 }
 0x3ce   : > { %4919 = vrsqrt.f32 %v1208_v4  ;;  %v1207_v7 = vmul.f32 0.03125, %v1204_v5  ;;  %v1206_v8 = vmul.f32 0.03125, %v1201_v6 }
 0x3d0   : > { %v1210_v9 = vadd.f32 1e-05, %v1207_v7  ;;  %v1209_v10 = vadd.f32 1e-05, %v1206_v8 }
 0x3d2   : > { %4921 = vrsqrt.f32 %v1210_v9 }
 0x3d3   : > { %4923 = vrsqrt.f32 %v1209_v10 }
 0x3d8   : > { %v4920_v11 = vpop.eup %4919 }
 0x3d9   : > { %v1214_v12 = vmul.f32 %v4920_v11, %v1190_v48 }
 0x3db   : > { %v1223_v18 = vmul.f32 %v4145_v13, %v1214_v12 }
 0x3dc   : > { %v4922_v14 = vpop.eup %4921 }
 0x3dd   : > { %v4924_v15 = vpop.eup %4923  ;;  %v1216_v16 = vmul.f32 %v4922_v14, %v1192_v55  ;;  %v1232_v23 = vadd.f32 %v4146_v19, %v1223_v18 }
 0x3de   : > { %v1215_v17 = vmul.f32 %v4924_v15, %v1191_v54 }
 0x3df   : > { %v1225_v20 = vmul.f32 %v4145_v13, %v1216_v16 }
 0x3e0   : > { %v1224_v21 = vmul.f32 %v4145_v13, %v1215_v17 }
 0x3e1   : > { %v1234_v22 = vadd.f32 %v4146_v19, %v1225_v20 }
 0x3e2   : > { %v1233_v24 = vadd.f32 %v4146_v19, %v1224_v21 }
 0x3e3   : > { %v1236_v25 = vpack.c.bf16 %v1234_v22, %v1234_v22 }
 0x3e4   : > { %v1235_v26 = vpack.c.bf16 %v1233_v24, %v1232_v23 }
 0x3e6   : > { %4435 = vmatprep.mubr.msk.bf16.mxu1 %vm1099_vm0, %v1235_v26  ;;  %4451 = vmatprep.mubr.msk.bf16.mxu0 %vm1099_vm0, %v1235_v26 }
 0x3e7   : > { %4436 = vmatmul.mubr.msk.bf16.vlgmr.msra.gmra.mrb[0].mxu1 %vm1099_vm0, %v1236_v25  ;;  %4452 = vmatmul.mubr.msk.bf16.vlgmr.msra.gmra.mrb[0].mxu0 %vm1099_vm0, %v1236_v25 }
 0x3e8   : > { %4440 = vmatpush3.bf16.msra.mxu1 %v4881_v1  ;;  %4443 = vmatprep.mubr.msk.bf16.mxu1 %vm1099_vm0, %v1235_v26 }
 0x3e9   : > { %4441 = vmatprep.subr.bf16.mxu1 %v4882_v27 }
 0x3ec   : > { %4442 = vmatpush3.bf16.msra.mxu1 %v4882_v27 }
 0x3ef   : > { %4444 = vmatmul.mubr.msk.bf16.vlgmr.msra.gmra.mrb[4].mxu1 %vm1099_vm0, %v1236_v25 }
 0x4ba   : > { %v4437_v28 = vpop.f32.mrb[0].mxu1  ;;  %v5978_v30 = vpop.f32.mrb[0].mxu0 }
 0x4bb   : > { %v1300_v31 = vpop.f32.mrb[1].mxu1  ;;  %v1442_v32 = vpop.f32.mrb[1].mxu0  ;;  %v1309_v9 = vadd.f32 %v4437_v28, %v4147_v29  ;;  %v1451_v17 = vadd.f32 %v5978_v30, %v4157_v44 }
 0x4bc   : > { %v4438_v33 = vpop.f32.mrb[2].mxu1  ;;  %v4454_v34 = vpop.f32.mrb[2].mxu0  ;;  %v1301_v37 = vadd.f32 %v4147_v29, %v1300_v31  ;;  %v1443_v51 = vadd.f32 %v4157_v44, %v1442_v32 }
 0x4bd   : > { %v1303_v38 = vpop.f32.mrb[3].mxu1  ;;  %v1445_v39 = vpop.f32.mrb[3].mxu0  ;;  %v1482_v11 = vmul.f32 %v5981_v35, %v1309_v9  ;;  %v1485_v12 = vmul.f32 %v5984_v40, %v1309_v9  ;;  %v1488_v15 = vmul.f32 %v5987_v41, %v1309_v9  ;;  %v1491_v16 = vmul.f32 %v5991_v45, %v1309_v9 }
 0x4be   : > { %v1304_v46 = vadd.f32 %v4147_v29, %v1303_v38  ;;  %v1446_v47 = vadd.f32 %v4157_v44, %v1445_v39  ;;  %v1480_v48 = vmul.f32 %v5981_v35, %v1301_v37  ;;  %v1483_v49 = vmul.f32 %v5984_v40, %v1301_v37 }
 0x4bf   : > { %v1486_v50 = vmul.f32 %v5987_v41, %v1301_v37  ;;  %v1489_v57 = vmul.f32 %v5991_v45, %v1301_v37  ;;  %v1493_v13 = vpack.c.bf16 %v1482_v11, %v1482_v11  ;;  %v1495_v14 = vpack.c.bf16 %v1485_v12, %v1485_v12 }
 0x4c0   : > { %v1481_v52 = vmul.f32 %v5981_v35, %v1304_v46  ;;  %v1484_v53 = vmul.f32 %v5984_v40, %v1304_v46  ;;  %v1487_v54 = vmul.f32 %v5987_v41, %v1304_v46  ;;  %v1490_v55 = vmul.f32 %v5991_v45, %v1304_v46 }
 0x4c1   : > { %v6001_v58 = vpack.c.bf16 %v1446_v47, %v1443_v51  ;;  %v1497_v18 = vpack.c.bf16 %v1488_v15, %v1488_v15  ;;  %v1499_v19 = vpack.c.bf16 %v1491_v16, %v1491_v16  ;;  %v6026_v20 = vpack.c.bf16 %v1451_v17, %v1451_v17 }
 0x4c2   : > { %v4445_v56 = vpop.f32.mrb[4].mxu1  ;;  %v1492_v62 = vpack.c.bf16 %v1481_v52, %v1480_v48  ;;  %v1494_v63 = vpack.c.bf16 %v1484_v53, %v1483_v49  ;;  %v1496_v0 = vpack.c.bf16 %v1487_v54, %v1486_v50  ;;  %v1498_v2 = vpack.c.bf16 %v1490_v55, %v1489_v57 }
 0x4c3   : > { %v1371_v60 = vpop.f32.mrb[5].mxu1  ;;  %v1380_v3 = vadd.f32 %v4445_v56, %v4152_v59  ;;  %v6038_v21 = vsel %vm1886_vm3, %v6026_v20, 0 }
 0x4c4   : > { %v4446_v61 = vpop.f32.mrb[6].mxu1  ;;  %v1372_v4 = vadd.f32 %v4152_v59, %v1371_v60  ;;  %4459 = vmatprep.mubr.msk.bf16.mxu1 %vm1099_vm0, %v1492_v62  ;;  %4467 = vmatprep.mubr.msk.bf16.mxu0 %vm1099_vm0, %v1494_v63 }
 0x4c5   : > { %v1374_v1 = vpop.f32.mrb[7].mxu1  ;;  %v1501_v7 = vpack.c.bf16 %v1380_v3, %v1380_v3 }
 0x4c6   : > { %v1375_v5 = vadd.f32 %v4152_v59, %v1374_v1 }
 0x4c7   : > { %v1514_v10 = vsel %vm1099_vm0, %v1501_v7, 0 }
 0x4c8   : > { %v1500_v6 = vpack.c.bf16 %v1375_v5, %v1372_v4 }
 0x4ca   : > { %4687 = vmatprep.subr.msk.bf16.mxu1 %vm1099_vm0, %v1500_v6  ;;  %4689 = vmatprep.subr.msk.bf16.mxu0 %vm1099_vm0, %v1500_v6  ;;  %v1511_v8 = vsel %vm1099_vm0, %v1500_v6, 0 }
 0x4cb   : > { %4456 = vmatpush3.bf16.xpose.msra.mxu1 %v1511_v8  ;;  %4464 = vmatpush3.bf16.xpose.msra.mxu0 %v1511_v8 }
 0x4cc   : > { %4688 = vmatprep.subr.msk.bf16.mxu1 %vm1099_vm0, %v1501_v7  ;;  %4690 = vmatprep.subr.msk.bf16.mxu0 %vm1099_vm0, %v1501_v7 }
 0x4d3   : > { %4458 = vmatpush3.bf16.xpose.msra.mxu1 %v1514_v10  ;;  %4466 = vmatpush3.bf16.xpose.msra.mxu0 %v1514_v10 }
 0x4d4   : > { %4691 = vmatprep.subr.msk.bf16.mxu1 %vm1099_vm0, %v1500_v6  ;;  %4693 = vmatprep.subr.msk.bf16.mxu0 %vm1099_vm0, %v1500_v6 }
 0x4da   : > { %4460 = vmatmul.mubr.msk.bf16.vlgmr.msra.gmra.mrb[8].mxu1 %vm1099_vm0, %v1493_v13  ;;  %4468 = vmatmul.mubr.msk.bf16.vlgmr.msra.gmra.mrb[4].mxu0 %vm1099_vm0, %v1495_v14 }
 0x4db   : > { %4472 = vmatpush3.bf16.xpose.msra.mxu1 %v1511_v8  ;;  %4475 = vmatprep.mubr.msk.bf16.mxu1 %vm1099_vm0, %v1496_v0 }
 0x4dc   : > { %4480 = vmatpush3.bf16.xpose.msra.mxu0 %v1511_v8  ;;  %4483 = vmatprep.mubr.msk.bf16.mxu0 %vm1099_vm0, %v1498_v2 }
 0x4dd   : > { %4692 = vmatprep.subr.msk.bf16.mxu1 %vm1099_vm0, %v1501_v7  ;;  %4694 = vmatprep.subr.msk.bf16.mxu0 %vm1099_vm0, %v1501_v7 }
 0x4e3   : > { %4474 = vmatpush3.bf16.xpose.msra.mxu1 %v1514_v10 }
 0x4e4   : > { %4482 = vmatpush3.bf16.xpose.msra.mxu0 %v1514_v10  ;;  %4487 = vmatprep.subr.bf16.mxu1 %v6001_v58 }
 0x4e5   : > { %4495 = vmatprep.subr.bf16.mxu0 %v6001_v58 }
 0x4ea   : > { %4476 = vmatmul.mubr.msk.bf16.vlgmr.msra.gmra.mrb[12].mxu1 %vm1099_vm0, %v1497_v18 }
 0x4eb   : > { %4484 = vmatmul.mubr.msk.bf16.vlgmr.msra.gmra.mrb[8].mxu0 %vm1099_vm0, %v1499_v19  ;;  %4488 = vmatpush3.bf16.msra.mxu1 %v6001_v58 }
 0x4ec   : > { %4496 = vmatpush3.bf16.msra.mxu0 %v6001_v58  ;;  %4695 = vmatprep.subr.msk.bf16.mxu1 %vm1886_vm3, %v6026_v20 }
 0x4ed   : > { %4696 = vmatprep.subr.msk.bf16.mxu0 %vm1886_vm3, %v6026_v20 }
 0x4ef   : > { %4490 = vmatpush3.bf16.msra.mxu1 %v6038_v21 }
 0x4f0   : > { %4498 = vmatpush3.bf16.msra.mxu0 %v6038_v21  ;;  %4503 = vmatprep.subr.bf16.mxu1 %v6001_v58 }
 0x4f1   : > { %4511 = vmatprep.subr.bf16.mxu0 %v6001_v58 }
 0x5ad   : > { %v4461_v22 = vpop.f32.mrb[8].mxu1  ;;  %v4469_v23 = vpop.f32.mrb[4].mxu0 }
 0x5ae   : > { %v1728_v24 = vmul.f32 0.35355338, %v4461_v22  ;;  %v1731_v25 = vmul.f32 0.35355338, %v4469_v23  ;;  %v1550_v26 = vpop.f32.mrb[9].mxu1  ;;  %v1604_v27 = vpop.f32.mrb[5].mxu0 }
 0x5af   : > { %v1726_v28 = vmul.f32 0.35355338, %v1550_v26  ;;  %v4462_v29 = vpop.f32.mrb[10].mxu1  ;;  %v4470_v30 = vpop.f32.mrb[6].mxu0  ;;  %v1729_v31 = vmul.f32 0.35355338, %v1604_v27 }
 0x5b0   : > { %v1553_v32 = vpop.f32.mrb[11].mxu1  ;;  %v1607_v33 = vpop.f32.mrb[7].mxu0  ;;  %v1755_v34 = vsel %vm1745_vm4, %v1731_v25, -inf  ;;  %v1746_v37 = vsel %vm1745_vm4, %v1728_v24, -inf }
 0x5b1   : > { %1756 = vmax.xlane.f32.xlu1 %v1755_v34  ;;  %1747 = vmax.xlane.f32.xlu0 %v1746_v37  ;;  %v1727_v38 = vmul.f32 0.35355338, %v1553_v32  ;;  %v1730_v39 = vmul.f32 0.35355338, %v1607_v33  ;;  %v1749_v44 = vsel %vm1738_vm5, %v1729_v31, -inf  ;;  %v1739_v46 = vsel %vm1738_vm5, %v1726_v28, -inf }
 0x5b3   : > { %v1752_v47 = vsel %vm1738_vm5, %v1730_v39, -inf  ;;  %v1742_v48 = vsel %vm1738_vm5, %v1727_v38, -inf }
 0x5b5   : > { %1750 = vmax.xlane.f32.xlu1 %v1749_v44  ;;  %1740 = vmax.xlane.f32.xlu0 %v1739_v46 }
 0x5b9   : > { %1753 = vmax.xlane.f32.xlu0 %v1752_v47  ;;  %1743 = vmax.xlane.f32.xlu1 %v1742_v48 }
 0x5bd   : > { %v4477_v49 = vpop.f32.mrb[12].mxu1 }
 0x5be   : > { %v1734_v50 = vmul.f32 0.35355338, %v4477_v49  ;;  %v4485_v51 = vpop.f32.mrb[8].mxu0  ;;  %v1658_v52 = vpop.f32.mrb[13].mxu1 }
 0x5bf   : > { %v6050_v53 = vmul.f32 0.35355338, %v1658_v52  ;;  %v1712_v54 = vpop.f32.mrb[9].mxu0  ;;  %v4478_v55 = vpop.f32.mrb[14].mxu1  ;;  %v6060_v2 = vmul.f32 0.35355338, %v4485_v51 }
 0x5c0   : > { %v1735_v56 = vmul.f32 0.35355338, %v1712_v54  ;;  %v4486_v57 = vpop.f32.mrb[10].mxu0  ;;  %v1661_v59 = vpop.f32.mrb[15].mxu1  ;;  %v1764_v60 = vsel %vm1745_vm4, %v1734_v50, -inf }
 0x5c1   : > { %v1715_v61 = vpop.f32.mrb[11].mxu0  ;;  %1765 = vmax.xlane.f32.xlu0 %v1764_v60  ;;  %v6053_v62 = vmul.f32 0.35355338, %v1661_v59  ;;  %v1758_v1 = vsel %vm1738_vm5, %v6050_v53, -inf  ;;  %v1773_v5 = vsel %vm1745_vm4, %v6060_v2, -inf }
 0x5c2   : > { %v1767_v63 = vsel %vm1738_vm5, %v1735_v56, -inf  ;;  %v6056_v0 = vmul.f32 0.35355338, %v1715_v61 }
 0x5c3   : > { %1768 = vmax.xlane.f32.xlu1 %v1767_v63  ;;  %v1761_v3 = vsel %vm1738_vm5, %v6053_v62, -inf }
 0x5c4   : > { %v1770_v4 = vsel %vm1738_vm5, %v6056_v0, -inf }
 0x5c5   : > { %1759 = vmax.xlane.f32.xlu0 %v1758_v1 }
 0x5c7   : > { %1762 = vmax.xlane.f32.xlu1 %v1761_v3 }
 0x5c9   : > { %1771 = vmax.xlane.f32.xlu0 %v1770_v4 }
 0x5cb   : > { %1774 = vmax.xlane.f32.xlu1 %v1773_v5 }
 0x63e   : > { %v1757_v6 = vpop.xlane.xlu1 %1756  ;;  %v1748_v7 = vpop.xlane.xlu0 %1747 }
 0x63f   : > { %v1781_v8 = vsub.f32 %v1731_v25, %v1757_v6  ;;  %v1778_v9 = vsub.f32 %v1728_v24, %v1748_v7 }
 0x641   : > { %v1798_v10 = vmul.f32 1.442695, %v1781_v8  ;;  %v1792_v11 = vmul.f32 1.442695, %v1778_v9 }
 0x642   : > { %v1751_v12 = vpop.xlane.xlu1 %1750  ;;  %v1741_v13 = vpop.xlane.xlu0 %1740 }
 0x643   : > { %4925 = vpow2.f32 %v1798_v10  ;;  %v1779_v14 = vsub.f32 %v1729_v31, %v1751_v12  ;;  %v1776_v15 = vsub.f32 %v1726_v28, %v1741_v13 }
 0x644   : > { %4927 = vpow2.f32 %v1792_v11 }
 0x645   : > { %v1794_v16 = vmul.f32 1.442695, %v1779_v14  ;;  %v1788_v17 = vmul.f32 1.442695, %v1776_v15 }
 0x646   : > { %v1754_v18 = vpop.xlane.xlu0 %1753  ;;  %v1744_v19 = vpop.xlane.xlu1 %1743 }
 0x647   : > { %4929 = vpow2.f32 %v1794_v16  ;;  %v1780_v22 = vsub.f32 %v1730_v39, %v1754_v18  ;;  %v1777_v23 = vsub.f32 %v1727_v38, %v1744_v19 }
 0x648   : > { %4931 = vpow2.f32 %v1788_v17 }
 0x649   : > { %v1796_v26 = vmul.f32 1.442695, %v1780_v22  ;;  %v1790_v27 = vmul.f32 1.442695, %v1777_v23 }
 0x64b   : > { %4933 = vpow2.f32 %v1796_v26 }
 0x64c   : > { %4935 = vpow2.f32 %v1790_v27 }
 0x64d   : > { %v6068_v24 = vpop.eup %4925 }
 0x64e   : > { %v6070_v25 = vpop.eup %4927  ;;  %v1766_v29 = vpop.xlane.xlu0 %1765  ;;  %v1827_v28 = vsel %vm1745_vm4, %v6068_v24, 0.0 }
 0x64f   : > { %v1784_v30 = vsub.f32 %v1734_v50, %v1766_v29  ;;  %v1818_v31 = vsel %vm1745_vm4, %v6070_v25, 0.0  ;;  %1828 = vadd.xlane.f32.xlu1 %v1827_v28 }
 0x650   : > { %v1769_v32 = vpop.xlane.xlu1 %1768  ;;  %1819 = vadd.xlane.f32.xlu0 %v1818_v31 }
 0x651   : > { %v6076_v33 = vpop.eup %4929  ;;  %v1804_v34 = vmul.f32 1.442695, %v1784_v30  ;;  %v1785_v37 = vsub.f32 %v1735_v56, %v1769_v32 }
 0x652   : > { %v6078_v38 = vpop.eup %4931  ;;  %v1760_v39 = vpop.xlane.xlu0 %1759  ;;  %v1821_v44 = vsel %vm1738_vm5, %v6076_v33, 0.0 }
 0x653   : > { %4937 = vpow2.f32 %v1804_v34  ;;  %v1806_v46 = vmul.f32 1.442695, %v1785_v37  ;;  %v1782_v47 = vsub.f32 %v6050_v53, %v1760_v39  ;;  %v1812_v48 = vsel %vm1738_vm5, %v6078_v38, 0.0  ;;  %1822 = vadd.xlane.f32.xlu1 %v1821_v44 }
 0x654   : > { %1813 = vadd.xlane.f32.xlu0 %v1812_v48  ;;  %v1763_v49 = vpop.xlane.xlu1 %1762 }
 0x655   : > { %v6085_v50 = vpop.eup %4933  ;;  %4939 = vpow2.f32 %v1806_v46  ;;  %v1800_v51 = vmul.f32 1.442695, %v1782_v47  ;;  %v1783_v52 = vsub.f32 %v6053_v62, %v1763_v49 }
 0x656   : > { %v6088_v54 = vpop.eup %4935  ;;  %v1772_v55 = vpop.xlane.xlu0 %1771  ;;  %v1824_v56 = vsel %vm1738_vm5, %v6085_v50, 0.0 }
 0x657   : > { %4941 = vpow2.f32 %v1800_v51  ;;  %v1802_v53 = vmul.f32 1.442695, %v1783_v52  ;;  %v1786_v57 = vsub.f32 %v6056_v0, %v1772_v55  ;;  %v1815_v59 = vsel %vm1738_vm5, %v6088_v54, 0.0 }
 0x658   : > { %1825 = vadd.xlane.f32.xlu0 %v1824_v56  ;;  %1816 = vadd.xlane.f32.xlu1 %v1815_v59  ;;  %v1775_v60 = vpop.xlane.xlu1 %1774 }
 0x659   : > { %4943 = vpow2.f32 %v1802_v53  ;;  %v1808_v61 = vmul.f32 1.442695, %v1786_v57  ;;  %v1787_v62 = vsub.f32 %v6060_v2, %v1775_v60 }
 0x65b   : > { %4945 = vpow2.f32 %v1808_v61  ;;  %v1810_v63 = vmul.f32 1.442695, %v1787_v62 }
 0x65d   : > { %v6096_v1 = vpop.eup %4937  ;;  %4947 = vpow2.f32 %v1810_v63  ;;  %v4883_v63 = vld [vmem:[%s6619_s20] sm:$0xff]  }
 0x65e   : > { %v1836_v3 = vsel %vm1745_vm4, %v6096_v1, 0.0 }
 0x65f   : > { %v6100_v4 = vpop.eup %4939  ;;  %1837 = vadd.xlane.f32.xlu0 %v1836_v3 }
 0x660   : > { %v1839_v0 = vsel %vm1738_vm5, %v6100_v4, 0.0 }
 0x661   : > { %v6104_v5 = vpop.eup %4941  ;;  %1840 = vadd.xlane.f32.xlu1 %v1839_v0 }
 0x662   : > { %v1830_v2 = vsel %vm1738_vm5, %v6104_v5, 0.0 }
 0x663   : > { %v6108_v6 = vpop.eup %4943  ;;  %1831 = vadd.xlane.f32.xlu0 %v1830_v2 }
 0x664   : > { %v1833_v7 = vsel %vm1738_vm5, %v6108_v6, 0.0 }
 0x665   : > { %v6112_v8 = vpop.eup %4945  ;;  %1834 = vadd.xlane.f32.xlu1 %v1833_v7 }
 0x666   : > { %v1842_v9 = vsel %vm1738_vm5, %v6112_v8, 0.0 }
 0x667   : > { %v6116_v10 = vpop.eup %4947  ;;  %1843 = vadd.xlane.f32.xlu0 %v1842_v9 }
 0x668   : > { %v1845_v11 = vsel %vm1745_vm4, %v6116_v10, 0.0 }
 0x669   : > { %1846 = vadd.xlane.f32.xlu1 %v1845_v11 }
 0x6dc   : > { %v1829_v12 = vpop.xlane.xlu1 %1828 }
 0x6dd   : > { %v1820_v13 = vpop.xlane.xlu0 %1819  ;;  %4949 = vrcp.f32 %v1829_v12 }
 0x6de   : > { %4951 = vrcp.f32 %v1820_v13 }
 0x6e0   : > { %v1823_v14 = vpop.xlane.xlu1 %1822 }
 0x6e1   : > { %v1814_v15 = vpop.xlane.xlu0 %1813  ;;  %4953 = vrcp.f32 %v1823_v14 }
 0x6e2   : > { %4955 = vrcp.f32 %v1814_v15 }
 0x6e5   : > { %v1826_v16 = vpop.xlane.xlu0 %1825  ;;  %v1817_v17 = vpop.xlane.xlu1 %1816 }
 0x6e6   : > { %4957 = vrcp.f32 %v1826_v16 }
 0x6e7   : > { %4959 = vrcp.f32 %v1817_v17  ;;  %v4950_v18 = vpop.eup %4949 }
 0x6e8   : > { %v4952_v22 = vpop.eup %4951  ;;  %v1859_v28 = vmul.f32 %v4950_v18, %v6068_v24 }
 0x6e9   : > { %v1853_v32 = vmul.f32 %v4952_v22, %v6070_v25 }
 0x6ea   : > { %v1875_v49 = vpack.c.bf16 %v1859_v28, %v1859_v28 }
 0x6eb   : > { %v4954_v23 = vpop.eup %4953  ;;  %v1873_v25 = vpack.c.bf16 %v1853_v32, %v1853_v32 }
 0x6ec   : > { %v1838_v19 = vpop.xlane.xlu0 %1837  ;;  %v4956_v27 = vpop.eup %4955  ;;  %v1855_v34 = vmul.f32 %v4954_v23, %v6076_v33 }
 0x6ed   : > { %4961 = vrcp.f32 %v1838_v19  ;;  %v1849_v44 = vmul.f32 %v4956_v27, %v6078_v38 }
 0x6ee   : > { %v1841_v26 = vpop.xlane.xlu1 %1840 }
 0x6f0   : > { %v4958_v29 = vpop.eup %4957  ;;  %v1832_v30 = vpop.xlane.xlu0 %1831 }
 0x6f1   : > { %v4960_v31 = vpop.eup %4959  ;;  %4963 = vrcp.f32 %v1832_v30  ;;  %v1857_v37 = vmul.f32 %v4958_v29, %v6085_v50 }
 0x6f2   : > { %4965 = vrcp.f32 %v1841_v26  ;;  %v1835_v39 = vpop.xlane.xlu1 %1834  ;;  %v1851_v46 = vmul.f32 %v4960_v31, %v6088_v54 }
 0x6f3   : > { %4967 = vrcp.f32 %v1835_v39  ;;  %v1874_v47 = vpack.c.bf16 %v1857_v37, %v1855_v34 }
 0x6f4   : > { %v1844_v48 = vpop.xlane.xlu0 %1843  ;;  %v1872_v24 = vpack.c.bf16 %v1851_v46, %v1849_v44 }
 0x6f5   : > { %4969 = vrcp.f32 %v1844_v48  ;;  %4499 = vmatprep.mubr.msk.bf16.mxu0 %vm1738_vm5, %v1874_v47 }
 0x6f6   : > { %4491 = vmatprep.mubr.msk.bf16.mxu1 %vm1738_vm5, %v1872_v24  ;;  %4500 = vmatmul.mubr.msk.bf16.vlgmr.msra.gmra.mrb[12].mxu0 %vm1738_vm5, %v1875_v49  ;;  %v1847_v33 = vpop.xlane.xlu1 %1846 }
 0x6f7   : > { %4492 = vmatmul.mubr.msk.bf16.vlgmr.msra.gmra.mrb[16].mxu1 %vm1738_vm5, %v1873_v25  ;;  %4512 = vmatpush3.bf16.msra.mxu0 %v6001_v58  ;;  %4971 = vrcp.f32 %v1847_v33  ;;  %v4962_v38 = vpop.eup %4961 }
 0x6f8   : > { %4504 = vmatpush3.bf16.msra.mxu1 %v6001_v58  ;;  %4698 = vmatprep.subr.msk.bf16.mxu0 %vm1886_vm3, %v6026_v20  ;;  %v1865_v55 = vmul.f32 %v4962_v38, %v6096_v1  ;;  %v4884_v1 = vld [vmem:[%s6619_s20 + $0x8] sm:$0xff]  }
 0x6f9   : > { %4697 = vmatprep.subr.msk.bf16.mxu1 %vm1886_vm3, %v6026_v20 }
 0x6fa   : > { %v1877_v60 = vpack.c.bf16 %v1865_v55, %v1865_v55 }
 0x6fb   : > { %v4964_v50 = vpop.eup %4963  ;;  %4514 = vmatpush3.bf16.msra.mxu0 %v6038_v21 }
 0x6fc   : > { %v4966_v51 = vpop.eup %4965  ;;  %4506 = vmatpush3.bf16.msra.mxu1 %v6038_v21  ;;  %v1861_v52 = vmul.f32 %v4964_v50, %v6104_v5 }
 0x6fd   : > { %v4968_v54 = vpop.eup %4967  ;;  %v1867_v20 = vmul.f32 %v4966_v51, %v6100_v4  ;;  %4519 = vmatprep.subr.bf16.mxu1 %v4883_v63 }
 0x6fe   : > { %v1863_v58 = vmul.f32 %v4968_v54, %v6108_v6 }
 0x6ff   : > { %v4970_v56 = vpop.eup %4969 }
 0x700   : > { %v1876_v53 = vpack.c.bf16 %v1863_v58, %v1861_v52  ;;  %v1869_v57 = vmul.f32 %v4970_v56, %v6112_v8 }
 0x701   : > { %v4972_v59 = vpop.eup %4971 }
 0x702   : > { %v1871_v61 = vmul.f32 %v4972_v59, %v6116_v10  ;;  %4507 = vmatprep.mubr.msk.bf16.mxu1 %vm1738_vm5, %v1876_v53  ;;  %v1878_v21 = vpack.c.bf16 %v1869_v57, %v1867_v20  ;;  %v4186_v57 = vld [vmem:[#allocation14] ss:$0 sm:$0xff] }
 0x703   : > { %4508 = vmatmul.mubr.msk.bf16.vlgmr.msra.gmra.mrb[20].mxu1 %vm1738_vm5, %v1877_v60 }
 0x704   : > { %4515 = vmatprep.mubr.msk.bf16.mxu0 %vm1738_vm5, %v1878_v21  ;;  %v1879_v62 = vpack.c.bf16 %v1871_v61, %v1871_v61  ;;  %4520 = vmatpush3.bf16.msra.mxu1 %v4883_v63 }
 0x705   : > { %4521 = vmatprep.subr.bf16.mxu1 %v4884_v1 }
 0x706   : > { %4516 = vmatmul.mubr.msk.bf16.vlgmr.msra.gmra.mrb[16].mxu0 %vm1738_vm5, %v1879_v62 }
 0x708   : > { %4522 = vmatpush3.bf16.msra.mxu1 %v4884_v1 }
 0x7c9   : > { %v4501_v3 = vpop.f32.mrb[12].mxu0 }
 0x7ca   : > { %v4493_v4 = vpop.f32.mrb[16].mxu1  ;;  %v2105_v0 = vmul.f32 %v4501_v3, %v5984_v40  ;;  %v1978_v5 = vpop.f32.mrb[13].mxu0 }
 0x7cb   : > { %v2102_v2 = vmul.f32 %v4493_v4, %v5981_v35  ;;  %v1924_v6 = vpop.f32.mrb[17].mxu1  ;;  %v2103_v7 = vmul.f32 %v5984_v40, %v1978_v5  ;;  %v4502_v8 = vpop.f32.mrb[14].mxu0 }
 0x7cc   : > { %v2127_v9 = vsel %vm1183_vm2, %v2105_v0, 0.0  ;;  %v2100_v10 = vmul.f32 %v5981_v35, %v1924_v6  ;;  %v4494_v11 = vpop.f32.mrb[18].mxu1  ;;  %v1981_v12 = vpop.f32.mrb[15].mxu0 }
 0x7cd   : > { %v2126_v13 = vsel %vm1183_vm2, %v2102_v2, 0.0  ;;  %v2113_v14 = vsel %vm1099_vm0, %v2103_v7, 0.0  ;;  %v1927_v15 = vpop.f32.mrb[19].mxu1  ;;  %v2104_v16 = vmul.f32 %v5984_v40, %v1981_v12 }
 0x7ce   : > { %v2128_v17 = vadd.f32 %v2127_v9, %v2126_v13  ;;  %v2112_v18 = vsel %vm1099_vm0, %v2100_v10, 0.0  ;;  %v2101_v19 = vmul.f32 %v5981_v35, %v1927_v15 }
 0x7cf   : > { %v2114_v22 = vadd.f32 %v2113_v14, %v2112_v18  ;;  %v2120_v23 = vsel %vm1099_vm0, %v2104_v16, 0.0  ;;  %v4886_v18 = vld [vmem:[%s6620_s23 + $0x8] sm:$0xff]  }
 0x7d0   : > { %v2119_v26 = vsel %vm1099_vm0, %v2101_v19, 0.0 }
 0x7d1   : > { %v2121_v27 = vadd.f32 %v2120_v23, %v2119_v26 }
 0x7d6   : > { %v4509_v29 = vpop.f32.mrb[20].mxu1 }
 0x7d7   : > { %v2108_v28 = vmul.f32 %v4509_v29, %v5987_v41  ;;  %v2032_v30 = vpop.f32.mrb[21].mxu1 }
 0x7d8   : > { %v2106_v31 = vmul.f32 %v5987_v41, %v2032_v30  ;;  %v4510_v32 = vpop.f32.mrb[22].mxu1 }
 0x7d9   : > { %v2129_v40 = vsel %vm1183_vm2, %v2108_v28, 0.0  ;;  %v2035_v34 = vpop.f32.mrb[23].mxu1  ;;  %v4517_v37 = vpop.f32.mrb[16].mxu0 }
 0x7da   : > { %v2130_v39 = vadd.f32 %v2129_v40, %v2128_v17  ;;  %v2115_v35 = vsel %vm1099_vm0, %v2106_v31, 0.0  ;;  %v2107_v44 = vmul.f32 %v5987_v41, %v2035_v34  ;;  %v2111_v46 = vmul.f32 %v4517_v37, %v5991_v45  ;;  %v2086_v47 = vpop.f32.mrb[17].mxu0  ;;  %v4885_v17 = vld [vmem:[%s6620_s23] sm:$0xff]  }
 0x7db   : > { %v2116_v48 = vadd.f32 %v2115_v35, %v2114_v22  ;;  %v2109_v24 = vmul.f32 %v5991_v45, %v2086_v47  ;;  %v4518_v49 = vpop.f32.mrb[18].mxu0  ;;  %4527 = vmatprep.subr.bf16.mxu0 %v4885_v17  ;;  %v4187_v40 = vld [vmem:[%s6621_s7] ss:$0 sm:$0xff] }
 0x7dc   : > { %v2122_v25 = vsel %vm1099_vm0, %v2107_v44, 0.0  ;;  %v2131_v33 = vsel %vm1183_vm2, %v2111_v46, 0.0  ;;  %v2089_v38 = vpop.f32.mrb[19].mxu0  ;;  %4528 = vmatpush3.bf16.msra.mxu0 %v4885_v17  ;;  %v4188_v46 = vld [vmem:[%s6622_s6] ss:$0 sm:$0xff] }
 0x7dd   : > { %v2123_v50 = vadd.f32 %v2122_v25, %v2121_v27  ;;  %v2132_v51 = vadd.f32 %v2131_v33, %v2130_v39  ;;  %v2117_v52 = vsel %vm1099_vm0, %v2109_v24, 0.0  ;;  %v2110_v54 = vmul.f32 %v5991_v45, %v2089_v38  ;;  %4529 = vmatprep.subr.bf16.mxu0 %v4886_v18 }
 0x7de   : > { %v2118_v55 = vadd.f32 %v2117_v52, %v2116_v48  ;;  %v4888_v52 = vld [vmem:[%s6623_s12 + $0x8] sm:$0xff]  }
 0x7df   : > { %v2124_v41 = vsel %vm1099_vm0, %v2110_v54, 0.0  ;;  %v2134_v53 = vpack.c.bf16 %v2132_v51, %v2132_v51  ;;  %v4887_v51 = vld [vmem:[%s6623_s12] sm:$0xff]   ;;  %v4889_v54 = vld [vmem:[%s6623_s12 + $0x10] sm:$0xff]  }
 0x7e0   : > { %v2125_v58 = vadd.f32 %v2124_v41, %v2123_v50  ;;  %4530 = vmatpush3.bf16.msra.mxu0 %v4886_v18  ;;  %4535 = vmatprep.subr.bf16.mxu1 %v4887_v51  ;;  %v4891_v41 = vld [vmem:[%s6623_s12 + $0x20] sm:$0xff]  }
 0x7e2   : > { %v2133_v56 = vpack.c.bf16 %v2125_v58, %v2118_v55  ;;  %v4890_v55 = vld [vmem:[%s6623_s12 + $0x18] sm:$0xff]   ;;  %v4892_v58 = vld [vmem:[%s6623_s12 + $0x28] sm:$0xff]  }
 0x7e4   : > { %4523 = vmatprep.mubr.msk.bf16.mxu1 %vm1099_vm0, %v2133_v56  ;;  %v4893_v56 = vld [vmem:[%s6623_s12 + $0x30] sm:$0xff]  }
 0x7e5   : > { %4524 = vmatmul.mubr.msk.bf16.vlgmr.msra.gmra.mrb[24].mxu1 %vm1099_vm0, %v2134_v53  ;;  %v4894_v53 = vld [vmem:[%s6623_s12 + $0x38] sm:$0xff]  }
 0x7e6   : > { %4536 = vmatpush3.bf16.msra.mxu1 %v4887_v51 }
 0x7e7   : > { %4537 = vmatprep.subr.bf16.mxu1 %v4888_v52 }
 0x7ea   : > { %4538 = vmatpush3.bf16.msra.mxu1 %v4888_v52 }
 0x7eb   : > { %4539 = vmatprep.subr.bf16.mxu1 %v4889_v54 }
 0x7ee   : > { %4540 = vmatpush3.bf16.msra.mxu1 %v4889_v54 }
 0x7ef   : > { %4541 = vmatprep.subr.bf16.mxu1 %v4890_v55 }
 0x7f2   : > { %4542 = vmatpush3.bf16.msra.mxu1 %v4890_v55 }
 0x7f3   : > { %4543 = vmatprep.subr.bf16.mxu1 %v4891_v41 }
 0x7f6   : > { %4544 = vmatpush3.bf16.msra.mxu1 %v4891_v41 }
 0x7f7   : > { %4545 = vmatprep.subr.bf16.mxu1 %v4892_v58 }
 0x7fa   : > { %4546 = vmatpush3.bf16.msra.mxu1 %v4892_v58 }
 0x7fb   : > { %4547 = vmatprep.subr.bf16.mxu1 %v4893_v56 }
 0x7fe   : > { %4548 = vmatpush3.bf16.msra.mxu1 %v4893_v56 }
 0x7ff   : > { %4549 = vmatprep.subr.bf16.mxu1 %v4894_v53 }
 0x802   : > { %4550 = vmatpush3.bf16.msra.mxu1 %v4894_v53 }
 0x8b8   : > { %v4525_v20 = vpop.f32.mrb[24].mxu1 }
 0x8b9   : > { %v2191_v59 = vpop.f32.mrb[25].mxu1  ;;  %v2207_v60 = vadd.f32 %v4525_v20, %v5952_v43  ;;  %v4189_v20 = vld [vmem:[#allocation15] ss:$0 sm:$0xff] }
 0x8ba   : > { %v2205_v61 = vadd.f32 %v2191_v59, %v5944_v36  ;;  %v4526_v21 = vpop.f32.mrb[26].mxu1 }
 0x8bb   : > { %v2194_v62 = vpop.f32.mrb[27].mxu1  ;;  %v6181_v1 = vadd.f32 %v4186_v57, %v2207_v60 }
 0x8bc   : > { %v6178_v45 = vadd.f32 %v4186_v57, %v2205_v61  ;;  %v2206_v63 = vadd.f32 %v2194_v62, %v5950_v42 }
 0x8bd   : > { %v2226_v36 = vsel %vm1183_vm2, %v6181_v1, 0.0 }
 0x8be   : > { %v6183_v3 = vadd.f32 %v4186_v57, %v2206_v63  ;;  %v2220_v4 = vsel %vm1099_vm0, %v6178_v45, 0.0 }
 0x8bf   : > { %2221 = vadd.xlane.f32.xlu0 %v2220_v4 }
 0x8c0   : > { %v2223_v0 = vsel %vm1099_vm0, %v6183_v3, 0.0 }
 0x8c1   : > { %2224 = vadd.xlane.f32.xlu1 %v2223_v0 }
 0x8c3   : > { %2227 = vadd.xlane.f32.xlu0 %v2226_v36 }
 0x94c   : > { %v2222_v43 = vpop.xlane.xlu0 %2221 }
 0x94d   : > { %v2229_v5 = vmul.f32 0.03125, %v2222_v43 }
 0x94e   : > { %v2225_v2 = vpop.xlane.xlu1 %2224 }
 0x94f   : > { %v2232_v42 = vsub.f32 %v6178_v45, %v2229_v5  ;;  %v2230_v6 = vmul.f32 0.03125, %v2225_v2 }
 0x950   : > { %v2228_v7 = vpop.xlane.xlu0 %2227 }
 0x951   : > { %v2233_v8 = vsub.f32 %v6183_v3, %v2230_v6  ;;  %v2231_v9 = vmul.f32 0.03125, %v2228_v7  ;;  %v2235_v10 = vmul.f32 %v2232_v42, %v2232_v42 }
 0x953   : > { %v2234_v11 = vsub.f32 %v6181_v1, %v2231_v9  ;;  %v2238_v12 = vsel %vm1099_vm0, %v2235_v10, 0.0  ;;  %v2236_v13 = vmul.f32 %v2233_v8, %v2233_v8 }
 0x954   : > { %2239 = vadd.xlane.f32.xlu1 %v2238_v12 }
 0x955   : > { %v2241_v14 = vsel %vm1099_vm0, %v2236_v13, 0.0  ;;  %v2237_v15 = vmul.f32 %v2234_v11, %v2234_v11 }
 0x956   : > { %2242 = vadd.xlane.f32.xlu0 %v2241_v14 }
 0x957   : > { %v2244_v16 = vsel %vm1183_vm2, %v2237_v15, 0.0 }
 0x958   : > { %2245 = vadd.xlane.f32.xlu1 %v2244_v16 }
 0x9e1   : > { %v2240_v19 = vpop.xlane.xlu1 %2239 }
 0x9e2   : > { %v2247_v22 = vmul.f32 0.03125, %v2240_v19 }
 0x9e3   : > { %v2243_v23 = vpop.xlane.xlu0 %2242 }
 0x9e4   : > { %v2250_v26 = vadd.f32 1e-05, %v2247_v22  ;;  %v2248_v27 = vmul.f32 0.03125, %v2243_v23 }
 0x9e5   : > { %v2246_v29 = vpop.xlane.xlu1 %2245 }
 0x9e6   : > { %4973 = vrsqrt.f32 %v2250_v26  ;;  %v2251_v28 = vadd.f32 1e-05, %v2248_v27  ;;  %v2249_v30 = vmul.f32 0.03125, %v2246_v29 }
 0x9e8   : > { %4975 = vrsqrt.f32 %v2251_v28  ;;  %v2252_v31 = vadd.f32 1e-05, %v2249_v30 }
 0x9ea   : > { %4977 = vrsqrt.f32 %v2252_v31 }
 0x9f0   : > { %v4974_v32 = vpop.eup %4973 }
 0x9f1   : > { %v2256_v34 = vmul.f32 %v4974_v32, %v2232_v42 }
 0x9f2   : > { %v4976_v37 = vpop.eup %4975 }
 0x9f3   : > { %v2257_v39 = vmul.f32 %v4976_v37, %v2233_v8  ;;  %v2265_v35 = vmul.f32 %v4187_v40, %v2256_v34 }
 0x9f4   : > { %v4978_v44 = vpop.eup %4977 }
 0x9f5   : > { %v2258_v47 = vmul.f32 %v4978_v44, %v2234_v11  ;;  %v2266_v48 = vmul.f32 %v4187_v40, %v2257_v39  ;;  %v2274_v24 = vadd.f32 %v4188_v46, %v2265_v35 }
 0x9f7   : > { %v2275_v49 = vadd.f32 %v4188_v46, %v2266_v48  ;;  %v2267_v25 = vmul.f32 %v4187_v40, %v2258_v47  ;;  %v4202_v40 = vld [vmem:[#allocation17] ss:$0 sm:$0xff] }
 0x9f9   : > { %v2277_v33 = vpack.c.bf16 %v2275_v49, %v2274_v24  ;;  %v2276_v38 = vadd.f32 %v4188_v46, %v2267_v25 }
 0x9fb   : > { %4531 = vmatprep.mubr.msk.bf16.mxu0 %vm1099_vm0, %v2277_v33  ;;  %v2278_v50 = vpack.c.bf16 %v2276_v38, %v2276_v38 }
 0x9fd   : > { %4532 = vmatmul.mubr.msk.bf16.vlgmr.msra.gmra.mrb[20].mxu0 %vm1099_vm0, %v2278_v50 }
 0xad0   : > { %v4533_v57 = vpop.f32.mrb[20].mxu0 }
 0xad1   : > { %v2351_v59 = vadd.f32 %v4533_v57, %v4189_v20  ;;  %v2342_v60 = vpop.f32.mrb[21].mxu0 }
 0xad2   : > { %v2343_v61 = vadd.f32 %v4189_v20, %v2342_v60  ;;  %v4534_v21 = vpop.f32.mrb[22].mxu0  ;;  %v4896_v60 = vld [vmem:[%s6612_s10 + $0x18] sm:$0xff]  }
 0xad3   : > { %v2361_v62 = vmul.f32 0.044715, %v2351_v59  ;;  %v2345_v63 = vpop.f32.mrb[23].mxu0  ;;  %v2358_v19 = vmul.f32 0.5, %v2351_v59 }
 0xad4   : > { %v2359_v4 = vmul.f32 0.044715, %v2343_v61  ;;  %v2346_v0 = vadd.f32 %v4189_v20, %v2345_v63  ;;  %v2356_v22 = vmul.f32 0.5, %v2343_v61 }
 0xad5   : > { %v2364_v36 = vmul.f32 %v2361_v62, %v2351_v59 }
 0xad6   : > { %v2362_v43 = vmul.f32 %v2359_v4, %v2343_v61  ;;  %v2360_v5 = vmul.f32 0.044715, %v2346_v0  ;;  %v2357_v23 = vmul.f32 0.5, %v2346_v0 }
 0xad7   : > { %v2367_v2 = vmul.f32 %v2364_v36, %v2351_v59 }
 0xad8   : > { %v2365_v42 = vmul.f32 %v2362_v43, %v2343_v61  ;;  %v2363_v6 = vmul.f32 %v2360_v5, %v2346_v0 }
 0xad9   : > { %v2370_v7 = vadd.f32 %v2367_v2, %v2351_v59  ;;  %v4895_v59 = vld [vmem:[%s6612_s10 + $0x10] sm:$0xff]  }
 0xada   : > { %v2366_v8 = vmul.f32 %v2363_v6, %v2346_v0  ;;  %v2368_v9 = vadd.f32 %v2365_v42, %v2343_v61  ;;  %4555 = vmatprep.subr.bf16.mxu0 %v4895_v59  ;;  %v4897_v61 = vld [vmem:[%s6614_s11 + $0x10] sm:$0xff]   ;;  %v4205_v6 = vld [vmem:[%s6615_s24 + $0x1] ss:$0 sm:$0xff] }
 0xadb   : > { %v2373_v10 = vmul.f32 0.7978846, %v2370_v7  ;;  %4556 = vmatpush3.bf16.msra.mxu0 %v4895_v59 }
 0xadc   : > { %v2369_v11 = vadd.f32 %v2366_v8, %v2346_v0  ;;  %v2371_v12 = vmul.f32 0.7978846, %v2368_v9  ;;  %4557 = vmatprep.subr.bf16.mxu0 %v4896_v60 }
 0xadd   : > { %4979 = vtanh.f32 %v2373_v10 }
 0xade   : > { %v2372_v13 = vmul.f32 0.7978846, %v2369_v11  ;;  %4981 = vtanh.f32 %v2371_v12  ;;  %v4206_v12 = vld [vmem:[%s6616_s4 + $0x1] ss:$0 sm:$0xff]  ;;  %s4301_s4 = sshll.u32 %s5659_s26, 4  ;;  %s5477_s26 = smov [#allocation20]  }
 0xadf   : > { %4558 = vmatpush3.bf16.msra.mxu0 %v4896_v60  ;;  %s5345_s8 = sshll.u32 %s5477_s26, 4  ;;  %s5346_s8 = int_to_ptr.vmem [resolvable:$false] %s5345_s8 }
 0xae0   : > { %4983 = vtanh.f32 %v2372_v13  ;;  %4563 = vmatprep.subr.bf16.mxu0 %v4897_v61  ;;  %s5347_s9 = scalar_lea.vmem %s5346_s8, 32 }
 0xae7   : > { %v4980_v14 = vpop.eup %4979 }
 0xae8   : > { %v4982_v15 = vpop.eup %4981  ;;  %v2379_v16 = vadd.f32 1.0, %v4980_v14 }
 0xae9   : > { %v2377_v17 = vadd.f32 1.0, %v4982_v15 }
 0xaea   : > { %v4984_v18 = vpop.eup %4983  ;;  %v2382_v27 = vmul.f32 %v2379_v16, %v2358_v19 }
 0xaeb   : > { %v2378_v26 = vadd.f32 1.0, %v4984_v18  ;;  %v2380_v29 = vmul.f32 %v2377_v17, %v2356_v22 }
 0xaec   : > { %v2384_v31 = vpack.c.bf16 %v2382_v27, %v2382_v27  ;;  %v4900_v27 = vld [vmem:[%s6613_s25 + $0x18] sm:$0xff]  }
 0xaed   : > { %v2381_v28 = vmul.f32 %v2378_v26, %v2357_v23  ;;  %v4898_v23 = vld [vmem:[%s6614_s11 + $0x18] sm:$0xff]   ;;  %v4899_v26 = vld [vmem:[%s6613_s25 + $0x10] sm:$0xff]  }
 0xaef   : > { %v2383_v30 = vpack.c.bf16 %v2381_v28, %v2380_v29  ;;  %v4211_v28 = vld [vmem:[#allocation11 + $0x1] ss:$0 sm:$0xff] }
 0xaf1   : > { %4551 = vmatprep.mubr.bf16.mxu1 %v2383_v30 }
 0xaf2   : > { %4552 = vmatmul.mubr.bf16.vlgmr.msra.gmra.mrb[28].mxu1 %v2384_v31 }
 0xbc5   : > { %v4553_v32 = vpop.f32.mrb[28].mxu1 }
 0xbc6   : > { %v2483_v34 = vpop.f32.mrb[29].mxu1  ;;  %v2499_v37 = vadd.f32 %v4553_v32, %v6181_v1 }
 0xbc7   : > { %v2497_v39 = vadd.f32 %v2483_v34, %v6178_v45  ;;  %v4554_v35 = vpop.f32.mrb[30].mxu1 }
 0xbc8   : > { %v2486_v44 = vpop.f32.mrb[31].mxu1  ;;  %v6216_v48 = vadd.f32 %v4202_v40, %v2499_v37  ;;  %v6247_v37 = vld [vmem:[%s6617_s13] ss:$0 sm:$0xff]  ;;  %v6251_v35 = vld [vmem:[%s6617_s13 + $0x1] ss:$0 sm:$0xff] }
 0xbc9   : > { %v6213_v46 = vadd.f32 %v4202_v40, %v2497_v39  ;;  %v2498_v47 = vadd.f32 %v2486_v44, %v6183_v3 }
 0xbca   : > { %v2520_v45 = vsel %vm1183_vm2, %v6216_v48, 0.0 }
 0xbcb   : > { %v6218_v24 = vadd.f32 %v4202_v40, %v2498_v47  ;;  %v2514_v49 = vsel %vm1099_vm0, %v6213_v46, 0.0  ;;  %v6255_v47 = vld [vmem:[%s6617_s13 + $0x2] ss:$0 sm:$0xff] }
 0xbcc   : > { %2515 = vadd.xlane.f32.xlu0 %v2514_v49 }
 0xbcd   : > { %v2517_v25 = vsel %vm1099_vm0, %v6218_v24, 0.0 }
 0xbce   : > { %2518 = vadd.xlane.f32.xlu1 %v2517_v25 }
 0xbd0   : > { %2521 = vadd.xlane.f32.xlu0 %v2520_v45 }
 0xc59   : > { %v2516_v1 = vpop.xlane.xlu0 %2515 }
 0xc5a   : > { %v2523_v33 = vmul.f32 0.03125, %v2516_v1 }
 0xc5b   : > { %v2519_v38 = vpop.xlane.xlu1 %2518 }
 0xc5c   : > { %v2526_v3 = vsub.f32 %v6213_v46, %v2523_v33  ;;  %v2524_v50 = vmul.f32 0.03125, %v2519_v38  ;;  %v6262_v33 = vld [vmem:[%s6617_s13 + $0x3] ss:$0 sm:$0xff] }
 0xc5d   : > { %v2522_v51 = vpop.xlane.xlu0 %2521 }
 0xc5e   : > { %v2527_v52 = vsub.f32 %v6218_v24, %v2524_v50  ;;  %v2525_v54 = vmul.f32 0.03125, %v2522_v51  ;;  %v2529_v55 = vmul.f32 %v2526_v3, %v2526_v3  ;;  %v4220_v51 = vld [vmem:[#allocation12 + $0x1] ss:$0 sm:$0xff] }
 0xc60   : > { %v2528_v41 = vsub.f32 %v6216_v48, %v2525_v54  ;;  %v2532_v58 = vsel %vm1099_vm0, %v2529_v55, 0.0  ;;  %v2530_v56 = vmul.f32 %v2527_v52, %v2527_v52 }
 0xc61   : > { %2533 = vadd.xlane.f32.xlu1 %v2532_v58 }
 0xc62   : > { %v2535_v53 = vsel %vm1099_vm0, %v2530_v56, 0.0  ;;  %v2531_v20 = vmul.f32 %v2528_v41, %v2528_v41 }
 0xc63   : > { %2536 = vadd.xlane.f32.xlu0 %v2535_v53 }
 0xc64   : > { %v2538_v57 = vsel %vm1183_vm2, %v2531_v20, 0.0 }
 0xc65   : > { %2539 = vadd.xlane.f32.xlu1 %v2538_v57 }
 0xcee   : > { %v2534_v21 = vpop.xlane.xlu1 %2533 }
 0xcef   : > { %v2541_v62 = vmul.f32 0.03125, %v2534_v21 }
 0xcf0   : > { %v2537_v63 = vpop.xlane.xlu0 %2536 }
 0xcf1   : > { %v2544_v4 = vadd.f32 1e-05, %v2541_v62  ;;  %v2542_v0 = vmul.f32 0.03125, %v2537_v63  ;;  %v4230_v63 = vld [vmem:[%s6618_s1 + $0x1] ss:$0 sm:$0xff]  ;;  %s6625_s1 = sld [smem:[#allocation53_spill]] }
 0xcf2   : > { %v2540_v36 = vpop.xlane.xlu1 %2539 }
 0xcf3   : > { %4985 = vrsqrt.f32 %v2544_v4  ;;  %v2545_v43 = vadd.f32 1e-05, %v2542_v0  ;;  %v2543_v5 = vmul.f32 0.03125, %v2540_v36 }
 0xcf5   : > { %4987 = vrsqrt.f32 %v2545_v43  ;;  %v2546_v2 = vadd.f32 1e-05, %v2543_v5 }
 0xcf7   : > { %4989 = vrsqrt.f32 %v2546_v2 }
 0xcfd   : > { %v4986_v42 = vpop.eup %4985 }
 0xcfe   : > { %v2550_v7 = vmul.f32 %v4986_v42, %v2526_v3 }
 0xcff   : > { %v4988_v8 = vpop.eup %4987 }
 0xd00   : > { %v2551_v9 = vmul.f32 %v4988_v8, %v2527_v52  ;;  %v2559_v10 = vmul.f32 %v4205_v6, %v2550_v7 }
 0xd01   : > { %v4990_v11 = vpop.eup %4989 }
 0xd02   : > { %v2552_v13 = vmul.f32 %v4990_v11, %v2528_v41  ;;  %v2560_v14 = vmul.f32 %v4205_v6, %v2551_v9  ;;  %v2568_v15 = vadd.f32 %v4206_v12, %v2559_v10 }
 0xd04   : > { %v2569_v16 = vadd.f32 %v4206_v12, %v2560_v14  ;;  %v2561_v17 = vmul.f32 %v4205_v6, %v2552_v13 }
 0xd06   : > { %v2571_v18 = vpack.c.bf16 %v2569_v16, %v2568_v15  ;;  %v2570_v19 = vadd.f32 %v4206_v12, %v2561_v17 }
 0xd08   : > { %4559 = vmatprep.mubr.msk.bf16.mxu0 %vm1099_vm0, %v2571_v18  ;;  %v2572_v22 = vpack.c.bf16 %v2570_v19, %v2570_v19 }
 0xd0a   : > { %4560 = vmatmul.mubr.msk.bf16.vlgmr.msra.gmra.mrb[24].mxu0 %vm1099_vm0, %v2572_v22 }
 0xd0b   : > { %4564 = vmatpush3.bf16.msra.mxu0 %v4897_v61  ;;  %4567 = vmatprep.mubr.msk.bf16.mxu0 %vm1099_vm0, %v2571_v18 }
 0xd0c   : > { %4565 = vmatprep.subr.bf16.mxu0 %v4898_v23 }
 0xd0f   : > { %4566 = vmatpush3.bf16.msra.mxu0 %v4898_v23 }
 0xd10   : > { %4571 = vmatprep.subr.bf16.mxu0 %v4899_v26 }
 0xd12   : > { %4568 = vmatmul.mubr.msk.bf16.vlgmr.msra.gmra.mrb[28].mxu0 %vm1099_vm0, %v2572_v22 }
 0xd13   : > { %4572 = vmatpush3.bf16.msra.mxu0 %v4899_v26  ;;  %4575 = vmatprep.mubr.msk.bf16.mxu0 %vm1099_vm0, %v2571_v18 }
 0xd14   : > { %4573 = vmatprep.subr.bf16.mxu0 %v4900_v27 }
 0xd17   : > { %4574 = vmatpush3.bf16.msra.mxu0 %v4900_v27 }
 0xd1a   : > { %4576 = vmatmul.mubr.msk.bf16.vlgmr.msra.gmra.mrb[32].mxu0 %vm1099_vm0, %v2572_v22 }
 0xddd   : > { %v4561_v29 = vpop.f32.mrb[24].mxu0 }
 0xdde   : > { %v2638_v30 = vpop.f32.mrb[25].mxu0  ;;  %v2647_v2 = vadd.f32 %v4561_v29, %v4211_v28 }
 0xddf   : > { %v4562_v31 = vpop.f32.mrb[26].mxu0  ;;  %v2639_v32 = vadd.f32 %v4211_v28, %v2638_v30 }
 0xde0   : > { %v2641_v40 = vpop.f32.mrb[27].mxu0  ;;  %v2800_v7 = vmul.f32 %v6247_v37, %v2647_v2  ;;  %v2803_v8 = vmul.f32 %v6251_v35, %v2647_v2  ;;  %v2806_v11 = vmul.f32 %v6255_v47, %v2647_v2  ;;  %v2809_v12 = vmul.f32 %v6262_v33, %v2647_v2 }
 0xde1   : > { %v2642_v34 = vadd.f32 %v4211_v28, %v2641_v40  ;;  %v2798_v39 = vmul.f32 %v6247_v37, %v2639_v32  ;;  %v2801_v44 = vmul.f32 %v6251_v35, %v2639_v32  ;;  %v2804_v49 = vmul.f32 %v6255_v47, %v2639_v32 }
 0xde2   : > { %v2807_v50 = vmul.f32 %v6262_v33, %v2639_v32  ;;  %v2811_v9 = vpack.c.bf16 %v2800_v7, %v2800_v7  ;;  %v2813_v10 = vpack.c.bf16 %v2803_v8, %v2803_v8  ;;  %v2815_v14 = vpack.c.bf16 %v2806_v11, %v2806_v11 }
 0xde3   : > { %v2799_v25 = vmul.f32 %v6247_v37, %v2642_v34  ;;  %v2802_v45 = vmul.f32 %v6251_v35, %v2642_v34  ;;  %v2805_v1 = vmul.f32 %v6255_v47, %v2642_v34  ;;  %v2808_v38 = vmul.f32 %v6262_v33, %v2642_v34 }
 0xde4   : > { %v2817_v15 = vpack.c.bf16 %v2809_v12, %v2809_v12 }
 0xde5   : > { %v4569_v3 = vpop.f32.mrb[28].mxu0  ;;  %v2810_v55 = vpack.c.bf16 %v2799_v25, %v2798_v39  ;;  %v2812_v41 = vpack.c.bf16 %v2802_v45, %v2801_v44  ;;  %v2814_v58 = vpack.c.bf16 %v2805_v1, %v2804_v49  ;;  %v2816_v53 = vpack.c.bf16 %v2808_v38, %v2807_v50 }
 0xde6   : > { %v2711_v52 = vpop.f32.mrb[29].mxu0  ;;  %v2720_v20 = vadd.f32 %v4569_v3, %v4220_v51 }
 0xde7   : > { %v4570_v54 = vpop.f32.mrb[30].mxu0  ;;  %v2712_v57 = vadd.f32 %v4220_v51, %v2711_v52  ;;  %4583 = vmatprep.mubr.msk.bf16.mxu0 %vm1099_vm0, %v2810_v55  ;;  %4591 = vmatprep.mubr.msk.bf16.mxu1 %vm1099_vm0, %v2812_v41 }
 0xde8   : > { %v2714_v56 = vpop.f32.mrb[31].mxu0  ;;  %v2819_v61 = vpack.c.bf16 %v2720_v20, %v2720_v20 }
 0xde9   : > { %v2715_v59 = vadd.f32 %v4220_v51, %v2714_v56 }
 0xdea   : > { %v2832_v6 = vsel %vm1099_vm0, %v2819_v61, 0 }
 0xdeb   : > { %v2818_v60 = vpack.c.bf16 %v2715_v59, %v2712_v57 }
 0xded   : > { %v4577_v21 = vpop.f32.mrb[32].mxu0  ;;  %4699 = vmatprep.subr.msk.bf16.mxu0 %vm1099_vm0, %v2818_v60  ;;  %4701 = vmatprep.subr.msk.bf16.mxu1 %vm1099_vm0, %v2818_v60  ;;  %v2829_v62 = vsel %vm1099_vm0, %v2818_v60, 0 }
 0xdee   : > { %v2784_v4 = vpop.f32.mrb[33].mxu0  ;;  %4580 = vmatpush3.bf16.xpose.msra.mxu0 %v2829_v62  ;;  %4588 = vmatpush3.bf16.xpose.msra.mxu1 %v2829_v62  ;;  %v2793_v13 = vadd.f32 %v4577_v21, %v4230_v63 }
 0xdef   : > { %v4578_v0 = vpop.f32.mrb[34].mxu0  ;;  %4700 = vmatprep.subr.msk.bf16.mxu0 %vm1099_vm0, %v2819_v61  ;;  %4702 = vmatprep.subr.msk.bf16.mxu1 %vm1099_vm0, %v2819_v61  ;;  %v2785_v43 = vadd.f32 %v4230_v63, %v2784_v4 }
 0xdf0   : > { %v2787_v36 = vpop.f32.mrb[35].mxu0  ;;  %v6291_v16 = vpack.c.bf16 %v2793_v13, %v2793_v13 }
 0xdf1   : > { %v2788_v5 = vadd.f32 %v4230_v63, %v2787_v36 }
 0xdf2   : > { %v6303_v17 = vsel %vm1886_vm3, %v6291_v16, 0 }
 0xdf3   : > { %v6274_v42 = vpack.c.bf16 %v2788_v5, %v2785_v43 }
 0xdf6   : > { %4582 = vmatpush3.bf16.xpose.msra.mxu0 %v2832_v6  ;;  %4590 = vmatpush3.bf16.xpose.msra.mxu1 %v2832_v6 }
 0xdf7   : > { %4703 = vmatprep.subr.msk.bf16.mxu0 %vm1099_vm0, %v2818_v60  ;;  %4705 = vmatprep.subr.msk.bf16.mxu1 %vm1099_vm0, %v2818_v60 }
 0xdfd   : > { %4584 = vmatmul.mubr.msk.bf16.vlgmr.msra.gmra.mrb[36].mxu0 %vm1099_vm0, %v2811_v9  ;;  %4592 = vmatmul.mubr.msk.bf16.vlgmr.msra.gmra.mrb[32].mxu1 %vm1099_vm0, %v2813_v10 }
 0xdfe   : > { %4596 = vmatpush3.bf16.xpose.msra.mxu0 %v2829_v62  ;;  %4599 = vmatprep.mubr.msk.bf16.mxu0 %vm1099_vm0, %v2814_v58 }
 0xdff   : > { %4604 = vmatpush3.bf16.xpose.msra.mxu1 %v2829_v62  ;;  %4607 = vmatprep.mubr.msk.bf16.mxu1 %vm1099_vm0, %v2816_v53 }
 0xe00   : > { %4704 = vmatprep.subr.msk.bf16.mxu0 %vm1099_vm0, %v2819_v61  ;;  %4706 = vmatprep.subr.msk.bf16.mxu1 %vm1099_vm0, %v2819_v61 }
 0xe06   : > { %4598 = vmatpush3.bf16.xpose.msra.mxu0 %v2832_v6 }
 0xe07   : > { %4606 = vmatpush3.bf16.xpose.msra.mxu1 %v2832_v6  ;;  %4611 = vmatprep.subr.bf16.mxu0 %v6274_v42 }
 0xe08   : > { %4619 = vmatprep.subr.bf16.mxu1 %v6274_v42 }
 0xe0d   : > { %4600 = vmatmul.mubr.msk.bf16.vlgmr.msra.gmra.mrb[40].mxu0 %vm1099_vm0, %v2815_v14 }
 0xe0e   : > { %4608 = vmatmul.mubr.msk.bf16.vlgmr.msra.gmra.mrb[36].mxu1 %vm1099_vm0, %v2817_v15  ;;  %4612 = vmatpush3.bf16.msra.mxu0 %v6274_v42 }
 0xe0f   : > { %4620 = vmatpush3.bf16.msra.mxu1 %v6274_v42  ;;  %4707 = vmatprep.subr.msk.bf16.mxu0 %vm1886_vm3, %v6291_v16 }
 0xe10   : > { %4708 = vmatprep.subr.msk.bf16.mxu1 %vm1886_vm3, %v6291_v16 }
 0xe12   : > { %4614 = vmatpush3.bf16.msra.mxu0 %v6303_v17 }
 0xe13   : > { %4622 = vmatpush3.bf16.msra.mxu1 %v6303_v17  ;;  %4627 = vmatprep.subr.bf16.mxu0 %v6274_v42 }
 0xe14   : > { %4635 = vmatprep.subr.bf16.mxu1 %v6274_v42 }
 0xed0   : > { %v4585_v18 = vpop.f32.mrb[36].mxu0  ;;  %v4593_v19 = vpop.f32.mrb[32].mxu1 }
 0xed1   : > { %v3046_v22 = vmul.f32 0.35355338, %v4585_v18  ;;  %v3049_v23 = vmul.f32 0.35355338, %v4593_v19  ;;  %v2868_v26 = vpop.f32.mrb[37].mxu0  ;;  %v2922_v27 = vpop.f32.mrb[33].mxu1 }
 0xed2   : > { %v3044_v29 = vmul.f32 0.35355338, %v2868_v26  ;;  %v4586_v28 = vpop.f32.mrb[38].mxu0  ;;  %v4594_v30 = vpop.f32.mrb[34].mxu1  ;;  %v3047_v31 = vmul.f32 0.35355338, %v2922_v27 }
 0xed3   : > { %v2871_v32 = vpop.f32.mrb[39].mxu0  ;;  %v2925_v40 = vpop.f32.mrb[35].mxu1  ;;  %v3071_v34 = vsel %vm1745_vm4, %v3049_v23, -inf  ;;  %v3062_v39 = vsel %vm1745_vm4, %v3046_v22, -inf }
 0xed4   : > { %3072 = vmax.xlane.f32.xlu1 %v3071_v34  ;;  %3063 = vmax.xlane.f32.xlu0 %v3062_v39  ;;  %v3045_v44 = vmul.f32 0.35355338, %v2871_v32  ;;  %v3048_v49 = vmul.f32 0.35355338, %v2925_v40  ;;  %v3065_v25 = vsel %vm1738_vm5, %v3047_v31, -inf  ;;  %v3056_v45 = vsel %vm1738_vm5, %v3044_v29, -inf }
 0xed6   : > { %v3068_v1 = vsel %vm1738_vm5, %v3048_v49, -inf  ;;  %v3059_v38 = vsel %vm1738_vm5, %v3045_v44, -inf }
 0xed8   : > { %3066 = vmax.xlane.f32.xlu1 %v3065_v25  ;;  %3057 = vmax.xlane.f32.xlu0 %v3056_v45 }
 0xedc   : > { %3069 = vmax.xlane.f32.xlu0 %v3068_v1  ;;  %3060 = vmax.xlane.f32.xlu1 %v3059_v38 }
 0xee0   : > { %v4601_v3 = vpop.f32.mrb[40].mxu0 }
 0xee1   : > { %v3052_v50 = vmul.f32 0.35355338, %v4601_v3  ;;  %v4609_v51 = vpop.f32.mrb[36].mxu1  ;;  %v2976_v52 = vpop.f32.mrb[41].mxu0 }
 0xee2   : > { %v6315_v54 = vmul.f32 0.35355338, %v2976_v52  ;;  %v3030_v55 = vpop.f32.mrb[37].mxu1  ;;  %v4602_v41 = vpop.f32.mrb[42].mxu0  ;;  %v6325_v62 = vmul.f32 0.35355338, %v4609_v51 }
 0xee3   : > { %v3053_v58 = vmul.f32 0.35355338, %v3030_v55  ;;  %v4610_v56 = vpop.f32.mrb[38].mxu1  ;;  %v2979_v53 = vpop.f32.mrb[43].mxu0  ;;  %v3080_v20 = vsel %vm1745_vm4, %v3052_v50, -inf }
 0xee4   : > { %v3033_v57 = vpop.f32.mrb[39].mxu1  ;;  %3081 = vmax.xlane.f32.xlu0 %v3080_v20  ;;  %v6318_v59 = vmul.f32 0.35355338, %v2979_v53  ;;  %v3074_v21 = vsel %vm1738_vm5, %v6315_v54, -inf  ;;  %v3089_v0 = vsel %vm1745_vm4, %v6325_v62, -inf }
 0xee5   : > { %v3083_v60 = vsel %vm1738_vm5, %v3053_v58, -inf  ;;  %v6321_v61 = vmul.f32 0.35355338, %v3033_v57 }
 0xee6   : > { %3084 = vmax.xlane.f32.xlu1 %v3083_v60  ;;  %v3077_v63 = vsel %vm1738_vm5, %v6318_v59, -inf }
 0xee7   : > { %v3086_v4 = vsel %vm1738_vm5, %v6321_v61, -inf }
 0xee8   : > { %3075 = vmax.xlane.f32.xlu0 %v3074_v21 }
 0xeea   : > { %3078 = vmax.xlane.f32.xlu1 %v3077_v63 }
 0xeec   : > { %3087 = vmax.xlane.f32.xlu0 %v3086_v4 }
 0xeee   : > { %3090 = vmax.xlane.f32.xlu1 %v3089_v0 }
 0xf61   : > { %v3073_v36 = vpop.xlane.xlu1 %3072  ;;  %v3064_v43 = vpop.xlane.xlu0 %3063 }
 0xf62   : > { %v3097_v5 = vsub.f32 %v3049_v23, %v3073_v36  ;;  %v3094_v2 = vsub.f32 %v3046_v22, %v3064_v43 }
 0xf64   : > { %v3114_v6 = vmul.f32 1.442695, %v3097_v5  ;;  %v3108_v7 = vmul.f32 1.442695, %v3094_v2 }
 0xf65   : > { %v3067_v8 = vpop.xlane.xlu1 %3066  ;;  %v3058_v9 = vpop.xlane.xlu0 %3057 }
 0xf66   : > { %4991 = vpow2.f32 %v3114_v6  ;;  %v3095_v10 = vsub.f32 %v3047_v31, %v3067_v8  ;;  %v3092_v11 = vsub.f32 %v3044_v29, %v3058_v9 }
 0xf67   : > { %4993 = vpow2.f32 %v3108_v7 }
 0xf68   : > { %v3110_v12 = vmul.f32 1.442695, %v3095_v10  ;;  %v3104_v13 = vmul.f32 1.442695, %v3092_v11 }
 0xf69   : > { %v3070_v14 = vpop.xlane.xlu0 %3069  ;;  %v3061_v15 = vpop.xlane.xlu1 %3060 }
 0xf6a   : > { %4995 = vpow2.f32 %v3110_v12  ;;  %v3096_v18 = vsub.f32 %v3048_v49, %v3070_v14  ;;  %v3093_v19 = vsub.f32 %v3045_v44, %v3061_v15 }
 0xf6b   : > { %4997 = vpow2.f32 %v3104_v13 }
 0xf6c   : > { %v3112_v26 = vmul.f32 1.442695, %v3096_v18  ;;  %v3106_v27 = vmul.f32 1.442695, %v3093_v19 }
 0xf6e   : > { %4999 = vpow2.f32 %v3112_v26 }
 0xf6f   : > { %5001 = vpow2.f32 %v3106_v27 }
 0xf70   : > { %v6333_v22 = vpop.eup %4991 }
 0xf71   : > { %v6335_v23 = vpop.eup %4993  ;;  %v3082_v28 = vpop.xlane.xlu0 %3081  ;;  %v3143_v29 = vsel %vm1745_vm4, %v6333_v22, 0.0 }
 0xf72   : > { %v3100_v30 = vsub.f32 %v3052_v50, %v3082_v28  ;;  %v3134_v31 = vsel %vm1745_vm4, %v6335_v23, 0.0  ;;  %3144 = vadd.xlane.f32.xlu1 %v3143_v29 }
 0xf73   : > { %v3085_v32 = vpop.xlane.xlu1 %3084  ;;  %3135 = vadd.xlane.f32.xlu0 %v3134_v31 }
 0xf74   : > { %v6341_v40 = vpop.eup %4995  ;;  %v3120_v34 = vmul.f32 1.442695, %v3100_v30  ;;  %v3101_v39 = vsub.f32 %v3053_v58, %v3085_v32 }
 0xf75   : > { %v6343_v44 = vpop.eup %4997  ;;  %v3076_v49 = vpop.xlane.xlu0 %3075  ;;  %v3137_v25 = vsel %vm1738_vm5, %v6341_v40, 0.0 }
 0xf76   : > { %5003 = vpow2.f32 %v3120_v34  ;;  %v3122_v45 = vmul.f32 1.442695, %v3101_v39  ;;  %v3098_v1 = vsub.f32 %v6315_v54, %v3076_v49  ;;  %v3128_v38 = vsel %vm1738_vm5, %v6343_v44, 0.0  ;;  %3138 = vadd.xlane.f32.xlu1 %v3137_v25 }
 0xf77   : > { %3129 = vadd.xlane.f32.xlu0 %v3128_v38  ;;  %v3079_v3 = vpop.xlane.xlu1 %3078 }
 0xf78   : > { %v6350_v50 = vpop.eup %4999  ;;  %5005 = vpow2.f32 %v3122_v45  ;;  %v3116_v51 = vmul.f32 1.442695, %v3098_v1  ;;  %v3099_v52 = vsub.f32 %v6318_v59, %v3079_v3 }
 0xf79   : > { %v6353_v55 = vpop.eup %5001  ;;  %v3088_v41 = vpop.xlane.xlu0 %3087  ;;  %v3140_v58 = vsel %vm1738_vm5, %v6350_v50, 0.0 }
 0xf7a   : > { %5007 = vpow2.f32 %v3116_v51  ;;  %v3118_v54 = vmul.f32 1.442695, %v3099_v52  ;;  %v3102_v56 = vsub.f32 %v6321_v61, %v3088_v41  ;;  %v3131_v53 = vsel %vm1738_vm5, %v6353_v55, 0.0 }
 0xf7b   : > { %3141 = vadd.xlane.f32.xlu0 %v3140_v58  ;;  %3132 = vadd.xlane.f32.xlu1 %v3131_v53  ;;  %v3091_v20 = vpop.xlane.xlu1 %3090 }
 0xf7c   : > { %5009 = vpow2.f32 %v3118_v54  ;;  %v3124_v57 = vmul.f32 1.442695, %v3102_v56  ;;  %v3103_v59 = vsub.f32 %v6325_v62, %v3091_v20 }
 0xf7e   : > { %5011 = vpow2.f32 %v3124_v57  ;;  %v3126_v60 = vmul.f32 1.442695, %v3103_v59 }
 0xf80   : > { %v6361_v21 = vpop.eup %5003  ;;  %5013 = vpow2.f32 %v3126_v60  ;;  %v4901_v60 = vld [vmem:[%s6619_s20 + $0x10] sm:$0xff]  }
 0xf81   : > { %v3152_v63 = vsel %vm1745_vm4, %v6361_v21, 0.0 }
 0xf82   : > { %v6365_v4 = vpop.eup %5005  ;;  %3153 = vadd.xlane.f32.xlu0 %v3152_v63 }
 0xf83   : > { %v3155_v61 = vsel %vm1738_vm5, %v6365_v4, 0.0 }
 0xf84   : > { %v6369_v0 = vpop.eup %5007  ;;  %3156 = vadd.xlane.f32.xlu1 %v3155_v61 }
 0xf85   : > { %v3146_v62 = vsel %vm1738_vm5, %v6369_v0, 0.0 }
 0xf86   : > { %v6373_v36 = vpop.eup %5009  ;;  %3147 = vadd.xlane.f32.xlu0 %v3146_v62 }
 0xf87   : > { %v3149_v43 = vsel %vm1738_vm5, %v6373_v36, 0.0 }
 0xf88   : > { %v6377_v5 = vpop.eup %5011  ;;  %3150 = vadd.xlane.f32.xlu1 %v3149_v43 }
 0xf89   : > { %v3158_v2 = vsel %vm1738_vm5, %v6377_v5, 0.0 }
 0xf8a   : > { %v6381_v6 = vpop.eup %5013  ;;  %3159 = vadd.xlane.f32.xlu0 %v3158_v2 }
 0xf8b   : > { %v3161_v7 = vsel %vm1745_vm4, %v6381_v6, 0.0 }
 0xf8c   : > { %3162 = vadd.xlane.f32.xlu1 %v3161_v7 }
 0xfff   : > { %v3145_v8 = vpop.xlane.xlu1 %3144 }
0x1000   : > { %v3136_v9 = vpop.xlane.xlu0 %3135  ;;  %5015 = vrcp.f32 %v3145_v8 }
0x1001   : > { %5017 = vrcp.f32 %v3136_v9 }
0x1003   : > { %v3139_v10 = vpop.xlane.xlu1 %3138 }
0x1004   : > { %v3130_v11 = vpop.xlane.xlu0 %3129  ;;  %5019 = vrcp.f32 %v3139_v10 }
0x1005   : > { %5021 = vrcp.f32 %v3130_v11 }
0x1008   : > { %v3142_v12 = vpop.xlane.xlu0 %3141  ;;  %v3133_v13 = vpop.xlane.xlu1 %3132 }
0x1009   : > { %5023 = vrcp.f32 %v3142_v12 }
0x100a   : > { %5025 = vrcp.f32 %v3133_v13  ;;  %v5016_v14 = vpop.eup %5015 }
0x100b   : > { %v5018_v18 = vpop.eup %5017  ;;  %v3175_v29 = vmul.f32 %v5016_v14, %v6333_v22 }
0x100c   : > { %v3169_v32 = vmul.f32 %v5018_v18, %v6335_v23 }
0x100d   : > { %v3191_v3 = vpack.c.bf16 %v3175_v29, %v3175_v29 }
0x100e   : > { %v5020_v19 = vpop.eup %5019  ;;  %v3189_v23 = vpack.c.bf16 %v3169_v32, %v3169_v32 }
0x100f   : > { %v3154_v15 = vpop.xlane.xlu0 %3153  ;;  %v5022_v27 = vpop.eup %5021  ;;  %v3171_v34 = vmul.f32 %v5020_v19, %v6341_v40 }
0x1010   : > { %5027 = vrcp.f32 %v3154_v15  ;;  %v3165_v25 = vmul.f32 %v5022_v27, %v6343_v44 }
0x1011   : > { %v3157_v26 = vpop.xlane.xlu1 %3156 }
0x1013   : > { %v5024_v28 = vpop.eup %5023  ;;  %v3148_v30 = vpop.xlane.xlu0 %3147 }
0x1014   : > { %v5026_v31 = vpop.eup %5025  ;;  %5029 = vrcp.f32 %v3148_v30  ;;  %v3173_v39 = vmul.f32 %v5024_v28, %v6350_v50 }
0x1015   : > { %5031 = vrcp.f32 %v3157_v26  ;;  %v3151_v49 = vpop.xlane.xlu1 %3150  ;;  %v3167_v45 = vmul.f32 %v5026_v31, %v6353_v55 }
0x1016   : > { %5033 = vrcp.f32 %v3151_v49  ;;  %v3190_v1 = vpack.c.bf16 %v3173_v39, %v3171_v34 }
0x1017   : > { %v3160_v38 = vpop.xlane.xlu0 %3159  ;;  %v3188_v22 = vpack.c.bf16 %v3167_v45, %v3165_v25 }
0x1018   : > { %5035 = vrcp.f32 %v3160_v38  ;;  %4623 = vmatprep.mubr.msk.bf16.mxu1 %vm1738_vm5, %v3190_v1 }
0x1019   : > { %4615 = vmatprep.mubr.msk.bf16.mxu0 %vm1738_vm5, %v3188_v22  ;;  %4624 = vmatmul.mubr.msk.bf16.vlgmr.msra.gmra.mrb[40].mxu1 %vm1738_vm5, %v3191_v3  ;;  %v3163_v40 = vpop.xlane.xlu1 %3162 }
0x101a   : > { %4616 = vmatmul.mubr.msk.bf16.vlgmr.msra.gmra.mrb[44].mxu0 %vm1738_vm5, %v3189_v23  ;;  %4636 = vmatpush3.bf16.msra.mxu1 %v6274_v42  ;;  %5037 = vrcp.f32 %v3163_v40  ;;  %v5028_v44 = vpop.eup %5027 }
0x101b   : > { %4628 = vmatpush3.bf16.msra.mxu0 %v6274_v42  ;;  %4710 = vmatprep.subr.msk.bf16.mxu1 %vm1886_vm3, %v6291_v16  ;;  %v3181_v41 = vmul.f32 %v5028_v44, %v6361_v21  ;;  %v4902_v21 = vld [vmem:[%s6619_s20 + $0x18] sm:$0xff]  }
0x101c   : > { %4709 = vmatprep.subr.msk.bf16.mxu0 %vm1886_vm3, %v6291_v16 }
0x101d   : > { %v3193_v20 = vpack.c.bf16 %v3181_v41, %v3181_v41 }
0x101e   : > { %v5030_v50 = vpop.eup %5029  ;;  %4638 = vmatpush3.bf16.msra.mxu1 %v6303_v17 }
0x101f   : > { %v5032_v51 = vpop.eup %5031  ;;  %4630 = vmatpush3.bf16.msra.mxu0 %v6303_v17  ;;  %v3177_v52 = vmul.f32 %v5030_v50, %v6369_v0 }
0x1020   : > { %v5034_v55 = vpop.eup %5033  ;;  %v3183_v16 = vmul.f32 %v5032_v51, %v6365_v4  ;;  %4643 = vmatprep.subr.bf16.mxu0 %v4901_v60 }
0x1021   : > { %v3179_v42 = vmul.f32 %v5034_v55, %v6373_v36 }
0x1022   : > { %v5036_v58 = vpop.eup %5035 }
0x1023   : > { %v3192_v54 = vpack.c.bf16 %v3179_v42, %v3177_v52  ;;  %v3185_v56 = vmul.f32 %v5036_v58, %v6377_v5 }
0x1024   : > { %v5038_v53 = vpop.eup %5037 }
0x1025   : > { %v3187_v57 = vmul.f32 %v5038_v53, %v6381_v6  ;;  %4631 = vmatprep.mubr.msk.bf16.mxu0 %vm1738_vm5, %v3192_v54  ;;  %v3194_v17 = vpack.c.bf16 %v3185_v56, %v3183_v16  ;;  %v4259_v53 = vld [vmem:[#allocation14 + $0x1] ss:$0 sm:$0xff] }
0x1026   : > { %4632 = vmatmul.mubr.msk.bf16.vlgmr.msra.gmra.mrb[48].mxu0 %vm1738_vm5, %v3193_v20 }
0x1027   : > { %4639 = vmatprep.mubr.msk.bf16.mxu1 %vm1738_vm5, %v3194_v17  ;;  %v3195_v59 = vpack.c.bf16 %v3187_v57, %v3187_v57  ;;  %4644 = vmatpush3.bf16.msra.mxu0 %v4901_v60 }
0x1028   : > { %4645 = vmatprep.subr.bf16.mxu0 %v4902_v21 }
0x1029   : > { %4640 = vmatmul.mubr.msk.bf16.vlgmr.msra.gmra.mrb[44].mxu1 %vm1738_vm5, %v3195_v59 }
0x102b   : > { %4646 = vmatpush3.bf16.msra.mxu0 %v4902_v21 }
0x10ec   : > { %v4625_v63 = vpop.f32.mrb[40].mxu1 }
0x10ed   : > { %v4617_v4 = vpop.f32.mrb[44].mxu0  ;;  %v3420_v61 = vmul.f32 %v6251_v35, %v4625_v63  ;;  %v3293_v0 = vpop.f32.mrb[41].mxu1 }
0x10ee   : > { %v3417_v62 = vmul.f32 %v6247_v37, %v4617_v4  ;;  %v3239_v36 = vpop.f32.mrb[45].mxu0  ;;  %v3418_v43 = vmul.f32 %v6251_v35, %v3293_v0  ;;  %v4626_v5 = vpop.f32.mrb[42].mxu1 }
0x10ef   : > { %v3442_v2 = vsel %vm1183_vm2, %v3420_v61, 0.0  ;;  %v3415_v6 = vmul.f32 %v6247_v37, %v3239_v36  ;;  %v4618_v7 = vpop.f32.mrb[46].mxu0  ;;  %v3296_v8 = vpop.f32.mrb[43].mxu1 }
0x10f0   : > { %v3441_v9 = vsel %vm1183_vm2, %v3417_v62, 0.0  ;;  %v3428_v10 = vsel %vm1099_vm0, %v3418_v43, 0.0  ;;  %v3242_v11 = vpop.f32.mrb[47].mxu0  ;;  %v3419_v12 = vmul.f32 %v6251_v35, %v3296_v8 }
0x10f1   : > { %v3443_v13 = vadd.f32 %v3442_v2, %v3441_v9  ;;  %v3427_v14 = vsel %vm1099_vm0, %v3415_v6, 0.0  ;;  %v3416_v15 = vmul.f32 %v6247_v37, %v3242_v11 }
0x10f2   : > { %v3429_v18 = vadd.f32 %v3428_v10, %v3427_v14  ;;  %v3435_v19 = vsel %vm1099_vm0, %v3419_v12, 0.0  ;;  %v4904_v14 = vld [vmem:[%s6620_s23 + $0x18] sm:$0xff]  }
0x10f3   : > { %v3434_v26 = vsel %vm1099_vm0, %v3416_v15, 0.0 }
0x10f4   : > { %v3436_v27 = vadd.f32 %v3435_v19, %v3434_v26 }
0x10f9   : > { %v4633_v28 = vpop.f32.mrb[48].mxu0 }
0x10fa   : > { %v3423_v29 = vmul.f32 %v6255_v47, %v4633_v28  ;;  %v3347_v30 = vpop.f32.mrb[49].mxu0 }
0x10fb   : > { %v3421_v31 = vmul.f32 %v6255_v47, %v3347_v30  ;;  %v4634_v32 = vpop.f32.mrb[50].mxu0 }
0x10fc   : > { %v3444_v35 = vsel %vm1183_vm2, %v3423_v29, 0.0  ;;  %v3350_v34 = vpop.f32.mrb[51].mxu0  ;;  %v4641_v39 = vpop.f32.mrb[44].mxu1 }
0x10fd   : > { %v3445_v49 = vadd.f32 %v3444_v35, %v3443_v13  ;;  %v3430_v37 = vsel %vm1099_vm0, %v3421_v31, 0.0  ;;  %v3422_v25 = vmul.f32 %v6255_v47, %v3350_v34  ;;  %v3426_v45 = vmul.f32 %v6262_v33, %v4641_v39  ;;  %v3401_v1 = vpop.f32.mrb[45].mxu1  ;;  %v4903_v13 = vld [vmem:[%s6620_s23 + $0x10] sm:$0xff]   ;;  %v4262_v35 = vld [vmem:[%s6621_s7 + $0x1] ss:$0 sm:$0xff]  ;;  %s6479_s7 = scalar_lea.hbm %s6626_s3, %s4301_s4 }
0x10fe   : > { %v3431_v38 = vadd.f32 %v3430_v37, %v3429_v18  ;;  %v3424_v22 = vmul.f32 %v6262_v33, %v3401_v1  ;;  %v4642_v3 = vpop.f32.mrb[46].mxu1  ;;  %4651 = vmatprep.subr.bf16.mxu1 %v4903_v13 }
0x10ff   : > { %v3437_v23 = vsel %vm1099_vm0, %v3422_v25, 0.0  ;;  %v3446_v40 = vsel %vm1183_vm2, %v3426_v45, 0.0  ;;  %v3404_v44 = vpop.f32.mrb[47].mxu1  ;;  %4652 = vmatpush3.bf16.msra.mxu1 %v4903_v13  ;;  %v4263_v45 = vld [vmem:[%s6622_s6 + $0x1] ss:$0 sm:$0xff]  ;;  %s3920_s6 = sshll.u32 %s1091_s5, 4  ;;  %s6481_s6 = int_to_ptr.vmem [resolvable:$true] %s3920_s6 }
0x1100   : > { %v3438_v50 = vadd.f32 %v3437_v23, %v3436_v27  ;;  %v3447_v51 = vadd.f32 %v3446_v40, %v3445_v49  ;;  %v3432_v52 = vsel %vm1099_vm0, %v3424_v22, 0.0  ;;  %v3425_v55 = vmul.f32 %v6262_v33, %v3404_v44  ;;  %4653 = vmatprep.subr.bf16.mxu1 %v4904_v14  ;;  %p5348_p7 = scmp.lt.s32.totalorder %s6481_s6, %s5346_s8 }
0x1101   : > { %v3433_v41 = vadd.f32 %v3432_v52, %v3431_v38  ;;  %v4906_v52 = vld [vmem:[%s6623_s12 + $0x48] sm:$0xff]  }
0x1102   : > { %v3439_v47 = vsel %vm1099_vm0, %v3425_v55, 0.0  ;;  %v3449_v54 = vpack.c.bf16 %v3447_v51, %v3447_v51  ;;  %v4905_v51 = vld [vmem:[%s6623_s12 + $0x40] sm:$0xff]   ;;  %v4907_v55 = vld [vmem:[%s6623_s12 + $0x50] sm:$0xff]  }
0x1103   : > { %v3440_v42 = vadd.f32 %v3439_v47, %v3438_v50  ;;  %4654 = vmatpush3.bf16.msra.mxu1 %v4904_v14  ;;  %4659 = vmatprep.subr.bf16.mxu0 %v4905_v51  ;;  %v4909_v47 = vld [vmem:[%s6623_s12 + $0x60] sm:$0xff]  }
0x1105   : > { %v3448_v58 = vpack.c.bf16 %v3440_v42, %v3433_v41  ;;  %v4908_v41 = vld [vmem:[%s6623_s12 + $0x58] sm:$0xff]   ;;  %v4910_v42 = vld [vmem:[%s6623_s12 + $0x68] sm:$0xff]  }
0x1107   : > { %4647 = vmatprep.mubr.msk.bf16.mxu0 %vm1099_vm0, %v3448_v58  ;;  %v4911_v58 = vld [vmem:[%s6623_s12 + $0x70] sm:$0xff]  }
0x1108   : > { %4648 = vmatmul.mubr.msk.bf16.vlgmr.msra.gmra.mrb[52].mxu0 %vm1099_vm0, %v3449_v54  ;;  %v4912_v54 = vld [vmem:[%s6623_s12 + $0x78] sm:$0xff]  }
0x1109   : > { %4660 = vmatpush3.bf16.msra.mxu0 %v4905_v51 }
0x110a   : > { %4661 = vmatprep.subr.bf16.mxu0 %v4906_v52 }
0x110d   : > { %4662 = vmatpush3.bf16.msra.mxu0 %v4906_v52  ;;  %v3827_v52 = vld [vmem:[%s6624_s28] sm:$0x1]  ;;  %s5341_s28 = scalar_lea.vmem %s6481_s6, 16 }
0x110e   : > { %4663 = vmatprep.subr.bf16.mxu0 %v4907_v55  ;;  %p5342_p6 = scmp.ne.s32.totalorder %s6481_s6, %s5341_s28  ;;  %p5349_p1 = scmp.lt.s32.totalorder %s5347_s9, %s5341_s28 }
0x1110   : > { %p5343_p5 = pnand %p5342_p6, %p6627_p10  ;;  %p5350_p4 = por %p5349_p1, %p5348_p7 }
0x1111   : > { %4664 = vmatpush3.bf16.msra.mxu0 %v4907_v55 }
0x1112   : > { %4665 = vmatprep.subr.bf16.mxu0 %v4908_v41  ;;  %p5344_p8 = pneg %p5343_p5 }
0x1114   : > { %p5351_p0 = pnand %p5350_p4, %p5344_p8 }
0x1115   : > { %4666 = vmatpush3.bf16.msra.mxu0 %v4908_v41  ;;  %v3828_v41 = vld [vmem:[%s6625_s1] sm:$0x1]  ;;  %s3908_s1 = scalar_lea.sflag [#allocation5], %s5898_s30 }
0x1116   : > { %4667 = vmatprep.subr.bf16.mxu0 %v4909_v47 }
0x1119   : > { %4668 = vmatpush3.bf16.msra.mxu0 %v4909_v47 }
0x111a   : > { %4669 = vmatprep.subr.bf16.mxu0 %v4910_v42 }
0x111d   : > { %4670 = vmatpush3.bf16.msra.mxu0 %v4910_v42 }
0x111e   : > { %4671 = vmatprep.subr.bf16.mxu0 %v4911_v58 }
0x1121   : > { %4672 = vmatpush3.bf16.msra.mxu0 %v4911_v58 }
0x1122   : > { %4673 = vmatprep.subr.bf16.mxu0 %v4912_v54 }
0x1125   : > { %4674 = vmatpush3.bf16.msra.mxu0 %v4912_v54  ;;  %v3849_v54 = vld [vmem:[#allocation18] sm:$0x1] }
0x11db   : > { %v4649_v16 = vpop.f32.mrb[52].mxu0 }
0x11dc   : > { %v3507_v56 = vpop.f32.mrb[53].mxu0  ;;  %v3523_v20 = vadd.f32 %v4649_v16, %v6216_v48  ;;  %v4268_v16 = vld [vmem:[#allocation15 + $0x1] ss:$0 sm:$0xff] }
0x11dd   : > { %v3521_v57 = vadd.f32 %v3507_v56, %v6213_v46  ;;  %v4650_v17 = vpop.f32.mrb[54].mxu0 }
0x11de   : > { %v3510_v59 = vpop.f32.mrb[55].mxu0  ;;  %v3534_v4 = vadd.f32 %v4259_v53, %v3523_v20 }
0x11df   : > { %v6443_v33 = vadd.f32 %v4259_v53, %v3521_v57  ;;  %v3522_v60 = vadd.f32 %v3510_v59, %v6218_v24 }
0x11e0   : > { %v3545_v0 = vsel %vm1183_vm2, %v3534_v4, 0.0 }
0x11e1   : > { %v3539_v21 = vsel %vm1099_vm0, %v6443_v33, 0.0  ;;  %v3533_v63 = vadd.f32 %v4259_v53, %v3522_v60 }
0x11e2   : > { %3540 = vadd.xlane.f32.xlu0 %v3539_v21 }
0x11e3   : > { %v3542_v61 = vsel %vm1099_vm0, %v3533_v63, 0.0 }
0x11e4   : > { %3543 = vadd.xlane.f32.xlu1 %v3542_v61 }
0x11e6   : > { %3546 = vadd.xlane.f32.xlu0 %v3545_v0 }
0x126f   : > { %v3541_v48 = vpop.xlane.xlu0 %3540 }
0x1270   : > { %v3548_v46 = vmul.f32 0.03125, %v3541_v48 }
0x1271   : > { %v3544_v62 = vpop.xlane.xlu1 %3543 }
0x1272   : > { %v3551_v36 = vsub.f32 %v6443_v33, %v3548_v46  ;;  %v3549_v24 = vmul.f32 0.03125, %v3544_v62 }
0x1273   : > { %v3547_v43 = vpop.xlane.xlu0 %3546 }
0x1274   : > { %v3552_v5 = vsub.f32 %v3533_v63, %v3549_v24  ;;  %v3550_v2 = vmul.f32 0.03125, %v3547_v43  ;;  %v3554_v6 = vmul.f32 %v3551_v36, %v3551_v36 }
0x1276   : > { %v3553_v7 = vsub.f32 %v3534_v4, %v3550_v2  ;;  %v3557_v8 = vsel %vm1099_vm0, %v3554_v6, 0.0  ;;  %v3555_v9 = vmul.f32 %v3552_v5, %v3552_v5 }
0x1277   : > { %3558 = vadd.xlane.f32.xlu1 %v3557_v8 }
0x1278   : > { %v3560_v10 = vsel %vm1099_vm0, %v3555_v9, 0.0  ;;  %v3556_v11 = vmul.f32 %v3553_v7, %v3553_v7 }
0x1279   : > { %3561 = vadd.xlane.f32.xlu0 %v3560_v10 }
0x127a   : > { %v3563_v12 = vsel %vm1183_vm2, %v3556_v11, 0.0 }
0x127b   : > { %3564 = vadd.xlane.f32.xlu1 %v3563_v12 }
0x1304   : > { %v3559_v15 = vpop.xlane.xlu1 %3558 }
0x1305   : > { %v3566_v18 = vmul.f32 0.03125, %v3559_v15 }
0x1306   : > { %v3562_v19 = vpop.xlane.xlu0 %3561 }
0x1307   : > { %v3569_v26 = vadd.f32 1e-05, %v3566_v18  ;;  %v3567_v27 = vmul.f32 0.03125, %v3562_v19 }
0x1308   : > { %v3565_v28 = vpop.xlane.xlu1 %3564 }
0x1309   : > { %5039 = vrsqrt.f32 %v3569_v26  ;;  %v3570_v29 = vadd.f32 1e-05, %v3567_v27  ;;  %v3568_v30 = vmul.f32 0.03125, %v3565_v28 }
0x130b   : > { %5041 = vrsqrt.f32 %v3570_v29  ;;  %v3571_v31 = vadd.f32 1e-05, %v3568_v30 }
0x130d   : > { %5043 = vrsqrt.f32 %v3571_v31 }
0x1313   : > { %v5040_v32 = vpop.eup %5039 }
0x1314   : > { %v3575_v34 = vmul.f32 %v5040_v32, %v3551_v36  ;;  %v4297_v32 = vld [vmem:[#allocation17 + $0x1] ss:$0 sm:$0xff] }
0x1315   : > { %v5042_v39 = vpop.eup %5041 }
0x1316   : > { %v3576_v49 = vmul.f32 %v5042_v39, %v3552_v5  ;;  %v3584_v37 = vmul.f32 %v4262_v35, %v3575_v34 }
0x1317   : > { %v5044_v25 = vpop.eup %5043 }
0x1318   : > { %v3577_v1 = vmul.f32 %v5044_v25, %v3553_v7  ;;  %v3585_v38 = vmul.f32 %v4262_v35, %v3576_v49  ;;  %v3593_v22 = vadd.f32 %v4263_v45, %v3584_v37 }
0x131a   : > { %v3594_v3 = vadd.f32 %v4263_v45, %v3585_v38  ;;  %v3586_v23 = vmul.f32 %v4262_v35, %v3577_v1 }
0x131c   : > { %v3596_v40 = vpack.c.bf16 %v3594_v3, %v3593_v22  ;;  %v3595_v44 = vadd.f32 %v4263_v45, %v3586_v23  ;;  %v4913_v3 = vld [vmem:[%s5626_s19] sm:$0xff]   ;;  %v5475_v23 = vmov 0.0  }
0x131d   : > { %4679 = vmatprep.subr.bf16.mxu1 %v5475_v23 }
0x131e   : > { %4655 = vmatprep.mubr.msk.bf16.mxu1 %vm1099_vm0, %v3596_v40  ;;  %v3597_v50 = vpack.c.bf16 %v3595_v44, %v3595_v44 }
0x1320   : > { %4656 = vmatmul.mubr.msk.bf16.vlgmr.msra.gmra.mrb[48].mxu1 %vm1099_vm0, %v3597_v50 }
0x1321   : > { %4680 = vmatpush3.bf16.msra.mxu1 %v4913_v3  ;;  %4683 = vmatprep.mubr.msk.bf16.mxu1 %vm5476_vm6, %v5475_v23 }
0x1322   : > { %4681 = vmatprep.subr.bf16.mxu1 %v5475_v23 }
0x13f3   : > { %v4657_v56 = vpop.f32.mrb[48].mxu1 }
0x13f4   : > { %v3672_v53 = vadd.f32 %v4657_v56, %v4268_v16  ;;  %v3663_v20 = vpop.f32.mrb[49].mxu1 }
0x13f5   : > { %v3664_v57 = vadd.f32 %v4268_v16, %v3663_v20  ;;  %v4658_v17 = vpop.f32.mrb[50].mxu1 }
0x13f6   : > { %v3682_v59 = vmul.f32 0.044715, %v3672_v53  ;;  %v3666_v60 = vpop.f32.mrb[51].mxu1  ;;  %v3679_v13 = vmul.f32 0.5, %v3672_v53 }
0x13f7   : > { %v3680_v21 = vmul.f32 0.044715, %v3664_v57  ;;  %v3667_v63 = vadd.f32 %v4268_v16, %v3666_v60  ;;  %v3677_v14 = vmul.f32 0.5, %v3664_v57 }
0x13f8   : > { %v3685_v4 = vmul.f32 %v3682_v59, %v3672_v53 }
0x13f9   : > { %v3683_v61 = vmul.f32 %v3680_v21, %v3664_v57  ;;  %v3681_v0 = vmul.f32 0.044715, %v3667_v63  ;;  %v3678_v15 = vmul.f32 0.5, %v3667_v63 }
0x13fa   : > { %v3688_v48 = vmul.f32 %v3685_v4, %v3672_v53 }
0x13fb   : > { %v3686_v46 = vmul.f32 %v3683_v61, %v3664_v57  ;;  %v3684_v62 = vmul.f32 %v3681_v0, %v3667_v63 }
0x13fc   : > { %v3691_v36 = vadd.f32 %v3688_v48, %v3672_v53 }
0x13fd   : > { %v3687_v24 = vmul.f32 %v3684_v62, %v3667_v63  ;;  %v3689_v43 = vadd.f32 %v3686_v46, %v3664_v57 }
0x13fe   : > { %v3694_v5 = vmul.f32 0.7978846, %v3691_v36 }
0x13ff   : > { %v3690_v2 = vadd.f32 %v3687_v24, %v3667_v63  ;;  %v3692_v6 = vmul.f32 0.7978846, %v3689_v43 }
0x1400   : > { %5045 = vtanh.f32 %v3694_v5 }
0x1401   : > { %v3693_v7 = vmul.f32 0.7978846, %v3690_v2  ;;  %5047 = vtanh.f32 %v3692_v6 }
0x1403   : > { %5049 = vtanh.f32 %v3693_v7 }
0x140a   : > { %v5046_v8 = vpop.eup %5045 }
0x140b   : > { %v5048_v9 = vpop.eup %5047  ;;  %v3700_v10 = vadd.f32 1.0, %v5046_v8 }
0x140c   : > { %v3698_v11 = vadd.f32 1.0, %v5048_v9 }
0x140d   : > { %v5050_v12 = vpop.eup %5049  ;;  %v3703_v19 = vmul.f32 %v3700_v10, %v3679_v13 }
0x140e   : > { %v3699_v18 = vadd.f32 1.0, %v5050_v12  ;;  %v3701_v26 = vmul.f32 %v3698_v11, %v3677_v14 }
0x140f   : > { %v3705_v29 = vpack.c.bf16 %v3703_v19, %v3703_v19 }
0x1410   : > { %v3702_v27 = vmul.f32 %v3699_v18, %v3678_v15 }
0x1412   : > { %v3704_v28 = vpack.c.bf16 %v3702_v27, %v3701_v26 }
0x1414   : > { %4675 = vmatprep.mubr.bf16.mxu0 %v3704_v28 }
0x1415   : > { %4676 = vmatmul.mubr.bf16.vlgmr.msra.gmra.mrb[56].mxu0 %v3705_v29 }
0x14e8   : > { %v4677_v30 = vpop.f32.mrb[56].mxu0 }
0x14e9   : > { %v3805_v31 = vpop.f32.mrb[57].mxu0 }
0x14ea   : > { %v3817_v35 = vadd.f32 %v3805_v31, %v6443_v33  ;;  %v4678_v34 = vpop.f32.mrb[58].mxu0  ;;  %v4914_v33 = vld [vmem:[%s5626_s19 + $0x8] sm:$0xff]  }
0x14eb   : > { %v3808_v39 = vpop.f32.mrb[59].mxu0  ;;  %4682 = vmatpush3.bf16.msra.mxu1 %v4914_v33 }
0x14ec   : > { %v3826_v49 = vadd.f32 %v4297_v32, %v3817_v35 }
0x14ee   : > { %v3829_v37 = vsel %vm1094_vm1, %v3826_v49, 0.0 }
0x14ef   : > { %3830 = vadd.xlane.f32.xlu0 %v3829_v37 }
0x157c   : > { %v3831_v25 = vpop.xlane.xlu0 %3830 }
0x157d   : > { %v3832_v45 = vmul.f32 0.03125, %v3831_v25 }
0x157f   : > { %v3833_v1 = vsub.f32 %v3826_v49, %v3832_v45 }
0x1581   : > { %v3834_v38 = vmul.f32 %v3833_v1, %v3833_v1 }
0x1583   : > { %v3835_v22 = vsel %vm1094_vm1, %v3834_v38, 0.0 }
0x1584   : > { %3836 = vadd.xlane.f32.xlu1 %v3835_v22 }
0x1611   : > { %v3837_v40 = vpop.xlane.xlu1 %3836 }
0x1612   : > { %v3838_v44 = vmul.f32 0.03125, %v3837_v40 }
0x1614   : > { %v3839_v50 = vadd.f32 1e-05, %v3838_v44 }
0x1616   : > { %5051 = vrsqrt.f32 %v3839_v50 }
0x1620   : > { %v5052_v51 = vpop.eup %5051 }
0x1621   : > { %v3841_v55 = vmul.f32 %v5052_v51, %v3833_v1 }
0x1623   : > { %v3842_v47 = vmul.f32 %v3841_v55, %v3827_v52 }
0x1625   : > { %v3843_v42 = vadd.f32 %v3842_v47, %v3828_v41 }
0x1627   : > { %v3844_v58 = vpack.c.bf16 %v3843_v42, %v3843_v42 }
0x1629   : > { %4684 = vmatmul.mubr.msk.bf16.vlgmr.msra.gmra.mrb[52].mxu1 %vm1099_vm0, %v3844_v58 }
0x16fc   : > { %v3899_v16 = vpop.f32.mrb[52].mxu1 }
0x16fd   : > { %v3900_v56 = vadd.f32 %v3899_v16, %v3849_v54  ;;  %v4685_v53 = vpop.f32.mrb[53].mxu1 }
0x16fe   : > { %v3902_v20 = vpop.f32.mrb[54].mxu1 }
0x16ff   : > { %v4686_v57 = vpop.f32.mrb[55].mxu1  ;;  %3906 = vst.msk [vmem:[%s1091_s5] sm:$0x1] %vm3905_vm7, %v3900_v56 }
0x1700   : > { %5354 = shalt.err (!%p5351_p0)
}
0x1701   : > { %s5355_s5 = scalar_lea.hbm %s6479_s7, 16  ;;  %s5359_s30 = scalar_lea.hbm %s6626_s3, 32 }
0x1702   : > { %p5356_p9 = scmp.ne.s32.totalorder %s6479_s7, %s5355_s5  ;;  %p5360_p12 = scmp.lt.u32.totalorder %s6479_s7, %s6626_s3 }
0x1703   : > { %p5361_p13 = scmp.lt.u32.totalorder %s5359_s30, %s5355_s5  ;;  %p5363_p6 = scmp.lt.u32.totalorder %s5355_s5, %s6479_s7 }
0x1704   : > { %p5357_p3 = pnand %p5356_p9, %p6627_p10 }
0x1705   : > { %p5362_p2 = por %p5361_p13, %p5360_p12 }
0x1706   : > { %p5358_p11 = pneg %p5357_p3 }
0x1707   : > { %p5364_p5 = por %p5363_p6, %p5362_p2 }
0x1709   : > { %p5365_p8 = pnand %p5364_p5, %p5358_p11 }
0x170b   : > { %5368 = shalt.err (!%p5365_p8)
}
0x170c   : > { %4747 = dma.vmem_to_hbm [thread:$0]  (%p6627_p10), %s6481_s6, 16, %s6479_s7, %s3908_s1  }
0x170d PF: > { %s3932_s9 = sand.u32 1, %s5419_s15   ;;  %p6628_p7 = scmp.ne.s32.totalorder %s6595_s27, 0 }
0x170e   : > { %p6629_p1 = scmp.ge.s32.totalorder %s5431_s22, 2  ;;  %s3933_s8 = scalar_lea.sflag [#allocation5], %s3932_s9 }
0x1710   : > { %p4782_p4 = pnand %p6629_p1, %p6628_p7 }
0x1712   : > { %5414 = dma.done.wait (!%p4782_p4), %s3933_s8, 16  }
0x1713   : > { %5416 = vsyncadd (!%p4782_p4), %s3933_s8, 4294967280  ;;  %p81_p0 = scmp.ge.s32.totalorder %s5803_s2, 4   ;;  %s6630_s15 = smov %s5423_s16 }
0x1714   : > { %s6631_s16 = smov %s5427_s18  ;;  %s6632_s18 = smov %s5814_s0 }
0x1715   : > { %s6633_s22 = smov %s5803_s2  ;;  %83 = sbr.rel (!%p81_p0) target bundleno = 74 (0x4a), region = 276 }
0x171c   :  { %3937 = vsyncpa [#allocation4], 1 }
0x171d   :  { %3939 = vsyncpa [#allocation4 + $0x1], 1 }
0x171e   :  { %3940 = vsyncpa [#allocation7], 1 }
0x171f   :  { %3942 = vsyncpa [#allocation7 + $0x1], 1 }
0x1720   :  { %3943 = vsyncpa [#allocation10], 1 }
0x1721   :  { %3944 = vsyncpa [#allocation13], 1 }
0x1722   :  { %3945 = vsyncpa [#allocation16], 1 }
0x1723   :  { %3946 = vsyncpa [#allocation19], 1 }
0x1724   :  { %3947 = vsyncpa [#allocation5], 1 }
0x1725   :  { %3949 = vsyncpa [#allocation5 + $0x1], 1 }

</bundles_post_ra>
